<compile_context>
chip_gen: v6e
topology: v6e:2x2x1
jax: 0.10.0
libtpu: 0.0.40
codegen_flags: <defaults>
</compile_context>

<pallas_src>
import numpy as np
import jax
import jax.numpy as jnp
from jax import lax
from jax.experimental import pallas as pl
from jax.experimental.pallas import tpu as pltpu


def msnet_kernel(p1_ref, w1_ref, b1_ref,
                 wf_ref, bf_ref,
                 w3_ref, b3_ref, w5_ref, b5_ref, w7_ref, b7_ref,
                 o_ref):
    patches = p1_ref[...]                         # (TB, L1, 8) stem im2col patches
    TB, L1, K1 = patches.shape

    # ---- conv1: Conv1d(1, 64, k=8, stride=2, pad=4) as one matmul ----
    h = jnp.dot(patches.reshape(TB * L1, K1), w1_ref[...],
                preferred_element_type=jnp.float32)
    h = (h + b1_ref[...]).reshape(TB, L1, 64)     # (TB, L1, 64)

    # ---- MaxPool1d(kernel=2, stride=2); all lengths here are even/aligned ----
    def pool2x(t):
        b_, l_, c_ = t.shape
        return t.reshape(b_, l_ // 2, 2, c_).max(axis=2)

    h = pool2x(h)                                 # (TB, L1/2, 64)

    # ---- stride-1 "same" Conv1d via tap-summed MXU matmuls ----
    def conv_same(t, w_ref, b_ref):
        b_, l_, cin = t.shape
        w = w_ref[...]                            # (K, Cin, Cout)
        K, _, cout = w.shape
        p = (K - 1) // 2
        zp = jnp.zeros((b_, p, cin), t.dtype)
        tp = jnp.concatenate([zp, t, zp], axis=1)         # (TB, l+2p, Cin)
        # accumulator starts from the bias (saves a zero fill + broadcast add)
        acc = jnp.broadcast_to(b_ref[...], (b_ * l_, cout))
        for j in range(K):                                # static unroll
            acc = acc + jnp.dot(tp[:, j:j + l_, :].reshape(b_ * l_, cin),
                                w[j], preferred_element_type=jnp.float32)
        return acc.reshape(b_, l_, cout)

    # fused first convs of the three branches: K=7, Cout = 3*64 = 192
    hf = pool2x(conv_same(h, wf_ref, bf_ref))             # (TB, L1/4, 192)

    # second conv + pool of each branch (their inputs differ, so kept separate)
    y1 = pool2x(conv_same(hf[:, :, 0:64],    w3_ref, b3_ref))   # (TB, 8, 128)
    y2 = pool2x(conv_same(hf[:, :, 64:128],  w5_ref, b5_ref))   # (TB, 8, 128)
    y3 = pool2x(conv_same(hf[:, :, 128:192], w7_ref, b7_ref))   # (TB, 8, 128)

    # pool2: MaxPool1d(kernel=8, stride=1); final length is exactly 8 -> 1.
    out = jnp.concatenate([y1.max(axis=1), y2.max(axis=1), y3.max(axis=1)],
                          axis=-1)                        # (TB, 384) lane-dense
    o_ref[...] = out.reshape(TB, 1, 384)


def _pick_batch_tile(B):
    # Prefer >= 2 grid steps (megacore on v7x) with at most 8 batch rows/step.
    for tb in (8, 4, 2):
        if B % tb == 0 and B // tb >= 2:
            return tb
    return 1


def init_params(key):
    """Deterministic PyTorch-default-style (uniform +-1/sqrt(fan_in)) init."""
    def conv_init(k, cout, cin, ksz):
        kw, kb = jax.random.split(k)
        bound = 1.0 / float(np.sqrt(cin * ksz))
        w = jax.random.uniform(kw, (cout, cin, ksz), jnp.float32, -bound, bound)
        b = jax.random.uniform(kb, (cout,), jnp.float32, -bound, bound)
        return w, b
    ks = jax.random.split(key, 7)
    return {
        "conv1":   conv_init(ks[0], 64, 1, 8),
        "conv3_1": conv_init(ks[1], 64, 64, 3),
        "conv3_2": conv_init(ks[2], 128, 64, 3),
        "conv5_1": conv_init(ks[3], 64, 64, 5),
        "conv5_2": conv_init(ks[4], 128, 64, 5),
        "conv7_1": conv_init(ks[5], 64, 64, 7),
        "conv7_2": conv_init(ks[6], 128, 64, 7),
    }


@jax.jit
def msnet_forward(x, params):
    # x: (B, 1, L) float32, PyTorch NCL convention.
    B, cin, L = x.shape
    assert cin == 1
    L1_full = L // 2 + 1              # conv1 output length (stride 2, pad 4)
    L1 = (L1_full // 2) * 2           # truncate: the trailing odd position is
                                      # dropped by the floor-mode MaxPool(2,2)
    lfin = ((L1 // 2) // 2) // 2      # length entering MaxPool1d(8, 1)
    assert lfin == 8, "kernel hard-wires the final MaxPool1d(8,1) as a full reduction"

    x2d = x[:, 0, :]                                           # (B, L)
    # Glue: strided im2col for the stride-2 stem conv (tiny at these shapes);
    # all matmuls, bias adds and poolings run inside the Pallas kernel.
    xp = jnp.pad(x2d, ((0, 0), (4, 4)))                        # (B, L+8)
    patches1 = jnp.stack([xp[:, k::2][:, :L1] for k in range(8)], axis=-1)  # (B, L1, 8)

    w1, b1 = params["conv1"]
    w1r = jnp.transpose(w1[:, 0, :])                           # (8, 64)
    b1r = b1.reshape(1, 64)

    def tr(name):
        w, b = params[name]
        return jnp.transpose(w, (2, 1, 0)), b.reshape(1, -1)   # (K,Cin,Cout),(1,Cout)

    # Fuse the three branches' first convs: zero-pad conv3_1/conv5_1 taps to K=7
    # and concatenate output channels -> one (7, 64, 192) weight.
    def pad_taps(w, k_to):
        p = (k_to - w.shape[0]) // 2
        return jnp.pad(w, ((p, p), (0, 0), (0, 0)))

    w3a, b3a = tr("conv3_1")
    w5a, b5a = tr("conv5_1")
    w7a, b7a = tr("conv7_1")
    wfa = jnp.concatenate([pad_taps(w3a, 7), pad_taps(w5a, 7), w7a], axis=-1)  # (7,64,192)
    bfa = jnp.concatenate([b3a, b5a, b7a], axis=-1)                            # (1,192)

    w3b, b3b = tr("conv3_2")
    w5b, b5b = tr("conv5_2")
    w7b, b7b = tr("conv7_2")

    TB = _pick_batch_tile(B)
    grid = (B // TB,)

    def resident(shape):              # constant block index -> DMA'd once, stays resident
        n = len(shape)
        return pl.BlockSpec(shape, lambda i, _n=n: (0,) * _n)

    in_specs = [
        pl.BlockSpec((TB, L1, 8), lambda i: (i, 0, 0)),        # stem patches / batch tile
        resident((8, 64)),      resident((1, 64)),             # conv1
        resident((7, 64, 192)), resident((1, 192)),            # fused conv{3,5,7}_1
        resident((3, 64, 128)), resident((1, 128)),            # conv3_2
        resident((5, 64, 128)), resident((1, 128)),            # conv5_2
        resident((7, 64, 128)), resident((1, 128)),            # conv7_2
    ]
    out_specs = pl.BlockSpec((TB, 1, 384), lambda i: (i, 0, 0))

    out = pl.pallas_call(
        msnet_kernel,
        out_shape=jax.ShapeDtypeStruct((B, 1, 384), jnp.float32),
        grid=grid,
        in_specs=in_specs,
        out_specs=out_specs,
        compiler_params=pltpu.CompilerParams(
            dimension_semantics=("parallel",)),
    )(patches1, w1r, b1r, wfa, bfa, w3b, b3b, w5b, b5b, w7b, b7b)

    out = out.reshape(B, 384)
    return out[:, 0:128], out[:, 128:256], out[:, 256:384]


def msnet_reference(x, params):
    """Pure-JAX reference matching the PyTorch forward exactly."""
    def conv1d(t, w, b, stride, pad):
        y = lax.conv_general_dilated(t, w, window_strides=(stride,),
                                     padding=[(pad, pad)],
                                     dimension_numbers=("NCH", "OIH", "NCH"))
        return y + b[None, :, None]

    def maxpool(t, k, s):
        return lax.reduce_window(t, -jnp.inf, lax.max,
                                 window_dimensions=(1, 1, k),
                                 window_strides=(1, 1, s), padding="VALID")

    w1, b1 = params["conv1"]
    h = maxpool(conv1d(x, w1, b1, 2, 4), 2, 2)

    def br(n1, n2, K):
        wa, ba = params[n1]
        wb, bb = params[n2]
        y = maxpool(conv1d(h, wa, ba, 1, (K - 1) // 2), 2, 2)
        y = maxpool(conv1d(y, wb, bb, 1, (K - 1) // 2), 2, 2)
        y = maxpool(y, 8, 1)
        return y.reshape(y.shape[0], -1)

    return (br("conv3_1", "conv3_2", 3),
            br("conv5_1", "conv5_2", 5),
            br("conv7_1", "conv7_2", 7))


if __name__ == "__main__":
    key = jax.random.PRNGKey(0)
    kp, kx = jax.random.split(key)
    params = init_params(kp)

    B, L = 2, 128
    x = jax.random.normal(kx, (B, 1, L), jnp.float32)

    outs = jax.block_until_ready(msnet_forward(x, params))
    refs = msnet_reference(x, params)
    for o, r in zip(outs, refs):
        np.testing.assert_allclose(np.asarray(o), np.asarray(r),
                                   rtol=1e-4, atol=1e-4)
    print("KERNEL_OK")
</pallas_src>

<mosaic_0001>
module attributes {stable_mosaic.version = 11 : i64} {
  func.func @msnet_kernel(%arg0: i32, %arg1: memref<1x64x8xf32, #tpu.memory_space<vmem>>, %arg2: memref<8x64xf32, #tpu.memory_space<vmem>>, %arg3: memref<1x64xf32, #tpu.memory_space<vmem>>, %arg4: memref<7x64x192xf32, #tpu.memory_space<vmem>>, %arg5: memref<1x192xf32, #tpu.memory_space<vmem>>, %arg6: memref<3x64x128xf32, #tpu.memory_space<vmem>>, %arg7: memref<1x128xf32, #tpu.memory_space<vmem>>, %arg8: memref<5x64x128xf32, #tpu.memory_space<vmem>>, %arg9: memref<1x128xf32, #tpu.memory_space<vmem>>, %arg10: memref<7x64x128xf32, #tpu.memory_space<vmem>>, %arg11: memref<1x128xf32, #tpu.memory_space<vmem>>, %arg12: memref<1x1x384xf32, #tpu.memory_space<vmem>>) attributes {dimension_semantics = [#tpu.dimension_semantics<parallel>], iteration_bounds = array<i64: 2>, scalar_prefetch = 0 : i64, scratch_operands = 0 : i64, tpu.core_type = #tpu.core_type<tc>, window_params = [{transform_indices = @transform_0, window_bounds = array<i64: 1, 64, 8>}, {pipeline_mode = #tpu.pipeline_mode<synchronous>, transform_indices = @transform_1, window_bounds = array<i64: 8, 64>}, {pipeline_mode = #tpu.pipeline_mode<synchronous>, transform_indices = @transform_2, window_bounds = array<i64: 1, 64>}, {pipeline_mode = #tpu.pipeline_mode<synchronous>, transform_indices = @transform_3, window_bounds = array<i64: 7, 64, 192>}, {pipeline_mode = #tpu.pipeline_mode<synchronous>, transform_indices = @transform_4, window_bounds = array<i64: 1, 192>}, {pipeline_mode = #tpu.pipeline_mode<synchronous>, transform_indices = @transform_5, window_bounds = array<i64: 3, 64, 128>}, {pipeline_mode = #tpu.pipeline_mode<synchronous>, transform_indices = @transform_6, window_bounds = array<i64: 1, 128>}, {pipeline_mode = #tpu.pipeline_mode<synchronous>, transform_indices = @transform_7, window_bounds = array<i64: 5, 64, 128>}, {pipeline_mode = #tpu.pipeline_mode<synchronous>, transform_indices = @transform_8, window_bounds = array<i64: 1, 128>}, {pipeline_mode = #tpu.pipeline_mode<synchronous>, transform_indices = @transform_9, window_bounds = array<i64: 7, 64, 128>}, {pipeline_mode = #tpu.pipeline_mode<synchronous>, transform_indices = @transform_10, window_bounds = array<i64: 1, 128>}, {transform_indices = @transform_11, window_bounds = array<i64: 1, 1, 384>}]} {
    %c0 = arith.constant 0 : index
    %c0_0 = arith.constant 0 : index
    %c0_1 = arith.constant 0 : index
    %0 = vector.load %arg1[%c0, %c0_0, %c0_1] : memref<1x64x8xf32, #tpu.memory_space<vmem>>, vector<1x64x8xf32>
    %1 = vector.shape_cast %0 : vector<1x64x8xf32> to vector<64x8xf32>
    %c0_2 = arith.constant 0 : index
    %c0_3 = arith.constant 0 : index
    %2 = vector.load %arg2[%c0_2, %c0_3] : memref<8x64xf32, #tpu.memory_space<vmem>>, vector<8x64xf32>
    %cst = arith.constant dense<0.000000e+00> : vector<64x64xf32>
    %3 = tpu.matmul %1, %2, %cst {dimension_numbers = #tpu.dot_dimension_numbers<[1], [0], [0], [1], [0, 0, 1, 1], [], []>} : vector<64x8xf32>, vector<8x64xf32>, vector<64x64xf32> -> vector<64x64xf32>
    %c0_4 = arith.constant 0 : index
    %c0_5 = arith.constant 0 : index
    %4 = vector.load %arg3[%c0_4, %c0_5] : memref<1x64xf32, #tpu.memory_space<vmem>>, vector<1x64xf32>
    %5 = vector.broadcast %4 : vector<1x64xf32> to vector<64x64xf32>
    %6 = arith.addf %3, %5 : vector<64x64xf32>
    %7 = vector.shape_cast %6 : vector<64x64xf32> to vector<1x64x64xf32>
    %8 = vector.shape_cast %7 : vector<1x64x64xf32> to vector<1x32x2x64xf32>
    %cst_6 = arith.constant dense<0xFF800000> : vector<1x32x64xf32>
    %9 = vector.multi_reduction <maximumf>, %8, %cst_6 [2] : vector<1x32x2x64xf32> to vector<1x32x64xf32>
    %c0_7 = arith.constant 0 : index
    %c0_8 = arith.constant 0 : index
    %c0_9 = arith.constant 0 : index
    %10 = vector.load %arg4[%c0_7, %c0_8, %c0_9] : memref<7x64x192xf32, #tpu.memory_space<vmem>>, vector<7x64x192xf32>
    %cst_10 = arith.constant 0.000000e+00 : f32
    %11 = vector.broadcast %cst_10 : f32 to vector<1x3x64xf32>
    %12 = tpu.concatenate %11, %9, %11 in 1 : vector<1x3x64xf32>, vector<1x32x64xf32>, vector<1x3x64xf32> -> vector<1x38x64xf32>
    %c0_11 = arith.constant 0 : index
    %c0_12 = arith.constant 0 : index
    %13 = vector.load %arg5[%c0_11, %c0_12] : memref<1x192xf32, #tpu.memory_space<vmem>>, vector<1x192xf32>
    %14 = vector.shape_cast %13 : vector<1x192xf32> to vector<1x192xf32>
    %15 = vector.broadcast %14 : vector<1x192xf32> to vector<32x192xf32>
    %16 = vector.extract_strided_slice %12 {offsets = [0, 0, 0], sizes = [1, 32, 64], strides = [1, 1, 1]} : vector<1x38x64xf32> to vector<1x32x64xf32>
    %17 = vector.shape_cast %16 : vector<1x32x64xf32> to vector<32x64xf32>
    %18 = vector.extract_strided_slice %10 {offsets = [0, 0, 0], sizes = [1, 64, 192], strides = [1, 1, 1]} : vector<7x64x192xf32> to vector<1x64x192xf32>
    %19 = vector.shape_cast %18 : vector<1x64x192xf32> to vector<64x192xf32>
    %cst_13 = arith.constant dense<0.000000e+00> : vector<32x192xf32>
    %20 = tpu.matmul %17, %19, %cst_13 {dimension_numbers = #tpu.dot_dimension_numbers<[1], [0], [0], [1], [0, 0, 1, 1], [], []>} : vector<32x64xf32>, vector<64x192xf32>, vector<32x192xf32> -> vector<32x192xf32>
    %21 = arith.addf %15, %20 : vector<32x192xf32>
    %22 = vector.extract_strided_slice %12 {offsets = [0, 1, 0], sizes = [1, 32, 64], strides = [1, 1, 1]} : vector<1x38x64xf32> to vector<1x32x64xf32>
    %23 = vector.shape_cast %22 : vector<1x32x64xf32> to vector<32x64xf32>
    %24 = vector.extract_strided_slice %10 {offsets = [1, 0, 0], sizes = [1, 64, 192], strides = [1, 1, 1]} : vector<7x64x192xf32> to vector<1x64x192xf32>
    %25 = vector.shape_cast %24 : vector<1x64x192xf32> to vector<64x192xf32>
    %cst_14 = arith.constant dense<0.000000e+00> : vector<32x192xf32>
    %26 = tpu.matmul %23, %25, %cst_14 {dimension_numbers = #tpu.dot_dimension_numbers<[1], [0], [0], [1], [0, 0, 1, 1], [], []>} : vector<32x64xf32>, vector<64x192xf32>, vector<32x192xf32> -> vector<32x192xf32>
    %27 = arith.addf %21, %26 : vector<32x192xf32>
    %28 = vector.extract_strided_slice %12 {offsets = [0, 2, 0], sizes = [1, 32, 64], strides = [1, 1, 1]} : vector<1x38x64xf32> to vector<1x32x64xf32>
    %29 = vector.shape_cast %28 : vector<1x32x64xf32> to vector<32x64xf32>
    %30 = vector.extract_strided_slice %10 {offsets = [2, 0, 0], sizes = [1, 64, 192], strides = [1, 1, 1]} : vector<7x64x192xf32> to vector<1x64x192xf32>
    %31 = vector.shape_cast %30 : vector<1x64x192xf32> to vector<64x192xf32>
    %cst_15 = arith.constant dense<0.000000e+00> : vector<32x192xf32>
    %32 = tpu.matmul %29, %31, %cst_15 {dimension_numbers = #tpu.dot_dimension_numbers<[1], [0], [0], [1], [0, 0, 1, 1], [], []>} : vector<32x64xf32>, vector<64x192xf32>, vector<32x192xf32> -> vector<32x192xf32>
    %33 = arith.addf %27, %32 : vector<32x192xf32>
    %34 = vector.extract_strided_slice %12 {offsets = [0, 3, 0], sizes = [1, 32, 64], strides = [1, 1, 1]} : vector<1x38x64xf32> to vector<1x32x64xf32>
    %35 = vector.shape_cast %34 : vector<1x32x64xf32> to vector<32x64xf32>
    %36 = vector.extract_strided_slice %10 {offsets = [3, 0, 0], sizes = [1, 64, 192], strides = [1, 1, 1]} : vector<7x64x192xf32> to vector<1x64x192xf32>
    %37 = vector.shape_cast %36 : vector<1x64x192xf32> to vector<64x192xf32>
    %cst_16 = arith.constant dense<0.000000e+00> : vector<32x192xf32>
    %38 = tpu.matmul %35, %37, %cst_16 {dimension_numbers = #tpu.dot_dimension_numbers<[1], [0], [0], [1], [0, 0, 1, 1], [], []>} : vector<32x64xf32>, vector<64x192xf32>, vector<32x192xf32> -> vector<32x192xf32>
    %39 = arith.addf %33, %38 : vector<32x192xf32>
    %40 = vector.extract_strided_slice %12 {offsets = [0, 4, 0], sizes = [1, 32, 64], strides = [1, 1, 1]} : vector<1x38x64xf32> to vector<1x32x64xf32>
    %41 = vector.shape_cast %40 : vector<1x32x64xf32> to vector<32x64xf32>
    %42 = vector.extract_strided_slice %10 {offsets = [4, 0, 0], sizes = [1, 64, 192], strides = [1, 1, 1]} : vector<7x64x192xf32> to vector<1x64x192xf32>
    %43 = vector.shape_cast %42 : vector<1x64x192xf32> to vector<64x192xf32>
    %cst_17 = arith.constant dense<0.000000e+00> : vector<32x192xf32>
    %44 = tpu.matmul %41, %43, %cst_17 {dimension_numbers = #tpu.dot_dimension_numbers<[1], [0], [0], [1], [0, 0, 1, 1], [], []>} : vector<32x64xf32>, vector<64x192xf32>, vector<32x192xf32> -> vector<32x192xf32>
    %45 = arith.addf %39, %44 : vector<32x192xf32>
    %46 = vector.extract_strided_slice %12 {offsets = [0, 5, 0], sizes = [1, 32, 64], strides = [1, 1, 1]} : vector<1x38x64xf32> to vector<1x32x64xf32>
    %47 = vector.shape_cast %46 : vector<1x32x64xf32> to vector<32x64xf32>
    %48 = vector.extract_strided_slice %10 {offsets = [5, 0, 0], sizes = [1, 64, 192], strides = [1, 1, 1]} : vector<7x64x192xf32> to vector<1x64x192xf32>
    %49 = vector.shape_cast %48 : vector<1x64x192xf32> to vector<64x192xf32>
    %cst_18 = arith.constant dense<0.000000e+00> : vector<32x192xf32>
    %50 = tpu.matmul %47, %49, %cst_18 {dimension_numbers = #tpu.dot_dimension_numbers<[1], [0], [0], [1], [0, 0, 1, 1], [], []>} : vector<32x64xf32>, vector<64x192xf32>, vector<32x192xf32> -> vector<32x192xf32>
    %51 = arith.addf %45, %50 : vector<32x192xf32>
    %52 = vector.extract_strided_slice %12 {offsets = [0, 6, 0], sizes = [1, 32, 64], strides = [1, 1, 1]} : vector<1x38x64xf32> to vector<1x32x64xf32>
    %53 = vector.shape_cast %52 : vector<1x32x64xf32> to vector<32x64xf32>
    %54 = vector.extract_strided_slice %10 {offsets = [6, 0, 0], sizes = [1, 64, 192], strides = [1, 1, 1]} : vector<7x64x192xf32> to vector<1x64x192xf32>
    %55 = vector.shape_cast %54 : vector<1x64x192xf32> to vector<64x192xf32>
    %cst_19 = arith.constant dense<0.000000e+00> : vector<32x192xf32>
    %56 = tpu.matmul %53, %55, %cst_19 {dimension_numbers = #tpu.dot_dimension_numbers<[1], [0], [0], [1], [0, 0, 1, 1], [], []>} : vector<32x64xf32>, vector<64x192xf32>, vector<32x192xf32> -> vector<32x192xf32>
    %57 = arith.addf %51, %56 : vector<32x192xf32>
    %58 = vector.shape_cast %57 : vector<32x192xf32> to vector<1x32x192xf32>
    %59 = vector.shape_cast %58 : vector<1x32x192xf32> to vector<1x16x2x192xf32>
    %cst_20 = arith.constant dense<0xFF800000> : vector<1x16x192xf32>
    %60 = vector.multi_reduction <maximumf>, %59, %cst_20 [2] : vector<1x16x2x192xf32> to vector<1x16x192xf32>
    %61 = vector.extract_strided_slice %60 {offsets = [0, 0, 0], sizes = [1, 16, 64], strides = [1, 1, 1]} : vector<1x16x192xf32> to vector<1x16x64xf32>
    %c0_21 = arith.constant 0 : index
    %c0_22 = arith.constant 0 : index
    %c0_23 = arith.constant 0 : index
    %62 = vector.load %arg6[%c0_21, %c0_22, %c0_23] : memref<3x64x128xf32, #tpu.memory_space<vmem>>, vector<3x64x128xf32>
    %cst_24 = arith.constant 0.000000e+00 : f32
    %63 = vector.broadcast %cst_24 : f32 to vector<1x1x64xf32>
    %64 = tpu.concatenate %63, %61, %63 in 1 : vector<1x1x64xf32>, vector<1x16x64xf32>, vector<1x1x64xf32> -> vector<1x18x64xf32>
    %c0_25 = arith.constant 0 : index
    %c0_26 = arith.constant 0 : index
    %65 = vector.load %arg7[%c0_25, %c0_26] : memref<1x128xf32, #tpu.memory_space<vmem>>, vector<1x128xf32>
    %66 = vector.shape_cast %65 : vector<1x128xf32> to vector<1x128xf32>
    %67 = vector.broadcast %66 : vector<1x128xf32> to vector<16x128xf32>
    %68 = vector.extract_strided_slice %64 {offsets = [0, 0, 0], sizes = [1, 16, 64], strides = [1, 1, 1]} : vector<1x18x64xf32> to vector<1x16x64xf32>
    %69 = vector.shape_cast %68 : vector<1x16x64xf32> to vector<16x64xf32>
    %70 = vector.extract_strided_slice %62 {offsets = [0, 0, 0], sizes = [1, 64, 128], strides = [1, 1, 1]} : vector<3x64x128xf32> to vector<1x64x128xf32>
    %71 = vector.shape_cast %70 : vector<1x64x128xf32> to vector<64x128xf32>
    %cst_27 = arith.constant dense<0.000000e+00> : vector<16x128xf32>
    %72 = tpu.matmul %69, %71, %cst_27 {dimension_numbers = #tpu.dot_dimension_numbers<[1], [0], [0], [1], [0, 0, 1, 1], [], []>} : vector<16x64xf32>, vector<64x128xf32>, vector<16x128xf32> -> vector<16x128xf32>
    %73 = arith.addf %67, %72 : vector<16x128xf32>
    %74 = vector.extract_strided_slice %64 {offsets = [0, 1, 0], sizes = [1, 16, 64], strides = [1, 1, 1]} : vector<1x18x64xf32> to vector<1x16x64xf32>
    %75 = vector.shape_cast %74 : vector<1x16x64xf32> to vector<16x64xf32>
    %76 = vector.extract_strided_slice %62 {offsets = [1, 0, 0], sizes = [1, 64, 128], strides = [1, 1, 1]} : vector<3x64x128xf32> to vector<1x64x128xf32>
    %77 = vector.shape_cast %76 : vector<1x64x128xf32> to vector<64x128xf32>
    %cst_28 = arith.constant dense<0.000000e+00> : vector<16x128xf32>
    %78 = tpu.matmul %75, %77, %cst_28 {dimension_numbers = #tpu.dot_dimension_numbers<[1], [0], [0], [1], [0, 0, 1, 1], [], []>} : vector<16x64xf32>, vector<64x128xf32>, vector<16x128xf32> -> vector<16x128xf32>
    %79 = arith.addf %73, %78 : vector<16x128xf32>
    %80 = vector.extract_strided_slice %64 {offsets = [0, 2, 0], sizes = [1, 16, 64], strides = [1, 1, 1]} : vector<1x18x64xf32> to vector<1x16x64xf32>
    %81 = vector.shape_cast %80 : vector<1x16x64xf32> to vector<16x64xf32>
    %82 = vector.extract_strided_slice %62 {offsets = [2, 0, 0], sizes = [1, 64, 128], strides = [1, 1, 1]} : vector<3x64x128xf32> to vector<1x64x128xf32>
    %83 = vector.shape_cast %82 : vector<1x64x128xf32> to vector<64x128xf32>
    %cst_29 = arith.constant dense<0.000000e+00> : vector<16x128xf32>
    %84 = tpu.matmul %81, %83, %cst_29 {dimension_numbers = #tpu.dot_dimension_numbers<[1], [0], [0], [1], [0, 0, 1, 1], [], []>} : vector<16x64xf32>, vector<64x128xf32>, vector<16x128xf32> -> vector<16x128xf32>
    %85 = arith.addf %79, %84 : vector<16x128xf32>
    %86 = vector.shape_cast %85 : vector<16x128xf32> to vector<1x16x128xf32>
    %87 = vector.shape_cast %86 : vector<1x16x128xf32> to vector<1x8x2x128xf32>
    %cst_30 = arith.constant dense<0xFF800000> : vector<1x8x128xf32>
    %88 = vector.multi_reduction <maximumf>, %87, %cst_30 [2] : vector<1x8x2x128xf32> to vector<1x8x128xf32>
    %89 = vector.extract_strided_slice %60 {offsets = [0, 0, 64], sizes = [1, 16, 64], strides = [1, 1, 1]} : vector<1x16x192xf32> to vector<1x16x64xf32>
    %c0_31 = arith.constant 0 : index
    %c0_32 = arith.constant 0 : index
    %c0_33 = arith.constant 0 : index
    %90 = vector.load %arg8[%c0_31, %c0_32, %c0_33] : memref<5x64x128xf32, #tpu.memory_space<vmem>>, vector<5x64x128xf32>
    %cst_34 = arith.constant 0.000000e+00 : f32
    %91 = vector.broadcast %cst_34 : f32 to vector<1x2x64xf32>
    %92 = tpu.concatenate %91, %89, %91 in 1 : vector<1x2x64xf32>, vector<1x16x64xf32>, vector<1x2x64xf32> -> vector<1x20x64xf32>
    %c0_35 = arith.constant 0 : index
    %c0_36 = arith.constant 0 : index
    %93 = vector.load %arg9[%c0_35, %c0_36] : memref<1x128xf32, #tpu.memory_space<vmem>>, vector<1x128xf32>
    %94 = vector.shape_cast %93 : vector<1x128xf32> to vector<1x128xf32>
    %95 = vector.broadcast %94 : vector<1x128xf32> to vector<16x128xf32>
    %96 = vector.extract_strided_slice %92 {offsets = [0, 0, 0], sizes = [1, 16, 64], strides = [1, 1, 1]} : vector<1x20x64xf32> to vector<1x16x64xf32>
    %97 = vector.shape_cast %96 : vector<1x16x64xf32> to vector<16x64xf32>
    %98 = vector.extract_strided_slice %90 {offsets = [0, 0, 0], sizes = [1, 64, 128], strides = [1, 1, 1]} : vector<5x64x128xf32> to vector<1x64x128xf32>
    %99 = vector.shape_cast %98 : vector<1x64x128xf32> to vector<64x128xf32>
    %cst_37 = arith.constant dense<0.000000e+00> : vector<16x128xf32>
    %100 = tpu.matmul %97, %99, %cst_37 {dimension_numbers = #tpu.dot_dimension_numbers<[1], [0], [0], [1], [0, 0, 1, 1], [], []>} : vector<16x64xf32>, vector<64x128xf32>, vector<16x128xf32> -> vector<16x128xf32>
    %101 = arith.addf %95, %100 : vector<16x128xf32>
    %102 = vector.extract_strided_slice %92 {offsets = [0, 1, 0], sizes = [1, 16, 64], strides = [1, 1, 1]} : vector<1x20x64xf32> to vector<1x16x64xf32>
    %103 = vector.shape_cast %102 : vector<1x16x64xf32> to vector<16x64xf32>
    %104 = vector.extract_strided_slice %90 {offsets = [1, 0, 0], sizes = [1, 64, 128], strides = [1, 1, 1]} : vector<5x64x128xf32> to vector<1x64x128xf32>
    %105 = vector.shape_cast %104 : vector<1x64x128xf32> to vector<64x128xf32>
    %cst_38 = arith.constant dense<0.000000e+00> : vector<16x128xf32>
    %106 = tpu.matmul %103, %105, %cst_38 {dimension_numbers = #tpu.dot_dimension_numbers<[1], [0], [0], [1], [0, 0, 1, 1], [], []>} : vector<16x64xf32>, vector<64x128xf32>, vector<16x128xf32> -> vector<16x128xf32>
    %107 = arith.addf %101, %106 : vector<16x128xf32>
    %108 = vector.extract_strided_slice %92 {offsets = [0, 2, 0], sizes = [1, 16, 64], strides = [1, 1, 1]} : vector<1x20x64xf32> to vector<1x16x64xf32>
    %109 = vector.shape_cast %108 : vector<1x16x64xf32> to vector<16x64xf32>
    %110 = vector.extract_strided_slice %90 {offsets = [2, 0, 0], sizes = [1, 64, 128], strides = [1, 1, 1]} : vector<5x64x128xf32> to vector<1x64x128xf32>
    %111 = vector.shape_cast %110 : vector<1x64x128xf32> to vector<64x128xf32>
    %cst_39 = arith.constant dense<0.000000e+00> : vector<16x128xf32>
    %112 = tpu.matmul %109, %111, %cst_39 {dimension_numbers = #tpu.dot_dimension_numbers<[1], [0], [0], [1], [0, 0, 1, 1], [], []>} : vector<16x64xf32>, vector<64x128xf32>, vector<16x128xf32> -> vector<16x128xf32>
    %113 = arith.addf %107, %112 : vector<16x128xf32>
    %114 = vector.extract_strided_slice %92 {offsets = [0, 3, 0], sizes = [1, 16, 64], strides = [1, 1, 1]} : vector<1x20x64xf32> to vector<1x16x64xf32>
    %115 = vector.shape_cast %114 : vector<1x16x64xf32> to vector<16x64xf32>
    %116 = vector.extract_strided_slice %90 {offsets = [3, 0, 0], sizes = [1, 64, 128], strides = [1, 1, 1]} : vector<5x64x128xf32> to vector<1x64x128xf32>
    %117 = vector.shape_cast %116 : vector<1x64x128xf32> to vector<64x128xf32>
    %cst_40 = arith.constant dense<0.000000e+00> : vector<16x128xf32>
    %118 = tpu.matmul %115, %117, %cst_40 {dimension_numbers = #tpu.dot_dimension_numbers<[1], [0], [0], [1], [0, 0, 1, 1], [], []>} : vector<16x64xf32>, vector<64x128xf32>, vector<16x128xf32> -> vector<16x128xf32>
    %119 = arith.addf %113, %118 : vector<16x128xf32>
    %120 = vector.extract_strided_slice %92 {offsets = [0, 4, 0], sizes = [1, 16, 64], strides = [1, 1, 1]} : vector<1x20x64xf32> to vector<1x16x64xf32>
    %121 = vector.shape_cast %120 : vector<1x16x64xf32> to vector<16x64xf32>
    %122 = vector.extract_strided_slice %90 {offsets = [4, 0, 0], sizes = [1, 64, 128], strides = [1, 1, 1]} : vector<5x64x128xf32> to vector<1x64x128xf32>
    %123 = vector.shape_cast %122 : vector<1x64x128xf32> to vector<64x128xf32>
    %cst_41 = arith.constant dense<0.000000e+00> : vector<16x128xf32>
    %124 = tpu.matmul %121, %123, %cst_41 {dimension_numbers = #tpu.dot_dimension_numbers<[1], [0], [0], [1], [0, 0, 1, 1], [], []>} : vector<16x64xf32>, vector<64x128xf32>, vector<16x128xf32> -> vector<16x128xf32>
    %125 = arith.addf %119, %124 : vector<16x128xf32>
    %126 = vector.shape_cast %125 : vector<16x128xf32> to vector<1x16x128xf32>
    %127 = vector.shape_cast %126 : vector<1x16x128xf32> to vector<1x8x2x128xf32>
    %cst_42 = arith.constant dense<0xFF800000> : vector<1x8x128xf32>
    %128 = vector.multi_reduction <maximumf>, %127, %cst_42 [2] : vector<1x8x2x128xf32> to vector<1x8x128xf32>
    %129 = vector.extract_strided_slice %60 {offsets = [0, 0, 128], sizes = [1, 16, 64], strides = [1, 1, 1]} : vector<1x16x192xf32> to vector<1x16x64xf32>
    %c0_43 = arith.constant 0 : index
    %c0_44 = arith.constant 0 : index
    %c0_45 = arith.constant 0 : index
    %130 = vector.load %arg10[%c0_43, %c0_44, %c0_45] : memref<7x64x128xf32, #tpu.memory_space<vmem>>, vector<7x64x128xf32>
    %cst_46 = arith.constant 0.000000e+00 : f32
    %131 = vector.broadcast %cst_46 : f32 to vector<1x3x64xf32>
    %132 = tpu.concatenate %131, %129, %131 in 1 : vector<1x3x64xf32>, vector<1x16x64xf32>, vector<1x3x64xf32> -> vector<1x22x64xf32>
    %c0_47 = arith.constant 0 : index
    %c0_48 = arith.constant 0 : index
    %133 = vector.load %arg11[%c0_47, %c0_48] : memref<1x128xf32, #tpu.memory_space<vmem>>, vector<1x128xf32>
    %134 = vector.shape_cast %133 : vector<1x128xf32> to vector<1x128xf32>
    %135 = vector.broadcast %134 : vector<1x128xf32> to vector<16x128xf32>
    %136 = vector.extract_strided_slice %132 {offsets = [0, 0, 0], sizes = [1, 16, 64], strides = [1, 1, 1]} : vector<1x22x64xf32> to vector<1x16x64xf32>
    %137 = vector.shape_cast %136 : vector<1x16x64xf32> to vector<16x64xf32>
    %138 = vector.extract_strided_slice %130 {offsets = [0, 0, 0], sizes = [1, 64, 128], strides = [1, 1, 1]} : vector<7x64x128xf32> to vector<1x64x128xf32>
    %139 = vector.shape_cast %138 : vector<1x64x128xf32> to vector<64x128xf32>
    %cst_49 = arith.constant dense<0.000000e+00> : vector<16x128xf32>
    %140 = tpu.matmul %137, %139, %cst_49 {dimension_numbers = #tpu.dot_dimension_numbers<[1], [0], [0], [1], [0, 0, 1, 1], [], []>} : vector<16x64xf32>, vector<64x128xf32>, vector<16x128xf32> -> vector<16x128xf32>
    %141 = arith.addf %135, %140 : vector<16x128xf32>
    %142 = vector.extract_strided_slice %132 {offsets = [0, 1, 0], sizes = [1, 16, 64], strides = [1, 1, 1]} : vector<1x22x64xf32> to vector<1x16x64xf32>
    %143 = vector.shape_cast %142 : vector<1x16x64xf32> to vector<16x64xf32>
    %144 = vector.extract_strided_slice %130 {offsets = [1, 0, 0], sizes = [1, 64, 128], strides = [1, 1, 1]} : vector<7x64x128xf32> to vector<1x64x128xf32>
    %145 = vector.shape_cast %144 : vector<1x64x128xf32> to vector<64x128xf32>
    %cst_50 = arith.constant dense<0.000000e+00> : vector<16x128xf32>
    %146 = tpu.matmul %143, %145, %cst_50 {dimension_numbers = #tpu.dot_dimension_numbers<[1], [0], [0], [1], [0, 0, 1, 1], [], []>} : vector<16x64xf32>, vector<64x128xf32>, vector<16x128xf32> -> vector<16x128xf32>
    %147 = arith.addf %141, %146 : vector<16x128xf32>
    %148 = vector.extract_strided_slice %132 {offsets = [0, 2, 0], sizes = [1, 16, 64], strides = [1, 1, 1]} : vector<1x22x64xf32> to vector<1x16x64xf32>
    %149 = vector.shape_cast %148 : vector<1x16x64xf32> to vector<16x64xf32>
    %150 = vector.extract_strided_slice %130 {offsets = [2, 0, 0], sizes = [1, 64, 128], strides = [1, 1, 1]} : vector<7x64x128xf32> to vector<1x64x128xf32>
    %151 = vector.shape_cast %150 : vector<1x64x128xf32> to vector<64x128xf32>
    %cst_51 = arith.constant dense<0.000000e+00> : vector<16x128xf32>
    %152 = tpu.matmul %149, %151, %cst_51 {dimension_numbers = #tpu.dot_dimension_numbers<[1], [0], [0], [1], [0, 0, 1, 1], [], []>} : vector<16x64xf32>, vector<64x128xf32>, vector<16x128xf32> -> vector<16x128xf32>
    %153 = arith.addf %147, %152 : vector<16x128xf32>
    %154 = vector.extract_strided_slice %132 {offsets = [0, 3, 0], sizes = [1, 16, 64], strides = [1, 1, 1]} : vector<1x22x64xf32> to vector<1x16x64xf32>
    %155 = vector.shape_cast %154 : vector<1x16x64xf32> to vector<16x64xf32>
    %156 = vector.extract_strided_slice %130 {offsets = [3, 0, 0], sizes = [1, 64, 128], strides = [1, 1, 1]} : vector<7x64x128xf32> to vector<1x64x128xf32>
    %157 = vector.shape_cast %156 : vector<1x64x128xf32> to vector<64x128xf32>
    %cst_52 = arith.constant dense<0.000000e+00> : vector<16x128xf32>
    %158 = tpu.matmul %155, %157, %cst_52 {dimension_numbers = #tpu.dot_dimension_numbers<[1], [0], [0], [1], [0, 0, 1, 1], [], []>} : vector<16x64xf32>, vector<64x128xf32>, vector<16x128xf32> -> vector<16x128xf32>
    %159 = arith.addf %153, %158 : vector<16x128xf32>
    %160 = vector.extract_strided_slice %132 {offsets = [0, 4, 0], sizes = [1, 16, 64], strides = [1, 1, 1]} : vector<1x22x64xf32> to vector<1x16x64xf32>
    %161 = vector.shape_cast %160 : vector<1x16x64xf32> to vector<16x64xf32>
    %162 = vector.extract_strided_slice %130 {offsets = [4, 0, 0], sizes = [1, 64, 128], strides = [1, 1, 1]} : vector<7x64x128xf32> to vector<1x64x128xf32>
    %163 = vector.shape_cast %162 : vector<1x64x128xf32> to vector<64x128xf32>
    %cst_53 = arith.constant dense<0.000000e+00> : vector<16x128xf32>
    %164 = tpu.matmul %161, %163, %cst_53 {dimension_numbers = #tpu.dot_dimension_numbers<[1], [0], [0], [1], [0, 0, 1, 1], [], []>} : vector<16x64xf32>, vector<64x128xf32>, vector<16x128xf32> -> vector<16x128xf32>
    %165 = arith.addf %159, %164 : vector<16x128xf32>
    %166 = vector.extract_strided_slice %132 {offsets = [0, 5, 0], sizes = [1, 16, 64], strides = [1, 1, 1]} : vector<1x22x64xf32> to vector<1x16x64xf32>
    %167 = vector.shape_cast %166 : vector<1x16x64xf32> to vector<16x64xf32>
    %168 = vector.extract_strided_slice %130 {offsets = [5, 0, 0], sizes = [1, 64, 128], strides = [1, 1, 1]} : vector<7x64x128xf32> to vector<1x64x128xf32>
    %169 = vector.shape_cast %168 : vector<1x64x128xf32> to vector<64x128xf32>
    %cst_54 = arith.constant dense<0.000000e+00> : vector<16x128xf32>
    %170 = tpu.matmul %167, %169, %cst_54 {dimension_numbers = #tpu.dot_dimension_numbers<[1], [0], [0], [1], [0, 0, 1, 1], [], []>} : vector<16x64xf32>, vector<64x128xf32>, vector<16x128xf32> -> vector<16x128xf32>
    %171 = arith.addf %165, %170 : vector<16x128xf32>
    %172 = vector.extract_strided_slice %132 {offsets = [0, 6, 0], sizes = [1, 16, 64], strides = [1, 1, 1]} : vector<1x22x64xf32> to vector<1x16x64xf32>
    %173 = vector.shape_cast %172 : vector<1x16x64xf32> to vector<16x64xf32>
    %174 = vector.extract_strided_slice %130 {offsets = [6, 0, 0], sizes = [1, 64, 128], strides = [1, 1, 1]} : vector<7x64x128xf32> to vector<1x64x128xf32>
    %175 = vector.shape_cast %174 : vector<1x64x128xf32> to vector<64x128xf32>
    %cst_55 = arith.constant dense<0.000000e+00> : vector<16x128xf32>
    %176 = tpu.matmul %173, %175, %cst_55 {dimension_numbers = #tpu.dot_dimension_numbers<[1], [0], [0], [1], [0, 0, 1, 1], [], []>} : vector<16x64xf32>, vector<64x128xf32>, vector<16x128xf32> -> vector<16x128xf32>
    %177 = arith.addf %171, %176 : vector<16x128xf32>
    %178 = vector.shape_cast %177 : vector<16x128xf32> to vector<1x16x128xf32>
    %179 = vector.shape_cast %178 : vector<1x16x128xf32> to vector<1x8x2x128xf32>
    %cst_56 = arith.constant dense<0xFF800000> : vector<1x8x128xf32>
    %180 = vector.multi_reduction <maximumf>, %179, %cst_56 [2] : vector<1x8x2x128xf32> to vector<1x8x128xf32>
    %cst_57 = arith.constant dense<0xFF800000> : vector<1x128xf32>
    %181 = vector.multi_reduction <maximumf>, %88, %cst_57 [1] : vector<1x8x128xf32> to vector<1x128xf32>
    %cst_58 = arith.constant dense<0xFF800000> : vector<1x128xf32>
    %182 = vector.multi_reduction <maximumf>, %128, %cst_58 [1] : vector<1x8x128xf32> to vector<1x128xf32>
    %cst_59 = arith.constant dense<0xFF800000> : vector<1x128xf32>
    %183 = vector.multi_reduction <maximumf>, %180, %cst_59 [1] : vector<1x8x128xf32> to vector<1x128xf32>
    %184 = tpu.concatenate %181, %182, %183 in 1 : vector<1x128xf32>, vector<1x128xf32>, vector<1x128xf32> -> vector<1x384xf32>
    %185 = vector.shape_cast %184 : vector<1x384xf32> to vector<1x1x384xf32>
    %c0_60 = arith.constant 0 : index
    %c0_61 = arith.constant 0 : index
    %c0_62 = arith.constant 0 : index
    %186 = vector.load %arg12[%c0_60, %c0_61, %c0_62] : memref<1x1x384xf32, #tpu.memory_space<vmem>>, vector<1x1x384xf32>
    tpu.vector_store %arg12[%c0_60, %c0_61, %c0_62], %185 {strides = array<i32>} : memref<1x1x384xf32, #tpu.memory_space<vmem>>, vector<1x1x384xf32>,
    return
  }
  func.func @transform_0(%arg0: i32) -> (i32, i32, i32) {
    %c0_i32 = arith.constant 0 : i32
    %c0_i32_0 = arith.constant 0 : i32
    %c0_i32_1 = arith.constant 0 : i32
    return %arg0, %c0_i32, %c0_i32_0 : i32, i32, i32
  }
  func.func @transform_1(%arg0: i32) -> (i32, i32) {
    %c0_i32 = arith.constant 0 : i32
    %c0_i32_0 = arith.constant 0 : i32
    %c0_i32_1 = arith.constant 0 : i32
    return %c0_i32, %c0_i32_0 : i32, i32
  }
  func.func @transform_2(%arg0: i32) -> (i32, i32) {
    %c0_i32 = arith.constant 0 : i32
    %c0_i32_0 = arith.constant 0 : i32
    %c0_i32_1 = arith.constant 0 : i32
    return %c0_i32, %c0_i32_0 : i32, i32
  }
  func.func @transform_3(%arg0: i32) -> (i32, i32, i32) {
    %c0_i32 = arith.constant 0 : i32
    %c0_i32_0 = arith.constant 0 : i32
    %c0_i32_1 = arith.constant 0 : i32
    %c0_i32_2 = arith.constant 0 : i32
    return %c0_i32, %c0_i32_0, %c0_i32_1 : i32, i32, i32
  }
  func.func @transform_4(%arg0: i32) -> (i32, i32) {
    %c0_i32 = arith.constant 0 : i32
    %c0_i32_0 = arith.constant 0 : i32
    %c0_i32_1 = arith.constant 0 : i32
    return %c0_i32, %c0_i32_0 : i32, i32
  }
  func.func @transform_5(%arg0: i32) -> (i32, i32, i32) {
    %c0_i32 = arith.constant 0 : i32
    %c0_i32_0 = arith.constant 0 : i32
    %c0_i32_1 = arith.constant 0 : i32
    %c0_i32_2 = arith.constant 0 : i32
    return %c0_i32, %c0_i32_0, %c0_i32_1 : i32, i32, i32
  }
  func.func @transform_6(%arg0: i32) -> (i32, i32) {
    %c0_i32 = arith.constant 0 : i32
    %c0_i32_0 = arith.constant 0 : i32
    %c0_i32_1 = arith.constant 0 : i32
    return %c0_i32, %c0_i32_0 : i32, i32
  }
  func.func @transform_7(%arg0: i32) -> (i32, i32, i32) {
    %c0_i32 = arith.constant 0 : i32
    %c0_i32_0 = arith.constant 0 : i32
    %c0_i32_1 = arith.constant 0 : i32
    %c0_i32_2 = arith.constant 0 : i32
    return %c0_i32, %c0_i32_0, %c0_i32_1 : i32, i32, i32
  }
  func.func @transform_8(%arg0: i32) -> (i32, i32) {
    %c0_i32 = arith.constant 0 : i32
    %c0_i32_0 = arith.constant 0 : i32
    %c0_i32_1 = arith.constant 0 : i32
    return %c0_i32, %c0_i32_0 : i32, i32
  }
  func.func @transform_9(%arg0: i32) -> (i32, i32, i32) {
    %c0_i32 = arith.constant 0 : i32
    %c0_i32_0 = arith.constant 0 : i32
    %c0_i32_1 = arith.constant 0 : i32
    %c0_i32_2 = arith.constant 0 : i32
    return %c0_i32, %c0_i32_0, %c0_i32_1 : i32, i32, i32
  }
  func.func @transform_10(%arg0: i32) -> (i32, i32) {
    %c0_i32 = arith.constant 0 : i32
    %c0_i32_0 = arith.constant 0 : i32
    %c0_i32_1 = arith.constant 0 : i32
    return %c0_i32, %c0_i32_0 : i32, i32
  }
  func.func @transform_11(%arg0: i32) -> (i32, i32, i32) {
    %c0_i32 = arith.constant 0 : i32
    %c0_i32_0 = arith.constant 0 : i32
    %c0_i32_1 = arith.constant 0 : i32
    return %arg0, %c0_i32, %c0_i32_0 : i32, i32, i32
  }
}

</mosaic_0001>

<bundles_post_ra>
// kernel: msnet_forward.1
= control target key start
LH: loop header
LB: loop body
LE: loop exit
PB: predicated region body
PF: predicated region fallthrough
CT: control target
= control target key end

     0   :  { %s4929_s17 = smov 0   ;;  %s6495_s0 = inlined_call_operand.vmem [shape: f32[2,64,8], index: 0, kind: input, shape index: {}]   ;;  %s6496_s1 = inlined_call_operand.vmem [shape: f32[8,64], index: 1, kind: input, shape index: {}]   ;;  %s6497_s2 = inlined_call_operand.vmem [shape: f32[1,64], index: 2, kind: input, shape index: {}]   ;;  %s6498_s3 = inlined_call_operand.vmem [shape: f32[7,64,192], index: 3, kind: input, shape index: {}]   ;;  %s6499_s4 = inlined_call_operand.vmem [shape: f32[1,192], index: 4, kind: input, shape index: {}]   ;;  %s6500_s5 = inlined_call_operand.vmem [shape: f32[3,64,128], index: 5, kind: input, shape index: {}]   ;;  %s6501_s6 = inlined_call_operand.vmem [shape: f32[1,128], index: 6, kind: input, shape index: {}]   ;;  %s6502_s7 = inlined_call_operand.vmem [shape: f32[5,64,128], index: 7, kind: input, shape index: {}]   ;;  %s6503_s8 = inlined_call_operand.vmem [shape: f32[1,128], index: 8, kind: input, shape index: {}]   ;;  %s6504_s9 = inlined_call_operand.vmem [shape: f32[7,64,128], index: 9, kind: input, shape index: {}]   ;;  %s6505_s10 = inlined_call_operand.vmem [shape: f32[1,128], index: 10, kind: input, shape index: {}]   ;;  %s6506_s11 = inlined_call_operand.vmem [shape: f32[2,1,384], index: 11, kind: output, shape index: {}]  }
   0x1 LB: > { %s4306_s18 = sadd.s32 4294967295, %s4863_s17   ;;  %p4310_p0 = scmp.ge.s32.totalorder %s4863_s17, 1  ;;  %s4863_s17 = sphi %s4929_s17, %s21_s17  }
   0x2   : > { %p337_p1 = scmp.lt.s32.totalorder %s4863_s17, 3 }
   0x4   : > { %p338_p2 = pnand %p4310_p0, %p337_p1 }
   0x5   : > { %p376_p3 = scmp.lt.s32.totalorder (!%p338_p2), %s4306_s18, 1  ;;  %s4867_s15 = smov (!%p338_p2), 64  }
   0x6   : > { %341 = sbr.rel (%p338_p2) target bundleno = 1062 (0x426), region = 64 }
   0xb   : > { %v393_v0 = vld [vmem:[%s6496_s1] sm:$0xff]  ;;  %s6508_s18 = smov (!%p376_p3, %s4306_s18), 1  ;;  %vm401_vm0 = vcmask 64512   ;;  %v947_v9 = vld [vmem:[%s6498_s3 + $0x78] sm:$0xff]  ;;  %v946_v10 = vld [vmem:[%s6498_s3 + $0x70] sm:$0xff]  ;;  %v4865_v35 = vmov 0.0   ;;  %v543_v46 = vlaneseq }
   0xc   : > { %4545 = vmatprep.subr.mxu0 %v393_v0  ;;  %s4385_s21 = sshll.u32 %s6508_s18, 6  ;;  %1153 = vmatprep.subr.mxu1 %v947_v9  ;;  %v945_v11 = vld [vmem:[%s6498_s3 + $0x68] sm:$0xff]  ;;  %v944_v12 = vld [vmem:[%s6498_s3 + $0x60] sm:$0xff]  ;;  %v943_v13 = vld [vmem:[%s6498_s3 + $0x58] sm:$0xff]  ;;  %v4866_v44 = vmov 1983009808  }
   0xd   : > { %4546 = vmatpush3.msra.mxu0 %v393_v0  ;;  %s380_s24 = scalar_lea.vmem %s6495_s0, %s4385_s21  ;;  %1154 = vmatpush1.msra.mxu1 %v946_v10  ;;  %v942_v14 = vld [vmem:[%s6498_s3 + $0x50] sm:$0xff]  ;;  %v941_v15 = vld [vmem:[%s6498_s3 + $0x48] sm:$0xff]  ;;  %v963_v16 = vld [vmem:[%s6498_s3 + $0xf8] sm:$0xff]  ;;  %v541_v45 = vunpack.c.l.s4 %v4866_v44  ;;  %v5059_v48 = vshrl.u32 %v543_v46, 7  ;;  %vm707_vm1 = vcmask 517120   ;;  %vm1084_vm2 = vcmask 1041409  }
   0xe   : > { %v385_v1 = vld [vmem:[%s380_s24] sm:$0xff]  ;;  %v386_v2 = vld [vmem:[%s380_s24 + $0x8] sm:$0xff]  ;;  %v387_v3 = vld [vmem:[%s380_s24 + $0x10] sm:$0xff]  ;;  %1155 = vmatprep.subr.mxu1 %v945_v11  ;;  %1269 = vmatprep.subr.mxu0 %v963_v16  ;;  %vm1076_vm3 = vcmask 1044484   ;;  %vm1086_vm4 = vcmask 1042434   ;;  %vm1078_vm5 = vcmask 1045509  }
   0xf   : > { %4547 = vmatprep.mubr.msk.f32.mxu0 %vm401_vm0, %v385_v1  ;;  %v388_v4 = vld [vmem:[%s380_s24 + $0x18] sm:$0xff]  ;;  %v389_v5 = vld [vmem:[%s380_s24 + $0x20] sm:$0xff]  ;;  %v390_v6 = vld [vmem:[%s380_s24 + $0x28] sm:$0xff]  ;;  %1156 = vmatpush1.msra.mxu1 %v944_v12  ;;  %v542_v47 = vunpack.c.0.s8 %v541_v45  ;;  %vm1088_vm6 = vcmask 1043459   ;;  %vm1080_vm7 = vcmask 1046534   ;;  %vm1082_vm8 = vcmask 1047559  }
  0x10   : > { %4548 = vmatmul.mubr.msk.f32.vlgmr.msra.gmra.mxu0 %vm401_vm0, %v386_v2  ;;  %v391_v7 = vld [vmem:[%s380_s24 + $0x30] sm:$0xff]  ;;  %v392_v8 = vld [vmem:[%s380_s24 + $0x38] sm:$0xff]  ;;  %1157 = vmatprep.subr.mxu1 %v943_v13  ;;  %v940_v17 = vld [vmem:[%s6498_s3 + $0x40] sm:$0xff]  ;;  %vm1112_vm9 = vcmask 1042432   ;;  %vm1127_vm10 = vcmask 523264   ;;  %vm1235_vm11 = vcmask 1046528  }
  0x11   : > { %4550 = vmatprep.mubr.msk.f32.mxu0 %vm401_vm0, %v387_v3  ;;  %1158 = vmatpush1.msra.mxu1 %v942_v14  ;;  %v962_v18 = vld [vmem:[%s6498_s3 + $0xf0] sm:$0xff]  ;;  %v939_v19 = vld [vmem:[%s6498_s3 + $0x38] sm:$0xff]  ;;  %v961_v20 = vld [vmem:[%s6498_s3 + $0xe8] sm:$0xff]  ;;  %v5067_v50 = vsub.s32 %v542_v47, %v5059_v48  ;;  %vm1350_vm12 = vcmask 1045504   ;;  %vm1465_vm13 = vcmask 1044480   ;;  %vm1580_vm14 = vcmask 1043456  }
  0x12   : > { %1159 = vmatprep.subr.mxu1 %v941_v15  ;;  %1270 = vmatpush1.msra.mxu0 %v962_v18  ;;  %v938_v21 = vld [vmem:[%s6498_s3 + $0x30] sm:$0xff]  ;;  %v960_v22 = vld [vmem:[%s6498_s3 + $0xe0] sm:$0xff]  ;;  %v937_v23 = vld [vmem:[%s6498_s3 + $0x28] sm:$0xff]  ;;  %vm1809_vm15 = vcmask 1041408   ;;  %s4844_s24 = smul.u32 3, %s6508_s18 }
  0x13   : > { %1160 = vmatpush1.msra.mxu1 %v940_v17  ;;  %1271 = vmatprep.subr.mxu0 %v961_v20  ;;  %v959_v24 = vld [vmem:[%s6498_s3 + $0xd8] sm:$0xff]  ;;  %v936_v25 = vld [vmem:[%s6498_s3 + $0x20] sm:$0xff]  ;;  %v958_v26 = vld [vmem:[%s6498_s3 + $0xd0] sm:$0xff] }
  0x14   : > { %4551 = vmatmul.mubr.msk.f32.gmra.mxu0 %vm401_vm0, %v388_v4  ;;  %1161 = vmatprep.subr.mxu1 %v939_v19  ;;  %v935_v27 = vld [vmem:[%s6498_s3 + $0x18] sm:$0xff]  ;;  %v957_v28 = vld [vmem:[%s6498_s3 + $0xc8] sm:$0xff]  ;;  %v934_v29 = vld [vmem:[%s6498_s3 + $0x10] sm:$0xff]  ;;  %s384_s27 = scalar_lea.vmem %s6506_s11, %s4844_s24 }
  0x15   : > { %4553 = vmatprep.mubr.msk.f32.mxu0 %vm401_vm0, %v389_v5  ;;  %1162 = vmatpush1.msra.mxu1 %v938_v21  ;;  %v956_v30 = vld [vmem:[%s6498_s3 + $0xc0] sm:$0xff]  ;;  %v933_v31 = vld [vmem:[%s6498_s3 + $0x8] sm:$0xff]  ;;  %v955_v32 = vld [vmem:[%s6498_s3 + $0xb8] sm:$0xff] }
  0x16   : > { %1272 = vmatpush1.msra.mxu0 %v960_v22  ;;  %1163 = vmatprep.subr.mxu1 %v937_v23  ;;  %v932_v33 = vld [vmem:[%s6498_s3] sm:$0xff]  ;;  %v954_v34 = vld [vmem:[%s6498_s3 + $0xb0] sm:$0xff]  ;;  %v979_v36 = vld [vmem:[%s6498_s3 + $0x178] sm:$0xff] }
  0x17   : > { %1273 = vmatprep.subr.mxu0 %v959_v24  ;;  %1164 = vmatpush1.msra.mxu1 %v936_v25  ;;  %v953_v37 = vld [vmem:[%s6498_s3 + $0xa8] sm:$0xff]  ;;  %v952_v38 = vld [vmem:[%s6498_s3 + $0xa0] sm:$0xff]  ;;  %v951_v39 = vld [vmem:[%s6498_s3 + $0x98] sm:$0xff] }
  0x18   : > { %4554 = vmatmul.mubr.msk.f32.gmra.mxu0 %vm401_vm0, %v390_v6  ;;  %1165 = vmatprep.subr.mxu1 %v935_v27  ;;  %v950_v40 = vld [vmem:[%s6498_s3 + $0x90] sm:$0xff]  ;;  %v949_v41 = vld [vmem:[%s6498_s3 + $0x88] sm:$0xff]  ;;  %v948_v42 = vld [vmem:[%s6498_s3 + $0x80] sm:$0xff] }
  0x19   : > { %4556 = vmatprep.mubr.msk.f32.mxu0 %vm401_vm0, %v391_v7  ;;  %1274 = vmatpush1.msra.mxu0 %v958_v26  ;;  %v995_v43 = vld [vmem:[%s6498_s3 + $0x1f8] sm:$0xff]  ;;  %v5064_v49 = vld [vmem:[%s6497_s2] ss:$0 sm:$0xff] }
  0x1a   : > { %1275 = vmatprep.subr.mxu0 %v957_v28  ;;  %1166 = vmatpush1.msra.mxu1 %v934_v29 }
  0x1b   : > { %1276 = vmatpush1.msra.mxu0 %v956_v30  ;;  %1167 = vmatprep.subr.mxu1 %v933_v31 }
  0x1c   : > { %4557 = vmatmul.mubr.msk.f32.gmra.mxu0 %vm401_vm0, %v392_v8  ;;  %1277 = vmatprep.subr.mxu0 %v955_v32  ;;  %vm2443_vm0 = vcmask 1040384  }
  0x1d   : > { %1168 = vmatpush1.msra.mxu1 %v932_v33  ;;  %1201 = vmatprep.mubr.f32.mxu1 %v4865_v35 }
  0x1e   : > { %1278 = vmatpush1.msra.mxu0 %v954_v34  ;;  %1384 = vmatprep.subr.mxu1 %v979_v36 }
  0x1f   : > { %1279 = vmatprep.subr.mxu0 %v953_v37  ;;  %1317 = vmatprep.mubr.f32.mxu0 %v4865_v35 }
  0x20   : > { %1280 = vmatpush1.msra.mxu0 %v952_v38 }
  0x21   : > { %1281 = vmatprep.subr.mxu0 %v951_v39 }
  0x22   : > { %1282 = vmatpush1.msra.mxu0 %v950_v40 }
  0x23   : > { %1283 = vmatprep.subr.mxu0 %v949_v41 }
  0x24   : > { %1284 = vmatpush1.msra.mxu0 %v948_v42 }
  0x25   : > { %1499 = vmatprep.subr.mxu0 %v995_v43 }
  0xd0   : > { %v4549_v51 = vpop.f32.mrf.mxu0 }
  0xd1   : > { %v498_v52 = vadd.f32 %v4549_v51, %v5064_v49 }
  0xd2   : > { %v492_v53 = vpop.f32.mrf.mxu0 }
  0xd3   : > { %v556_v54 = vcombine.high %v498_v52, %v498_v52  ;;  %v563_v55 = vrot.slane %v498_v52, %v5067_v50  ;;  %v493_v56 = vadd.f32 %v5064_v49, %v492_v53 }
  0xd4   : > { %v4552_v19 = vpop.f32.mrf.mxu0 }
  0xd5   : > { %v570_v57 = vrot.slane %v556_v54, %v5067_v50  ;;  %v571_v58 = vcombine.high %v563_v55, %v563_v55  ;;  %v736_v59 = vsel %vm707_vm1, %v563_v55, -inf  ;;  %v539_v60 = vcombine.high %v493_v56, %v493_v56 }
  0xd6   : > { %v737_v61 = vrot.slane %v736_v59, 4  ;;  %v546_v62 = vrot.slane %v493_v56, %v5067_v50  ;;  %v508_v31 = vadd.f32 %v4552_v19, %v5064_v49 }
  0xd7   : > { %v572_v63 = vcombine.high %v570_v57, %v570_v57  ;;  %v743_v0 = vsel %vm707_vm1, %v571_v58, -inf  ;;  %v750_v1 = vsel %vm707_vm1, %v570_v57, -inf  ;;  %v553_v2 = vrot.slane %v539_v60, %v5067_v50  ;;  %v502_v57 = vpop.f32.mrf.mxu0 }
  0xd8   : > { %v738_v3 = vmax.f32 %v736_v59, %v737_v61  ;;  %v744_v4 = vrot.slane %v743_v0, 4  ;;  %v751_v5 = vrot.slane %v750_v1, 4  ;;  %v554_v6 = vcombine.high %v546_v62, %v546_v62 }
  0xd9   : > { %v757_v7 = vsel %vm707_vm1, %v572_v63, -inf  ;;  %v555_v8 = vcombine.high %v553_v2, %v553_v2  ;;  %v708_v9 = vsel %vm707_vm1, %v546_v62, -inf  ;;  %v722_v10 = vsel %vm707_vm1, %v553_v2, -inf }
  0xda   : > { %v739_v11 = vrot.slane %v738_v3, 2  ;;  %v745_v12 = vmax.f32 %v743_v0, %v744_v4  ;;  %v752_v13 = vmax.f32 %v750_v1, %v751_v5  ;;  %v758_v14 = vrot.slane %v757_v7, 4 }
  0xdb   : > { %v709_v15 = vrot.slane %v708_v9, 4  ;;  %v715_v16 = vsel %vm707_vm1, %v554_v6, -inf  ;;  %v723_v17 = vrot.slane %v722_v10, 4  ;;  %v729_v18 = vsel %vm707_vm1, %v555_v8, -inf }
  0xdc   : > { %v740_v20 = vmax.f32 %v738_v3, %v739_v11  ;;  %v746_v21 = vrot.slane %v745_v12, 2  ;;  %v753_v22 = vrot.slane %v752_v13, 2  ;;  %v759_v23 = vmax.f32 %v757_v7, %v758_v14 }
  0xdd   : > { %v710_v24 = vmax.f32 %v708_v9, %v709_v15  ;;  %v716_v25 = vrot.slane %v715_v16, 4  ;;  %v724_v26 = vmax.f32 %v722_v10, %v723_v17  ;;  %v730_v27 = vrot.slane %v729_v18, 4 }
  0xde   : > { %v747_v28 = vmax.f32 %v745_v12, %v746_v21  ;;  %v754_v29 = vmax.f32 %v752_v13, %v753_v22  ;;  %v760_v30 = vrot.slane %v759_v23, 2  ;;  %v741_v36 = vrot.slane %v740_v20, 1  ;;  %v4555_v22 = vpop.f32.mrf.mxu0 }
  0xdf   : > { %v711_v32 = vrot.slane %v710_v24, 2  ;;  %v717_v33 = vmax.f32 %v715_v16, %v716_v25  ;;  %v725_v34 = vrot.slane %v724_v26, 2  ;;  %v731_v37 = vmax.f32 %v729_v18, %v730_v27 }
  0xe0   : > { %v748_v38 = vrot.slane %v747_v28, 1  ;;  %v755_v39 = vrot.slane %v754_v29, 1  ;;  %v761_v40 = vmax.f32 %v759_v23, %v760_v30  ;;  %v590_v42 = vcombine.high %v508_v31, %v508_v31 }
  0xe1   : > { %v718_v41 = vrot.slane %v717_v33, 2  ;;  %v712_v43 = vmax.f32 %v710_v24, %v711_v32  ;;  %v726_v44 = vmax.f32 %v724_v26, %v725_v34  ;;  %v5084_v45 = vmax.f32 %v740_v20, %v741_v36 }
  0xe2   : > { %v732_v47 = vrot.slane %v731_v37, 2  ;;  %v597_v51 = vrot.slane %v508_v31, %v5067_v50  ;;  %v604_v52 = vrot.slane %v590_v42, %v5067_v50  ;;  %v749_v53 = vmax.f32 %v747_v28, %v748_v38 }
  0xe3   : > { %v756_v54 = vmax.f32 %v754_v29, %v755_v39  ;;  %v762_v55 = vrot.slane %v761_v40, 1  ;;  %v719_v56 = vmax.f32 %v717_v33, %v718_v41  ;;  %v713_v62 = vrot.slane %v712_v43, 1 }
  0xe4   : > { %v605_v58 = vcombine.high %v597_v51, %v597_v51  ;;  %v606_v59 = vcombine.high %v604_v52, %v604_v52  ;;  %v792_v60 = vsel %vm707_vm1, %v597_v51, -inf  ;;  %v806_v61 = vsel %vm707_vm1, %v604_v52, -inf }
  0xe5   : > { %v727_v63 = vrot.slane %v726_v44, 1  ;;  %v793_v0 = vrot.slane %v792_v60, 4  ;;  %v807_v1 = vrot.slane %v806_v61, 4  ;;  %v5090_v2 = vmax.f32 %v731_v37, %v732_v47 }
  0xe6   : > { %v799_v3 = vsel %vm707_vm1, %v605_v58, -inf  ;;  %v813_v4 = vsel %vm707_vm1, %v606_v59, -inf  ;;  %v503_v5 = vadd.f32 %v5064_v49, %v502_v57  ;;  %v763_v6 = vmax.f32 %v761_v40, %v762_v55 }
  0xe7   : > { %v720_v7 = vrot.slane %v719_v56, 1  ;;  %v800_v8 = vrot.slane %v799_v3, 4  ;;  %v808_v9 = vmax.f32 %v806_v61, %v807_v1  ;;  %v794_v10 = vmax.f32 %v792_v60, %v793_v0 }
  0xe8   : > { %v814_v11 = vrot.slane %v813_v4, 4  ;;  %v573_v12 = vcombine.high %v503_v5, %v503_v5  ;;  %v580_v13 = vrot.slane %v503_v5, %v5067_v50  ;;  %v1085_v14 = vsel %vm1084_vm2, %v756_v54, %v749_v53 }
  0xe9   : > { %v714_v15 = vmax.f32 %v712_v43, %v713_v62  ;;  %v801_v16 = vmax.f32 %v799_v3, %v800_v8  ;;  %v809_v17 = vrot.slane %v808_v9, 2  ;;  %v721_v23 = vmax.f32 %v719_v56, %v720_v7 }
  0xea   : > { %v815_v18 = vmax.f32 %v813_v4, %v814_v11  ;;  %v587_v19 = vrot.slane %v573_v12, %v5067_v50  ;;  %v588_v20 = vcombine.high %v580_v13, %v580_v13  ;;  %v764_v21 = vsel %vm707_vm1, %v580_v13, -inf }
  0xeb   : > { %v5099_v24 = vmax.f32 %v726_v44, %v727_v63  ;;  %v802_v25 = vrot.slane %v801_v16, 2  ;;  %v765_v26 = vrot.slane %v764_v21, 4  ;;  %v795_v27 = vrot.slane %v794_v10, 2 }
  0xec   : > { %v589_v28 = vcombine.high %v587_v19, %v587_v19  ;;  %v771_v29 = vsel %vm707_vm1, %v588_v20, -inf  ;;  %v778_v30 = vsel %vm707_vm1, %v587_v19, -inf  ;;  %v734_v31 = vrot.slane %v5090_v2, 1 }
  0xed   : > { %v810_v32 = vmax.f32 %v808_v9, %v809_v17  ;;  %v766_v33 = vmax.f32 %v764_v21, %v765_v26  ;;  %v518_v34 = vadd.f32 %v4555_v22, %v5064_v49  ;;  %v816_v36 = vrot.slane %v815_v18, 2 }
  0xee   : > { %v772_v37 = vrot.slane %v771_v29, 4  ;;  %v779_v38 = vrot.slane %v778_v30, 4  ;;  %v785_v39 = vsel %vm707_vm1, %v589_v28, -inf  ;;  %v1077_v40 = vsel %vm1076_vm3, %v721_v23, %v714_v15 }
  0xef   : > { %v803_v41 = vmax.f32 %v801_v16, %v802_v25  ;;  %v767_v42 = vrot.slane %v766_v33, 2  ;;  %v1087_v43 = vsel %vm1086_vm4, %v763_v6, %v1085_v14  ;;  %v796_v44 = vmax.f32 %v794_v10, %v795_v27  ;;  %v512_v14 = vpop.f32.mrf.mxu0 }
  0xf0   : > { %v773_v47 = vmax.f32 %v771_v29, %v772_v37  ;;  %v780_v51 = vmax.f32 %v778_v30, %v779_v38  ;;  %v786_v52 = vrot.slane %v785_v39, 4  ;;  %v811_v53 = vrot.slane %v810_v32, 1 }
  0xf1   : > { %v768_v54 = vmax.f32 %v766_v33, %v767_v42  ;;  %v624_v55 = vcombine.high %v518_v34, %v518_v34  ;;  %v631_v56 = vrot.slane %v518_v34, %v5067_v50  ;;  %v817_v57 = vmax.f32 %v815_v18, %v816_v36  ;;  %v4558_v38 = vpop.f32.mrf.mxu0 }
  0xf2   : > { %v774_v58 = vrot.slane %v773_v47, 2  ;;  %v781_v59 = vrot.slane %v780_v51, 2  ;;  %v787_v60 = vmax.f32 %v785_v39, %v786_v52  ;;  %v804_v61 = vrot.slane %v803_v41, 1 }
  0xf3   : > { %v769_v62 = vrot.slane %v768_v54, 1  ;;  %v638_v63 = vrot.slane %v624_v55, %v5067_v50  ;;  %v639_v0 = vcombine.high %v631_v56, %v631_v56  ;;  %v848_v5 = vsel %vm707_vm1, %v631_v56, -inf }
  0xf4   : > { %v775_v1 = vmax.f32 %v773_v47, %v774_v58  ;;  %v782_v3 = vmax.f32 %v780_v51, %v781_v59  ;;  %v788_v4 = vrot.slane %v787_v60, 2  ;;  %v797_v6 = vrot.slane %v796_v44, 1 }
  0xf5   : > { %v640_v7 = vcombine.high %v638_v63, %v638_v63  ;;  %v849_v8 = vrot.slane %v848_v5, 4  ;;  %v855_v9 = vsel %vm707_vm1, %v639_v0, -inf  ;;  %v812_v10 = vmax.f32 %v810_v32, %v811_v53 }
  0xf6   : > { %v818_v11 = vrot.slane %v817_v57, 1  ;;  %v789_v12 = vmax.f32 %v787_v60, %v788_v4  ;;  %v856_v13 = vrot.slane %v855_v9, 4  ;;  %v805_v15 = vmax.f32 %v803_v41, %v804_v61  ;;  %v522_v61 = vpop.f32.mrf.mxu0 }
  0xf7   : > { %v776_v16 = vrot.slane %v775_v1, 1  ;;  %v862_v17 = vsel %vm707_vm1, %v638_v63, -inf  ;;  %v869_v18 = vsel %vm707_vm1, %v640_v7, -inf  ;;  %v770_v19 = vmax.f32 %v768_v54, %v769_v62 }
  0xf8   : > { %v783_v20 = vrot.slane %v782_v3, 1  ;;  %v850_v21 = vmax.f32 %v848_v5, %v849_v8  ;;  %v857_v22 = vmax.f32 %v855_v9, %v856_v13  ;;  %v790_v23 = vrot.slane %v789_v12, 1 }
  0xf9   : > { %v863_v25 = vrot.slane %v862_v17, 4  ;;  %v870_v26 = vrot.slane %v869_v18, 4  ;;  %v513_v27 = vadd.f32 %v5064_v49, %v512_v14  ;;  %v5116_v28 = vmax.f32 %v5090_v2, %v734_v31 }
  0xfa   : > { %v5120_v29 = vsel %vm1078_vm5, %v5099_v24, %v1077_v40  ;;  %v5122_v30 = vmax.f32 %v796_v44, %v797_v6  ;;  %v819_v32 = vmax.f32 %v817_v57, %v818_v11  ;;  %v1094_v33 = vsel %vm1084_vm2, %v812_v10, %v805_v15 }
  0xfb   : > { %v777_v34 = vmax.f32 %v775_v1, %v776_v16  ;;  %v858_v36 = vrot.slane %v857_v22, 2  ;;  %v864_v37 = vmax.f32 %v862_v17, %v863_v25  ;;  %v1089_v39 = vsel %vm1088_vm6, %v770_v19, %v1087_v43 }
  0xfc   : > { %v851_v41 = vrot.slane %v850_v21, 2  ;;  %v607_v42 = vcombine.high %v513_v27, %v513_v27  ;;  %v614_v2 = vrot.slane %v513_v27, %v5067_v50  ;;  %v5127_v31 = vmax.f32 %v782_v3, %v783_v20 }
  0xfd   : > { %v5129_v47 = vmax.f32 %v789_v12, %v790_v23  ;;  %v865_v24 = vrot.slane %v864_v37, 2  ;;  %v871_v40 = vmax.f32 %v869_v18, %v870_v26  ;;  %v528_v53 = vadd.f32 %v4558_v38, %v5064_v49 }
  0xfe   : > { %v621_v44 = vrot.slane %v607_v42, %v5067_v50  ;;  %v622_v51 = vcombine.high %v614_v2, %v614_v2  ;;  %v820_v52 = vsel %vm707_vm1, %v614_v2, -inf  ;;  %v5135_v54 = vsel %vm1076_vm3, %v777_v34, %v1089_v39 }
  0xff   : > { %v859_v43 = vmax.f32 %v857_v22, %v858_v36  ;;  %v821_v55 = vrot.slane %v820_v52, 4  ;;  %v1095_v56 = vsel %vm1086_vm4, %v819_v32, %v1094_v33  ;;  %v5138_v57 = vmax.f32 %v850_v21, %v851_v41 }
 0x100   : > { %v623_v58 = vcombine.high %v621_v44, %v621_v44  ;;  %v827_v59 = vsel %vm707_vm1, %v622_v51, -inf  ;;  %v834_v60 = vsel %vm707_vm1, %v621_v44, -inf  ;;  %v866_v62 = vmax.f32 %v864_v37, %v865_v24 }
 0x101   : > { %v872_v63 = vrot.slane %v871_v40, 2  ;;  %v822_v0 = vmax.f32 %v820_v52, %v821_v55  ;;  %v828_v1 = vrot.slane %v827_v59, 4  ;;  %v835_v3 = vrot.slane %v834_v60, 4 }
 0x102   : > { %v841_v4 = vsel %vm707_vm1, %v623_v58, -inf  ;;  %v658_v5 = vcombine.high %v528_v53, %v528_v53  ;;  %v665_v6 = vrot.slane %v528_v53, %v5067_v50  ;;  %v860_v7 = vrot.slane %v859_v43, 1 }
 0x103   : > { %v823_v8 = vrot.slane %v822_v0, 2  ;;  %v829_v9 = vmax.f32 %v827_v59, %v828_v1  ;;  %v523_v10 = vadd.f32 %v5064_v49, %v522_v61  ;;  %v836_v11 = vmax.f32 %v834_v60, %v835_v3 }
 0x104   : > { %v842_v12 = vrot.slane %v841_v4, 4  ;;  %v672_v13 = vrot.slane %v658_v5, %v5067_v50  ;;  %v673_v14 = vcombine.high %v665_v6, %v665_v6  ;;  %v873_v15 = vmax.f32 %v871_v40, %v872_v63 }
 0x105   : > { %v824_v16 = vmax.f32 %v822_v0, %v823_v8  ;;  %v830_v17 = vrot.slane %v829_v9, 2  ;;  %v904_v18 = vsel %vm707_vm1, %v665_v6, -inf  ;;  %v867_v19 = vrot.slane %v866_v62, 1 }
 0x106   : > { %v837_v20 = vrot.slane %v836_v11, 2  ;;  %v843_v21 = vmax.f32 %v841_v4, %v842_v12  ;;  %v674_v22 = vcombine.high %v672_v13, %v672_v13  ;;  %v911_v26 = vsel %vm707_vm1, %v673_v14, -inf }
 0x107   : > { %v825_v23 = vrot.slane %v824_v16, 1  ;;  %v831_v25 = vmax.f32 %v829_v9, %v830_v17  ;;  %v918_v49 = vsel %vm707_vm1, %v672_v13, -inf  ;;  %v905_v33 = vrot.slane %v904_v18, 4 }
 0x108   : > { %v838_v27 = vmax.f32 %v836_v11, %v837_v20  ;;  %v844_v32 = vrot.slane %v843_v21, 2  ;;  %v912_v34 = vrot.slane %v911_v26, 4  ;;  %v919_v38 = vrot.slane %v918_v49, 4 }
 0x109   : > { %v826_v36 = vmax.f32 %v824_v16, %v825_v23  ;;  %v832_v37 = vrot.slane %v831_v25, 1  ;;  %v925_v39 = vsel %vm707_vm1, %v674_v22, -inf  ;;  %v853_v41 = vrot.slane %v5138_v57, 1 }
 0x10a   : > { %v874_v42 = vrot.slane %v873_v15, 1  ;;  %v845_v2 = vmax.f32 %v843_v21, %v844_v32  ;;  %v913_v24 = vmax.f32 %v911_v26, %v912_v34  ;;  %v861_v40 = vmax.f32 %v859_v43, %v860_v7  ;;  %v975_v34 = vld [vmem:[%s6498_s3 + $0x158] sm:$0xff] }
 0x10b   : > { %v839_v44 = vrot.slane %v838_v27, 1  ;;  %v920_v51 = vmax.f32 %v918_v49, %v919_v38  ;;  %v926_v52 = vrot.slane %v925_v39, 4  ;;  %v868_v53 = vmax.f32 %v866_v62, %v867_v19 }
 0x10c   : > { %v833_v55 = vmax.f32 %v831_v25, %v832_v37  ;;  %v5151_v58 = vmax.f32 %v904_v18, %v905_v33  ;;  %v914_v59 = vrot.slane %v913_v24, 2  ;;  %v1096_v60 = vsel %vm1088_vm6, %v826_v36, %v1095_v56 }
 0x10d   : > { %v921_v61 = vrot.slane %v920_v51, 2  ;;  %v927_v63 = vmax.f32 %v925_v39, %v926_v52  ;;  %v641_v0 = vcombine.high %v523_v10, %v523_v10  ;;  %v1091_v1 = vsel %vm1078_vm5, %v5127_v31, %v5135_v54 }
 0x10e   : > { %v854_v3 = vmax.f32 %v5138_v57, %v853_v41  ;;  %v5158_v43 = vmax.f32 %v873_v15, %v874_v42  ;;  %v846_v4 = vrot.slane %v845_v2, 1  ;;  %v840_v5 = vmax.f32 %v838_v27, %v839_v44  ;;  %v976_v27 = vld [vmem:[%s6498_s3 + $0x160] sm:$0xff]  ;;  %v974_v42 = vld [vmem:[%s6498_s3 + $0x150] sm:$0xff] }
 0x10f   : > { %v5160_v62 = vmax.f32 %v913_v24, %v914_v59  ;;  %v648_v6 = vrot.slane %v523_v10, %v5067_v50  ;;  %v655_v7 = vrot.slane %v641_v0, %v5067_v50  ;;  %v5165_v56 = vsel %vm1084_vm2, %v868_v53, %v861_v40  ;;  %v994_v59 = vld [vmem:[%s6498_s3 + $0x1f0] sm:$0xff] }
 0x110   : > { %v1097_v8 = vsel %vm1076_vm3, %v833_v55, %v1096_v60  ;;  %v907_v31 = vrot.slane %v5151_v58, 2  ;;  %v1081_v54 = vsel %vm1080_vm7, %v5116_v28, %v5120_v29  ;;  %v5172_v57 = vmax.f32 %v920_v51, %v921_v61  ;;  %v978_v29 = vld [vmem:[%s6498_s3 + $0x170] sm:$0xff]  ;;  %v972_v55 = vld [vmem:[%s6498_s3 + $0x140] sm:$0xff] }
 0x111   : > { %v928_v9 = vrot.slane %v927_v63, 2  ;;  %v656_v11 = vcombine.high %v648_v6, %v648_v6  ;;  %v657_v12 = vcombine.high %v655_v7, %v655_v7  ;;  %v847_v10 = vmax.f32 %v845_v2, %v846_v4 }
 0x112   : > { %v876_v13 = vsel %vm707_vm1, %v648_v6, -inf  ;;  %v890_v14 = vsel %vm707_vm1, %v655_v7, -inf  ;;  %v1083_v15 = vsel %vm1082_vm8, %v5084_v45, %v1081_v54  ;;  %v1098_v16 = vsel %vm1078_vm5, %v840_v5, %v1097_v8  ;;  %v977_v45 = vld [vmem:[%s6498_s3 + $0x168] sm:$0xff]  ;;  %v970_v6 = vld [vmem:[%s6498_s3 + $0x130] sm:$0xff] }
 0x113   : > { %v916_v17 = vrot.slane %v5160_v62, 1  ;;  %v877_v18 = vrot.slane %v876_v13, 4  ;;  %v883_v28 = vsel %vm707_vm1, %v656_v11, -inf  ;;  %v891_v20 = vrot.slane %v890_v14, 4  ;;  %v993_v7 = vld [vmem:[%s6498_s3 + $0x1e8] sm:$0xff] }
 0x114   : > { %v884_v19 = vrot.slane %v883_v28, 4  ;;  %v897_v21 = vsel %vm707_vm1, %v657_v12, -inf  ;;  %v5186_v22 = vsel %vm1112_vm9, 0.0, %v1083_v15  ;;  %v923_v23 = vrot.slane %v5172_v57, 1  ;;  %v991_v15 = vld [vmem:[%s6498_s3 + $0x1d8] sm:$0xff] }
 0x115   : > { %v5192_v25 = vmax.f32 %v927_v63, %v928_v9  ;;  %v878_v26 = vmax.f32 %v876_v13, %v877_v18  ;;  %v898_v49 = vrot.slane %v897_v21, 4  ;;  %4322 = vmatmul.mubr.msk.f32.vlgmr.msra.gmra.mxu1 %vm1127_vm10, %v5186_v22  ;;  %v892_v33 = vmax.f32 %v890_v14, %v891_v20  ;;  %v990_v20 = vld [vmem:[%s6498_s3 + $0x1d0] sm:$0xff] }
 0x116   : > { %v885_v32 = vmax.f32 %v883_v28, %v884_v19  ;;  %1385 = vmatpush1.msra.mxu1 %v978_v29  ;;  %1207 = vmatprep.mubr.f32.mxu1 %v4865_v35  ;;  %v1092_v36 = vsel %vm1080_vm7, %v5129_v47, %v1091_v1  ;;  %v1236_v37 = vrot.slane %v5186_v22, 1  ;;  %v1099_v2 = vsel %vm1080_vm7, %v847_v10, %v1098_v16  ;;  %v973_v47 = vld [vmem:[%s6498_s3 + $0x148] sm:$0xff]  ;;  %v967_v28 = vld [vmem:[%s6498_s3 + $0x118] sm:$0xff] }
 0x117   : > { %v879_v38 = vrot.slane %v878_v26, 2  ;;  %v899_v39 = vmax.f32 %v897_v21, %v898_v49  ;;  %1386 = vmatprep.subr.mxu1 %v977_v45  ;;  %v5208_v41 = vsel %vm1082_vm8, %v5122_v30, %v1092_v36  ;;  %v893_v40 = vrot.slane %v892_v33, 2  ;;  %v966_v21 = vld [vmem:[%s6498_s3 + $0x110] sm:$0xff]  ;;  %v965_v49 = vld [vmem:[%s6498_s3 + $0x108] sm:$0xff] }
 0x118   : > { %v886_v24 = vrot.slane %v885_v32, 2  ;;  %1387 = vmatpush1.msra.mxu1 %v976_v27  ;;  %v1237_v44 = vrot.slane %v5208_v41, 1  ;;  %v5219_v51 = vsel %vm1082_vm8, %v854_v3, %v1099_v2  ;;  %v908_v30 = vmax.f32 %v5151_v58, %v907_v31  ;;  %v971_v58 = vld [vmem:[%s6498_s3 + $0x138] sm:$0xff] }
 0x119   : > { %v880_v52 = vmax.f32 %v878_v26, %v879_v38  ;;  %v900_v53 = vrot.slane %v899_v39, 2  ;;  %1388 = vmatprep.subr.mxu1 %v975_v34  ;;  %4323 = vmatmul.mubr.msk.f32.gmra.mxu1 %vm1127_vm10, %v5208_v41  ;;  %v894_v61 = vmax.f32 %v892_v33, %v893_v40  ;;  %v1239_v0 = vrot.slane %v5219_v51, 1  ;;  %v964_v33 = vld [vmem:[%s6498_s3 + $0x100] sm:$0xff]  ;;  %v1011_v2 = vld [vmem:[%s6498_s3 + $0x278] sm:$0xff] }
 0x11a   : > { %v887_v60 = vmax.f32 %v885_v32, %v886_v24  ;;  %1389 = vmatpush1.msra.mxu1 %v974_v42  ;;  %v1238_v63 = vsel %vm1235_vm11, %v1236_v37, %v1237_v44  ;;  %1213 = vmatprep.mubr.f32.mxu1 %v4865_v35  ;;  %v930_v1 = vrot.slane %v5192_v25, 1  ;;  %v1102_v5 = vsel %vm1086_vm4, %v5158_v43, %v5165_v56  ;;  %v969_v43 = vld [vmem:[%s6498_s3 + $0x128] sm:$0xff]  ;;  %v988_v32 = vld [vmem:[%s6498_s3 + $0x1c0] sm:$0xff]  ;;  %v987_v37 = vld [vmem:[%s6498_s3 + $0x1b8] sm:$0xff] }
 0x11b   : > { %v881_v3 = vrot.slane %v880_v52, 1  ;;  %v901_v4 = vmax.f32 %v899_v39, %v900_v53  ;;  %1390 = vmatprep.subr.mxu1 %v973_v47  ;;  %4326 = vmatmul.mubr.msk.f32.vlgmr.msra.gmra.mxu0 %vm1127_vm10, %v1238_v63  ;;  %v917_v8 = vmax.f32 %v5160_v62, %v916_v17  ;;  %v924_v31 = vmax.f32 %v5172_v57, %v923_v23  ;;  %v992_v62 = vld [vmem:[%s6498_s3 + $0x1e0] sm:$0xff]  ;;  %v986_v39 = vld [vmem:[%s6498_s3 + $0x1b0] sm:$0xff]  ;;  %v985_v47 = vld [vmem:[%s6498_s3 + $0x1a8] sm:$0xff] }
 0x11c   : > { %v888_v54 = vrot.slane %v887_v60, 1  ;;  %v895_v9 = vrot.slane %v894_v61, 1  ;;  %1391 = vmatpush1.msra.mxu1 %v972_v55  ;;  %1500 = vmatpush1.msra.mxu0 %v994_v59  ;;  %v909_v56 = vrot.slane %v908_v30, 1  ;;  %v968_v57 = vld [vmem:[%s6498_s3 + $0x120] sm:$0xff]  ;;  %v1240_v14 = vsel %vm1235_vm11, %v1237_v44, %v1239_v0  ;;  %v1010_v44 = vld [vmem:[%s6498_s3 + $0x270] sm:$0xff]  ;;  %v1009_v53 = vld [vmem:[%s6498_s3 + $0x268] sm:$0xff] }
 0x11d   : > { %v882_v11 = vmax.f32 %v880_v52, %v881_v3  ;;  %v902_v12 = vrot.slane %v901_v4, 1  ;;  %1392 = vmatprep.subr.mxu1 %v971_v58  ;;  %4324 = vmatmul.mubr.msk.f32.gmra.mxu1 %vm1127_vm10, %v5219_v51  ;;  %v931_v16 = vmax.f32 %v5192_v25, %v930_v1  ;;  %v1108_v29 = vsel %vm1084_vm2, %v924_v31, %v917_v8  ;;  %v989_v25 = vld [vmem:[%s6498_s3 + $0x1c8] sm:$0xff]  ;;  %v984_v52 = vld [vmem:[%s6498_s3 + $0x1a0] sm:$0xff]  ;;  %v983_v59 = vld [vmem:[%s6498_s3 + $0x198] sm:$0xff] }
 0x11e   : > { %v889_v10 = vmax.f32 %v887_v60, %v888_v54  ;;  %v896_v13 = vmax.f32 %v894_v61, %v895_v9  ;;  %1393 = vmatpush1.msra.mxu1 %v970_v6  ;;  %1501 = vmatprep.subr.mxu0 %v993_v7  ;;  %v910_v45 = vmax.f32 %v908_v30, %v909_v56  ;;  %v1352_v38 = vrot.slane %v5208_v41, 2  ;;  %v1008_v60 = vld [vmem:[%s6498_s3 + $0x260] sm:$0xff]  ;;  %v982_v58 = vld [vmem:[%s6498_s3 + $0x190] sm:$0xff]  ;;  %v981_v1 = vld [vmem:[%s6498_s3 + $0x188] sm:$0xff] }
 0x11f   : > { %v903_v17 = vmax.f32 %v901_v4, %v902_v12  ;;  %v1103_v18 = vsel %vm1088_vm6, %v882_v11, %v1102_v5  ;;  %1323 = vmatprep.mubr.f32.mxu0 %v4865_v35  ;;  %1394 = vmatprep.subr.mxu1 %v969_v43  ;;  %v1109_v34 = vsel %vm1086_vm4, %v931_v16, %v1108_v29  ;;  %v1351_v24 = vrot.slane %v5186_v22, 2  ;;  %v1006_v3 = vld [vmem:[%s6498_s3 + $0x250] sm:$0xff]  ;;  %v980_v6 = vld [vmem:[%s6498_s3 + $0x180] sm:$0xff]  ;;  %v1005_v7 = vld [vmem:[%s6498_s3 + $0x248] sm:$0xff] }
 0x120   : > { %v1104_v19 = vsel %vm1076_vm3, %v889_v10, %v1103_v18  ;;  %1502 = vmatpush1.msra.mxu0 %v992_v62  ;;  %1395 = vmatpush1.msra.mxu1 %v968_v57  ;;  %v5319_v40 = vsel %vm1112_vm9, %v1109_v34, 0.0  ;;  %v1354_v61 = vrot.slane %v5219_v51, 2  ;;  %v1467_v4 = vrot.slane %v5208_v41, 3  ;;  %v1004_v31 = vld [vmem:[%s6498_s3 + $0x240] sm:$0xff]  ;;  %v1027_v54 = vld [vmem:[%s6498_s3 + $0x2f8] sm:$0xff]  ;;  %v1026_v11 = vld [vmem:[%s6498_s3 + $0x2f0] sm:$0xff] }
 0x121   : > { %v1105_v23 = vsel %vm1078_vm5, %v896_v13, %v1104_v19  ;;  %4327 = vmatmul.mubr.msk.f32.gmra.mxu0 %vm1127_vm10, %v1240_v14  ;;  %1503 = vmatprep.subr.mxu0 %v991_v15  ;;  %v1353_v30 = vsel %vm1350_vm12, %v1351_v24, %v1352_v38  ;;  %v1243_v55 = vrot.slane %v5319_v40, 1  ;;  %v1466_v8 = vrot.slane %v5186_v22, 3  ;;  %v1003_v56 = vld [vmem:[%s6498_s3 + $0x238] sm:$0xff]  ;;  %v1002_v12 = vld [vmem:[%s6498_s3 + $0x230] sm:$0xff]  ;;  %v1025_v62 = vld [vmem:[%s6498_s3 + $0x2e8] sm:$0xff] }
 0x122   : > { %1219 = vmatprep.mubr.f32.mxu1 %v4865_v35  ;;  %1396 = vmatprep.subr.mxu1 %v967_v28  ;;  %v1106_v26 = vsel %vm1080_vm7, %v903_v17, %v1105_v23  ;;  %v1355_v5 = vsel %vm1350_vm12, %v1352_v38, %v1354_v61  ;;  %v1001_v10 = vld [vmem:[%s6498_s3 + $0x228] sm:$0xff]  ;;  %v1469_v13 = vrot.slane %v5219_v51, 3  ;;  %v1024_v14 = vld [vmem:[%s6498_s3 + $0x2e0] sm:$0xff]  ;;  %v1023_v16 = vld [vmem:[%s6498_s3 + $0x2d8] sm:$0xff]  ;;  %v1358_v29 = vrot.slane %v5319_v40, 2 }
 0x123   : > { %1504 = vmatpush1.msra.mxu0 %v990_v20  ;;  %v5291_v27 = vsel %vm1082_vm8, %v910_v45, %v1106_v26  ;;  %1397 = vmatpush1.msra.mxu1 %v966_v21  ;;  %v1468_v43 = vsel %vm1465_vm13, %v1466_v8, %v1467_v4  ;;  %v1000_v15 = vld [vmem:[%s6498_s3 + $0x220] sm:$0xff]  ;;  %v999_v17 = vld [vmem:[%s6498_s3 + $0x218] sm:$0xff]  ;;  %v1022_v28 = vld [vmem:[%s6498_s3 + $0x2d0] sm:$0xff]  ;;  %v1698_v8 = vrot.slane %v5219_v51, 5 }
 0x124   : > { %4325 = vmatmul.mubr.msk.f32.gmra.mxu1 %vm1127_vm10, %v5291_v27  ;;  %1505 = vmatprep.subr.mxu0 %v989_v25  ;;  %v1241_v36 = vrot.slane %v5291_v27, 1  ;;  %v1356_v9 = vrot.slane %v5291_v27, 2  ;;  %v1470_v18 = vsel %vm1465_vm13, %v1467_v4, %v1469_v13  ;;  %v998_v19 = vld [vmem:[%s6498_s3 + $0x210] sm:$0xff]  ;;  %v1021_v20 = vld [vmem:[%s6498_s3 + $0x2c8] sm:$0xff]  ;;  %v1471_v23 = vrot.slane %v5291_v27, 3  ;;  %v1020_v25 = vld [vmem:[%s6498_s3 + $0x2c0] sm:$0xff] }
 0x125   : > { %1329 = vmatprep.mubr.f32.mxu0 %v4865_v35  ;;  %1398 = vmatprep.subr.mxu1 %v965_v49  ;;  %v997_v45 = vld [vmem:[%s6498_s3 + $0x208] sm:$0xff]  ;;  %v996_v26 = vld [vmem:[%s6498_s3 + $0x200] sm:$0xff]  ;;  %v1019_v49 = vld [vmem:[%s6498_s3 + $0x2b8] sm:$0xff]  ;;  %v1586_v4 = vrot.slane %v5291_v27, 4 }
 0x126   : > { %1506 = vmatpush1.msra.mxu0 %v988_v32  ;;  %v1242_v42 = vsel %vm1235_vm11, %v1239_v0, %v1241_v36  ;;  %1399 = vmatpush1.msra.mxu1 %v964_v33  ;;  %v1244_v63 = vsel %vm1235_vm11, %v1241_v36, %v1243_v55  ;;  %v1007_v0 = vld [vmem:[%s6498_s3 + $0x258] sm:$0xff]  ;;  %v1357_v57 = vsel %vm1350_vm12, %v1354_v61, %v1356_v9  ;;  %v1582_v32 = vrot.slane %v5208_v41, 4  ;;  %v1018_v33 = vld [vmem:[%s6498_s3 + $0x2b0] sm:$0xff]  ;;  %v1017_v38 = vld [vmem:[%s6498_s3 + $0x2a8] sm:$0xff] }
 0x127   : > { %4328 = vmatmul.mubr.msk.f32.gmra.mxu0 %vm1127_vm10, %v1242_v42  ;;  %1507 = vmatprep.subr.mxu0 %v987_v37  ;;  %v1359_v21 = vsel %vm1350_vm12, %v1356_v9, %v1358_v29  ;;  %v1472_v34 = vsel %vm1465_vm13, %v1469_v13, %v1471_v23  ;;  %v1043_v36 = vld [vmem:[%s6498_s3 + $0x378] sm:$0xff]  ;;  %v1581_v37 = vrot.slane %v5186_v22, 4  ;;  %v1041_v24 = vld [vmem:[%s6498_s3 + $0x368] sm:$0xff]  ;;  %v1014_v55 = vld [vmem:[%s6498_s3 + $0x290] sm:$0xff] }
 0x128   : > { %1432 = vmatprep.mubr.f32.mxu1 %v4865_v35  ;;  %1508 = vmatpush1.msra.mxu0 %v986_v39  ;;  %v1042_v39 = vld [vmem:[%s6498_s3 + $0x370] sm:$0xff]  ;;  %v1033_v9 = vld [vmem:[%s6498_s3 + $0x328] sm:$0xff] }
 0x129   : > { %1614 = vmatprep.subr.mxu1 %v1011_v2  ;;  %4330 = vmatmul.mubr.msk.f32.vlgmr.msra.gmra.mxu1 %vm1127_vm10, %v1353_v30  ;;  %v1583_v42 = vsel %vm1580_vm14, %v1581_v37, %v1582_v32  ;;  %v1016_v2 = vld [vmem:[%s6498_s3 + $0x2a0] sm:$0xff]  ;;  %v1038_v61 = vld [vmem:[%s6498_s3 + $0x350] sm:$0xff]  ;;  %v1029_v13 = vld [vmem:[%s6498_s3 + $0x308] sm:$0xff] }
 0x12a   : > { %1509 = vmatprep.subr.mxu0 %v985_v47  ;;  %1615 = vmatpush1.msra.mxu1 %v1010_v44  ;;  %v1473_v47 = vrot.slane %v5319_v40, 3  ;;  %v1015_v44 = vld [vmem:[%s6498_s3 + $0x298] sm:$0xff]  ;;  %v1040_v30 = vld [vmem:[%s6498_s3 + $0x360] sm:$0xff] }
 0x12b   : > { %1335 = vmatprep.mubr.f32.mxu0 %v4865_v35  ;;  %1510 = vmatpush1.msra.mxu0 %v984_v52  ;;  %v1584_v52 = vrot.slane %v5219_v51, 4 }
 0x12c   : > { %1616 = vmatprep.subr.mxu1 %v1009_v53  ;;  %4329 = vmatmul.mubr.msk.f32.gmra.mxu0 %vm1127_vm10, %v1244_v63  ;;  %v1474_v53 = vsel %vm1465_vm13, %v1471_v23, %v1473_v47  ;;  %v1696_v63 = vrot.slane %v5208_v41, 5  ;;  %v2401_v47 = vld [vmem:[%s6500_s5 + $0x68] sm:$0xff] }
 0x12d   : > { %1511 = vmatprep.subr.mxu0 %v983_v59  ;;  %1617 = vmatpush1.msra.mxu1 %v1008_v60  ;;  %v1039_v59 = vld [vmem:[%s6498_s3 + $0x358] sm:$0xff]  ;;  %v1013_v60 = vld [vmem:[%s6498_s3 + $0x288] sm:$0xff] }
 0x12e   : > { %1438 = vmatprep.mubr.f32.mxu1 %v4865_v35  ;;  %1512 = vmatpush1.msra.mxu0 %v982_v58  ;;  %v1585_v58 = vsel %vm1580_vm14, %v1582_v32, %v1584_v52  ;;  %v2402_v32 = vld [vmem:[%s6500_s5 + $0x70] sm:$0xff] }
 0x12f   : > { %1618 = vmatprep.subr.mxu1 %v1007_v0  ;;  %4331 = vmatmul.mubr.msk.f32.gmra.mxu1 %vm1127_vm10, %v1355_v5  ;;  %v1012_v0 = vld [vmem:[%s6498_s3 + $0x280] sm:$0xff] }
 0x130   : > { %1513 = vmatprep.subr.mxu0 %v981_v1  ;;  %1619 = vmatpush1.msra.mxu1 %v1006_v3  ;;  %v1037_v1 = vld [vmem:[%s6498_s3 + $0x348] sm:$0xff]  ;;  %v1695_v3 = vrot.slane %v5186_v22, 5  ;;  %v1036_v5 = vld [vmem:[%s6498_s3 + $0x340] sm:$0xff] }
 0x131   : > { %1514 = vmatpush1.msra.mxu0 %v980_v6  ;;  %1547 = vmatprep.mubr.f32.mxu0 %v4865_v35 }
 0x132   : > { %1620 = vmatprep.subr.mxu1 %v1005_v7  ;;  %4334 = vmatmul.mubr.msk.f32.vlgmr.msra.gmra.mxu0 %vm1127_vm10, %v1468_v43  ;;  %v1697_v6 = vsel %vm1112_vm9, %v1695_v3, %v1696_v63  ;;  %v1035_v7 = vld [vmem:[%s6498_s3 + $0x338] sm:$0xff]  ;;  %v1032_v43 = vld [vmem:[%s6498_s3 + $0x320] sm:$0xff] }
 0x133   : > { %1621 = vmatpush1.msra.mxu1 %v1004_v31  ;;  %1728 = vmatprep.subr.mxu0 %v1027_v54  ;;  %v1034_v31 = vld [vmem:[%s6498_s3 + $0x330] sm:$0xff]  ;;  %v1587_v54 = vsel %vm1580_vm14, %v1584_v52, %v1586_v4  ;;  %v2400_v52 = vld [vmem:[%s6500_s5 + $0x60] sm:$0xff] }
 0x134   : > { %1444 = vmatprep.mubr.f32.mxu1 %v4865_v35  ;;  %1622 = vmatprep.subr.mxu1 %v1003_v56  ;;  %v1699_v56 = vsel %vm1112_vm9, %v1696_v63, %v1698_v8  ;;  %v5639_v63 = vld [vmem:[%s6500_s5 + $0xb8] sm:$0xff] }
 0x135   : > { %1729 = vmatpush1.msra.mxu0 %v1026_v11  ;;  %4332 = vmatmul.mubr.msk.f32.gmra.mxu1 %vm1127_vm10, %v1357_v57  ;;  %v1031_v11 = vld [vmem:[%s6498_s3 + $0x318] sm:$0xff]  ;;  %v1030_v57 = vld [vmem:[%s6498_s3 + $0x310] sm:$0xff] }
 0x136   : > { %1623 = vmatpush1.msra.mxu1 %v1002_v12  ;;  %1730 = vmatprep.subr.mxu0 %v1025_v62  ;;  %v1588_v12 = vrot.slane %v5319_v40, 4  ;;  %v1700_v62 = vrot.slane %v5291_v27, 5 }
 0x137   : > { %1553 = vmatprep.mubr.f32.mxu0 %v4865_v35  ;;  %1624 = vmatprep.subr.mxu1 %v1001_v10 }
 0x138   : > { %1731 = vmatpush1.msra.mxu0 %v1024_v14  ;;  %1625 = vmatpush1.msra.mxu1 %v1000_v15  ;;  %v1589_v10 = vsel %vm1580_vm14, %v1586_v4, %v1588_v12  ;;  %v1811_v14 = vrot.slane %v5208_v41, 6  ;;  %v1028_v15 = vld [vmem:[%s6498_s3 + $0x300] sm:$0xff] }
 0x139   : > { %4335 = vmatmul.mubr.msk.f32.gmra.mxu0 %vm1127_vm10, %v1470_v18  ;;  %1732 = vmatprep.subr.mxu0 %v1023_v16  ;;  %v1701_v16 = vsel %vm1112_vm9, %v1698_v8, %v1700_v62  ;;  %v1702_v18 = vrot.slane %v5319_v40, 5 }
 0x13a   : > { %1450 = vmatprep.mubr.f32.mxu1 %v4865_v35  ;;  %1626 = vmatprep.subr.mxu1 %v999_v17  ;;  %v1810_v17 = vrot.slane %v5186_v22, 6 }
 0x13b   : > { %1733 = vmatpush1.msra.mxu0 %v1022_v28  ;;  %4333 = vmatmul.mubr.msk.f32.gmra.mxu1 %vm1127_vm10, %v1359_v21  ;;  %v1813_v28 = vrot.slane %v5219_v51, 6  ;;  %v1703_v29 = vsel %vm1112_vm9, %v1700_v62, %v1702_v18 }
 0x13c   : > { %1627 = vmatpush1.msra.mxu1 %v998_v19  ;;  %1734 = vmatprep.subr.mxu0 %v1021_v20  ;;  %v1812_v41 = vsel %vm1809_vm15, %v1810_v17, %v1811_v14  ;;  %v1815_v19 = vrot.slane %v5291_v27, 6  ;;  %v1817_v20 = vrot.slane %v5319_v40, 6  ;;  %v2395_v27 = vld [vmem:[%s6500_s5 + $0x38] sm:$0xff] }
 0x13d   : > { %1559 = vmatprep.mubr.f32.mxu0 %v4865_v35  ;;  %1628 = vmatprep.subr.mxu1 %v997_v45  ;;  %v1814_v22 = vsel %vm1809_vm15, %v1811_v14, %v1813_v28  ;;  %v2394_v45 = vld [vmem:[%s6500_s5 + $0x30] sm:$0xff]  ;;  %v5663_v14 = vld [vmem:[%s6502_s7 + $0x38] sm:$0xff] }
 0x13e   : > { %1735 = vmatpush1.msra.mxu0 %v1020_v25  ;;  %1629 = vmatpush1.msra.mxu1 %v996_v26  ;;  %v1816_v51 = vsel %vm1809_vm15, %v1813_v28, %v1815_v19  ;;  %v1818_v21 = vsel %vm1809_vm15, %v1815_v19, %v1817_v20  ;;  %v2403_v25 = vld [vmem:[%s6500_s5 + $0x78] sm:$0xff]  ;;  %v2392_v26 = vld [vmem:[%s6500_s5 + $0x20] sm:$0xff] }
 0x13f   : > { %4336 = vmatmul.mubr.msk.f32.gmra.mxu0 %vm1127_vm10, %v1472_v34  ;;  %1736 = vmatprep.subr.mxu0 %v1019_v49 }
 0x140   : > { %1662 = vmatprep.mubr.f32.mxu1 %v4865_v35  ;;  %1737 = vmatpush1.msra.mxu0 %v1018_v33  ;;  %v2391_v33 = vld [vmem:[%s6500_s5 + $0x18] sm:$0xff] }
 0x141   : > { %1843 = vmatprep.subr.mxu1 %v1043_v36  ;;  %4338 = vmatmul.mubr.msk.f32.vlgmr.msra.gmra.mxu1 %vm1127_vm10, %v1583_v42 }
 0x142   : > { %1738 = vmatprep.subr.mxu0 %v1017_v38  ;;  %1844 = vmatpush1.msra.mxu1 %v1042_v39 }
 0x143   : > { %1565 = vmatprep.mubr.f32.mxu0 %v4865_v35  ;;  %1739 = vmatpush1.msra.mxu0 %v1016_v2 }
 0x144   : > { %1845 = vmatprep.subr.mxu1 %v1041_v24  ;;  %4337 = vmatmul.mubr.msk.f32.gmra.mxu0 %vm1127_vm10, %v1474_v53  ;;  %v2389_v53 = vld [vmem:[%s6500_s5 + $0x8] sm:$0xff] }
 0x145   : > { %1740 = vmatprep.subr.mxu0 %v1015_v44  ;;  %1846 = vmatpush1.msra.mxu1 %v1040_v30  ;;  %v2390_v44 = vld [vmem:[%s6500_s5 + $0x10] sm:$0xff] }
 0x146   : > { %1668 = vmatprep.mubr.f32.mxu1 %v4865_v35  ;;  %1741 = vmatpush1.msra.mxu0 %v1014_v55  ;;  %v2399_v55 = vld [vmem:[%s6500_s5 + $0x58] sm:$0xff] }
 0x147   : > { %1847 = vmatprep.subr.mxu1 %v1039_v59  ;;  %4339 = vmatmul.mubr.msk.f32.gmra.mxu1 %vm1127_vm10, %v1585_v58 }
 0x148   : > { %1742 = vmatprep.subr.mxu0 %v1013_v60  ;;  %1848 = vmatpush1.msra.mxu1 %v1038_v61  ;;  %v2388_v60 = vld [vmem:[%s6500_s5] sm:$0xff]  ;;  %v2398_v61 = vld [vmem:[%s6500_s5 + $0x50] sm:$0xff] }
 0x149   : > { %1743 = vmatpush1.msra.mxu0 %v1012_v0  ;;  %1776 = vmatprep.mubr.f32.mxu0 %v4865_v35 }
 0x14a   : > { %1849 = vmatprep.subr.mxu1 %v1037_v1  ;;  %4342 = vmatmul.mubr.msk.f32.vlgmr.msra.gmra.mxu0 %vm1127_vm10, %v1697_v6  ;;  %v2397_v6 = vld [vmem:[%s6500_s5 + $0x48] sm:$0xff] }
 0x14b   : > { %1850 = vmatpush1.msra.mxu1 %v1036_v5  ;;  %1674 = vmatprep.mubr.f32.mxu1 %v4865_v35 }
 0x14c   : > { %1851 = vmatprep.subr.mxu1 %v1035_v7  ;;  %4340 = vmatmul.mubr.msk.f32.gmra.mxu1 %vm1127_vm10, %v1587_v54 }
 0x14d   : > { %1852 = vmatpush1.msra.mxu1 %v1034_v31  ;;  %1782 = vmatprep.mubr.f32.mxu0 %v4865_v35  ;;  %v2396_v31 = vld [vmem:[%s6500_s5 + $0x40] sm:$0xff] }
 0x14e   : > { %1853 = vmatprep.subr.mxu1 %v1033_v9  ;;  %4343 = vmatmul.mubr.msk.f32.gmra.mxu0 %vm1127_vm10, %v1699_v56 }
 0x14f   : > { %1854 = vmatpush1.msra.mxu1 %v1032_v43  ;;  %1680 = vmatprep.mubr.f32.mxu1 %v4865_v35 }
 0x150   : > { %1855 = vmatprep.subr.mxu1 %v1031_v11  ;;  %4341 = vmatmul.mubr.msk.f32.gmra.mxu1 %vm1127_vm10, %v1589_v10 }
 0x151   : > { %1856 = vmatpush1.msra.mxu1 %v1030_v57  ;;  %1788 = vmatprep.mubr.f32.mxu0 %v4865_v35 }
 0x152   : > { %1857 = vmatprep.subr.mxu1 %v1029_v13  ;;  %4344 = vmatmul.mubr.msk.f32.gmra.mxu0 %vm1127_vm10, %v1701_v16  ;;  %v1123_v16 = vsub.s32 1, %v5059_v48 }
 0x153   : > { %1858 = vmatpush1.msra.mxu1 %v1028_v15  ;;  %1891 = vmatprep.mubr.f32.mxu1 %v4865_v35  ;;  %v1119_v15 = vsub.s32 0, %v5059_v48 }
 0x154   : > { %4346 = vmatmul.mubr.msk.f32.vlgmr.msra.gmra.mxu1 %vm1127_vm10, %v1812_v41  ;;  %1794 = vmatprep.mubr.f32.mxu0 %v4865_v35  ;;  %v1115_v41 = vld [vmem:[%s6499_s4] sm:$0x3] }
 0x155   : > { %1897 = vmatprep.mubr.f32.mxu1 %v4865_v35  ;;  %4559 = vmatprep.subr.mxu0 %v2395_v27 }
 0x156   : > { %4345 = vmatmul.mubr.msk.f32.gmra.mxu0 %vm1127_vm10, %v1703_v29  ;;  %4578 = vmatprep.subr.mxu1 %v2403_v25  ;;  %v1120_v29 = vrot.slane %v1115_v41, %v1119_v15 }
 0x157   : > { %4560 = vmatpush3.msra.mxu0 %v2395_v27  ;;  %4579 = vmatpush3.msra.mxu1 %v2403_v25 }
 0x158   : > { %4347 = vmatmul.mubr.msk.f32.gmra.mxu1 %vm1127_vm10, %v1814_v22  ;;  %4561 = vmatprep.subr.mxu0 %v2394_v45  ;;  %v1124_v22 = vrot.slane %v1115_v41, %v1123_v16 }
 0x159   : > { %1903 = vmatprep.mubr.f32.mxu1 %v4865_v35  ;;  %4562 = vmatpush3.msra.mxu0 %v2394_v45 }
 0x15a   : > { %4580 = vmatprep.subr.mxu1 %v2402_v32 }
 0x15b   : > { %4581 = vmatpush3.msra.mxu1 %v2402_v32 }
 0x15c   : > { %4348 = vmatmul.mubr.msk.f32.gmra.mxu1 %vm1127_vm10, %v1816_v51  ;;  %4582 = vmatprep.subr.mxu1 %v2401_v47 }
 0x15d   : > { %1909 = vmatprep.mubr.f32.mxu1 %v4865_v35  ;;  %v2393_v35 = vld [vmem:[%s6500_s5 + $0x28] sm:$0xff]  ;;  %4583 = vmatpush3.msra.mxu1 %v2401_v47 }
 0x15e   : > { %4563 = vmatprep.subr.mxu0 %v2393_v35  ;;  %4584 = vmatprep.subr.mxu1 %v2400_v52 }
 0x15f   : > { %4564 = vmatpush3.msra.mxu0 %v2393_v35  ;;  %4585 = vmatpush3.msra.mxu1 %v2400_v52 }
 0x160   : > { %4349 = vmatmul.mubr.msk.f32.gmra.mxu1 %vm1127_vm10, %v1818_v21  ;;  %4565 = vmatprep.subr.mxu0 %v2392_v26 }
 0x161   : > { %4566 = vmatpush3.msra.mxu0 %v2392_v26  ;;  %4586 = vmatprep.subr.mxu1 %v2399_v55 }
 0x162   : > { %4567 = vmatprep.subr.mxu0 %v2391_v33  ;;  %4587 = vmatpush3.msra.mxu1 %v2399_v55 }
 0x163   : > { %4568 = vmatpush3.msra.mxu0 %v2391_v33  ;;  %4588 = vmatprep.subr.mxu1 %v2398_v61 }
 0x164   : > { %4569 = vmatprep.subr.mxu0 %v2390_v44  ;;  %4589 = vmatpush3.msra.mxu1 %v2398_v61 }
 0x165   : > { %4570 = vmatpush3.msra.mxu0 %v2390_v44  ;;  %4590 = vmatprep.subr.mxu1 %v2397_v6 }
 0x166   : > { %4571 = vmatprep.subr.mxu0 %v2389_v53  ;;  %4591 = vmatpush3.msra.mxu1 %v2397_v6 }
 0x167   : > { %4572 = vmatpush3.msra.mxu0 %v2389_v53  ;;  %4592 = vmatprep.subr.mxu1 %v2396_v31 }
 0x168   : > { %4573 = vmatprep.subr.mxu0 %v2388_v60  ;;  %4593 = vmatpush3.msra.mxu1 %v2396_v31 }
 0x169   : > { %4574 = vmatpush3.msra.mxu0 %v2388_v60  ;;  %4616 = vmatprep.subr.mxu1 %v5663_v14 }
 0x16a   : > { %4597 = vmatprep.subr.mxu0 %v5639_v63 }
 0x1d5   : > { %v5574_v23 = vpop.f32.mrf.mxu1 }
 0x1d6   : > { %v1226_v21 = vadd.f32 %v5574_v23, %v1120_v29 }
 0x1d7   : > { %v5579_v40 = vpop.f32.mrf.mxu1 }
 0x1d8   : > { %v1227_v27 = vadd.f32 %v5579_v40, %v1124_v22 }
 0x1d9   : > { %v5587_v49 = vpop.f32.mrf.mxu1 }
 0x1da   : > { %v1228_v53 = vadd.f32 %v5587_v49, %v1120_v29 }
 0x1db   : > { %v5595_v34 = vpop.f32.mrf.mxu1  ;;  %v5597_v36 = vpop.f32.mrf.mxu0 }
 0x1dc   : > { %v1342_v25 = vadd.f32 %v5597_v36, %v1226_v21  ;;  %v1229_v47 = vadd.f32 %v5595_v34, %v1124_v22 }
 0x1dd   : > { %v5599_v37 = vpop.f32.mrf.mxu1  ;;  %v5601_v38 = vpop.f32.mrf.mxu0 }
 0x1de   : > { %v1343_v26 = vadd.f32 %v5601_v38, %v1227_v27  ;;  %v1230_v6 = vadd.f32 %v5599_v37, %v1120_v29 }
 0x1df   : > { %v5603_v39 = vpop.f32.mrf.mxu1 }
 0x1e0   : > { %v1231_v36 = vadd.f32 %v5603_v39, %v1124_v22 }
 0x1e1   : > { %v5605_v42 = vpop.f32.mrf.mxu0 }
 0x1e2   : > { %v1344_v38 = vadd.f32 %v5605_v42, %v1228_v53 }
 0x1e3   : > { %v5607_v2 = vpop.f32.mrf.mxu0 }
 0x1e4   : > { %v5609_v24 = vpop.f32.mrf.mxu1  ;;  %v1345_v23 = vadd.f32 %v5607_v2, %v1229_v47 }
 0x1e5   : > { %v1232_v34 = vadd.f32 %v5609_v24, %v1120_v29 }
 0x1e6   : > { %v5617_v30 = vpop.f32.mrf.mxu1 }
 0x1e7   : > { %v5628_v59 = vpop.f32.mrf.mxu0  ;;  %v1233_v49 = vadd.f32 %v5617_v30, %v1124_v22 }
 0x1e8   : > { %v1346_v41 = vadd.f32 %v5628_v59, %v1230_v6 }
 0x1e9   : > { %v5641_v58 = vpop.f32.mrf.mxu0  ;;  %v1434_v0 = vpop.f32.mrf.mxu1 }
 0x1ea   : > { %v1457_v44 = vadd.f32 %v1434_v0, %v1342_v25  ;;  %v1347_v2 = vadd.f32 %v5641_v58, %v1231_v36 }
 0x1eb   : > { %v1436_v1 = vpop.f32.mrf.mxu1 }
 0x1ec   : > { %v5644_v3 = vpop.f32.mrf.mxu0  ;;  %v1458_v52 = vadd.f32 %v1436_v1, %v1343_v26 }
 0x1ed   : > { %v1348_v39 = vadd.f32 %v5644_v3, %v1232_v34 }
 0x1ee   : > { %v5646_v4 = vpop.f32.mrf.mxu0 }
 0x1ef   : > { %v1440_v5 = vpop.f32.mrf.mxu1  ;;  %v1349_v25 = vadd.f32 %v5646_v4, %v1233_v49 }
 0x1f1   : > { %v1442_v7 = vpop.f32.mrf.mxu1 }
 0x1f2   : > { %v1549_v8 = vpop.f32.mrf.mxu0  ;;  %v1460_v0 = vadd.f32 %v1442_v7, %v1345_v23 }
 0x1f3   : > { %v1572_v61 = vadd.f32 %v1549_v8, %v1457_v44  ;;  %v1459_v8 = vadd.f32 %v1440_v5, %v1344_v38 }
 0x1f4   : > { %v1551_v9 = vpop.f32.mrf.mxu0 }
 0x1f5   : > { %v1446_v54 = vpop.f32.mrf.mxu1  ;;  %v1573_v40 = vadd.f32 %v1551_v9, %v1458_v52 }
 0x1f6   : > { %v1461_v24 = vadd.f32 %v1446_v54, %v1346_v41 }
 0x1f7   : > { %v1448_v43 = vpop.f32.mrf.mxu1 }
 0x1f8   : > { %v1462_v7 = vadd.f32 %v1448_v43, %v1347_v2 }
 0x1f9   : > { %v1555_v56 = vpop.f32.mrf.mxu0 }
 0x1fb   : > { %v1452_v11 = vpop.f32.mrf.mxu1  ;;  %v1557_v12 = vpop.f32.mrf.mxu0 }
 0x1fc   : > { %v1575_v21 = vadd.f32 %v1557_v12, %v1460_v0  ;;  %v1463_v29 = vadd.f32 %v1452_v11, %v1348_v39 }
 0x1fd   : > { %v5654_v62 = vpop.f32.mrf.mxu1 }
 0x1fe   : > { %v1464_v58 = vadd.f32 %v5654_v62, %v1349_v25 }
 0x1ff   : > { %v5656_v57 = vpop.f32.mrf.mxu0 }
 0x200   : > { %v1576_v5 = vadd.f32 %v5656_v57, %v1461_v24 }
 0x201   : > { %v5658_v10 = vpop.f32.mrf.mxu0  ;;  %v1664_v13 = vpop.f32.mrf.mxu1 }
 0x202   : > { %v1687_v1 = vadd.f32 %v1664_v13, %v1572_v61  ;;  %v1574_v13 = vadd.f32 %v1555_v56, %v1459_v8  ;;  %v1577_v3 = vadd.f32 %v5658_v10, %v1462_v7 }
 0x203   : > { %v1666_v17 = vpop.f32.mrf.mxu1 }
 0x204   : > { %v1567_v18 = vpop.f32.mrf.mxu0  ;;  %v1688_v16 = vadd.f32 %v1666_v17, %v1573_v40 }
 0x206   : > { %v1569_v28 = vpop.f32.mrf.mxu0 }
 0x207   : > { %v1670_v19 = vpop.f32.mrf.mxu1  ;;  %v1579_v43 = vadd.f32 %v1569_v28, %v1464_v58 }
 0x208   : > { %v1689_v12 = vadd.f32 %v1670_v19, %v1574_v13 }
 0x209   : > { %v1672_v51 = vpop.f32.mrf.mxu1 }
 0x20a   : > { %v1778_v20 = vpop.f32.mrf.mxu0  ;;  %v1690_v30 = vadd.f32 %v1672_v51, %v1575_v21 }
 0x20b   : > { %v1801_v42 = vadd.f32 %v1778_v20, %v1687_v1 }
 0x20c   : > { %v1676_v45 = vpop.f32.mrf.mxu1  ;;  %v1780_v35 = vpop.f32.mrf.mxu0 }
 0x20d   : > { %v1802_v27 = vadd.f32 %v1780_v35, %v1688_v16  ;;  %v1578_v35 = vadd.f32 %v1567_v18, %v1463_v29  ;;  %v1691_v56 = vadd.f32 %v1676_v45, %v1576_v5 }
 0x20e   : > { %v1678_v32 = vpop.f32.mrf.mxu1  ;;  %v1784_v33 = vpop.f32.mrf.mxu0 }
 0x20f   : > { %v1692_v44 = vadd.f32 %v1678_v32, %v1577_v3  ;;  %v1803_v11 = vadd.f32 %v1784_v33, %v1689_v12 }
 0x210   : > { %v1682_v55 = vpop.f32.mrf.mxu1  ;;  %v1786_v60 = vpop.f32.mrf.mxu0 }
 0x211   : > { %v1804_v47 = vadd.f32 %v1786_v60, %v1690_v30  ;;  %v1693_v52 = vadd.f32 %v1682_v55, %v1578_v35 }
 0x212   : > { %v1684_v31 = vpop.f32.mrf.mxu1  ;;  %v1790_v15 = vpop.f32.mrf.mxu0 }
 0x213   : > { %v1694_v61 = vadd.f32 %v1684_v31, %v1579_v43  ;;  %v1805_v10 = vadd.f32 %v1790_v15, %v1691_v56 }
 0x214   : > { %v1792_v9 = vpop.f32.mrf.mxu0  ;;  %v1893_v37 = vpop.f32.mrf.mxu1 }
 0x215   : > { %v1916_v22 = vadd.f32 %v1893_v37, %v1801_v42  ;;  %v5692_v19 = vadd.f32 %v1792_v9, %v1692_v44 }
 0x216   : > { %v1895_v17 = vpop.f32.mrf.mxu1  ;;  %v1796_v59 = vpop.f32.mrf.mxu0 }
 0x217   : > { %v1917_v26 = vadd.f32 %v1895_v17, %v1802_v27  ;;  %v5696_v33 = vadd.f32 %v1796_v59, %v1693_v52 }
 0x218   : > { %v1899_v20 = vpop.f32.mrf.mxu1  ;;  %v1798_v23 = vpop.f32.mrf.mxu0 }
 0x219   : > { %v1932_v4 = vcombine.low %v1916_v22, %v1917_v26  ;;  %v1933_v54 = vcombine.high %v1916_v22, %v1917_v26  ;;  %v1918_v18 = vadd.f32 %v1899_v20, %v1803_v11  ;;  %v5698_v55 = vadd.f32 %v1798_v23, %v1694_v61 }
 0x21a   : > { %v1901_v51 = vpop.f32.mrf.mxu1 }
 0x21b   : > { %v1940_v53 = vrot.slane %v1932_v4, %v5067_v50  ;;  %v1947_v62 = vrot.slane %v1933_v54, %v5067_v50  ;;  %v1919_v57 = vadd.f32 %v1901_v51, %v1804_v47 }
 0x21c   : > { %v1905_v32 = vpop.f32.mrf.mxu1 }
 0x21d   : > { %v1948_v60 = vcombine.high %v1940_v53, %v1940_v53  ;;  %v1949_v40 = vcombine.high %v1947_v62, %v1947_v62  ;;  %v2010_v28 = vrot.slane %v1940_v53, %v5067_v50  ;;  %v2026_v45 = vrot.slane %v1947_v62, %v5067_v50 }
 0x21e   : > { %v1950_v6 = vcombine.low %v1918_v18, %v1919_v57  ;;  %v1951_v36 = vcombine.high %v1918_v18, %v1919_v57  ;;  %v5705_v49 = vadd.f32 %v1905_v32, %v1805_v10 }
 0x21f   : > { %v2011_v38 = vcombine.high %v2010_v28, %v2010_v28  ;;  %v2018_v31 = vrot.slane %v1948_v60, %v5067_v50  ;;  %v2027_v15 = vcombine.high %v2026_v45, %v2026_v45  ;;  %v2034_v34 = vrot.slane %v1949_v40, %v5067_v50 }
 0x220   : > { %v2164_v0 = vsel %vm1809_vm15, %v2010_v28, -inf  ;;  %v2192_v1 = vsel %vm1809_vm15, %v2026_v45, -inf  ;;  %v1958_v16 = vrot.slane %v1950_v6, %v5067_v50  ;;  %v1965_v54 = vrot.slane %v1951_v36, %v5067_v50 }
 0x221   : > { %v2019_v41 = vcombine.high %v2018_v31, %v2018_v31  ;;  %v2035_v2 = vcombine.high %v2034_v34, %v2034_v34  ;;  %v2165_v8 = vrot.slane %v2164_v0, 4  ;;  %v2171_v9 = vsel %vm707_vm1, %v2011_v38, -inf  ;;  %v1907_v38 = vpop.f32.mrf.mxu1 }
 0x222   : > { %v2172_v37 = vrot.slane %v2171_v9, 4  ;;  %v2178_v39 = vsel %vm1809_vm15, %v2018_v31, -inf  ;;  %v2193_v21 = vrot.slane %v2192_v1, 4  ;;  %v2199_v42 = vsel %vm707_vm1, %v2027_v15, -inf }
 0x223   : > { %v2166_v27 = vmax.f32 %v2164_v0, %v2165_v8  ;;  %v2179_v25 = vrot.slane %v2178_v39, 4  ;;  %v2185_v24 = vsel %vm707_vm1, %v2019_v41, -inf  ;;  %v2200_v7 = vrot.slane %v2199_v42, 4 }
 0x224   : > { %v2173_v13 = vmax.f32 %v2171_v9, %v2172_v37  ;;  %v2186_v17 = vrot.slane %v2185_v24, 4  ;;  %v2194_v29 = vmax.f32 %v2192_v1, %v2193_v21  ;;  %v2206_v30 = vsel %vm1809_vm15, %v2034_v34, -inf }
 0x225   : > { %v2167_v22 = vrot.slane %v2166_v27, 2  ;;  %v2180_v59 = vmax.f32 %v2178_v39, %v2179_v25  ;;  %v2201_v26 = vmax.f32 %v2199_v42, %v2200_v7  ;;  %v2207_v58 = vrot.slane %v2206_v30, 4 }
 0x226   : > { %v2174_v5 = vrot.slane %v2173_v13, 2  ;;  %v2187_v3 = vmax.f32 %v2185_v24, %v2186_v17  ;;  %v2195_v12 = vrot.slane %v2194_v29, 2  ;;  %v2213_v20 = vsel %vm707_vm1, %v2035_v2, -inf  ;;  %v1911_v24 = vpop.f32.mrf.mxu1 }
 0x227   : > { %v2168_v35 = vmax.f32 %v2166_v27, %v2167_v22  ;;  %v2181_v47 = vrot.slane %v2180_v59, 2  ;;  %v2202_v4 = vrot.slane %v2201_v26, 2  ;;  %v2214_v11 = vrot.slane %v2213_v20, 4 }
 0x228   : > { %v2175_v43 = vmax.f32 %v2173_v13, %v2174_v5  ;;  %v2188_v56 = vrot.slane %v2187_v3, 2  ;;  %v5714_v44 = vmax.f32 %v2194_v29, %v2195_v12  ;;  %v1966_v62 = vcombine.high %v1958_v16, %v1958_v16 }
 0x229   : > { %v2169_v51 = vrot.slane %v2168_v35, 1  ;;  %v5716_v52 = vmax.f32 %v2180_v59, %v2181_v47  ;;  %v2203_v53 = vmax.f32 %v2201_v26, %v2202_v4  ;;  %v5718_v61 = vmax.f32 %v2206_v30, %v2207_v58 }
 0x22a   : > { %v2176_v23 = vrot.slane %v2175_v43, 1  ;;  %v2189_v57 = vmax.f32 %v2187_v3, %v2188_v56  ;;  %v2215_v10 = vmax.f32 %v2213_v20, %v2214_v11  ;;  %v2197_v60 = vrot.slane %v5714_v44, 1 }
 0x22b   : > { %v5720_v18 = vmax.f32 %v2168_v35, %v2169_v51  ;;  %v2204_v40 = vrot.slane %v2203_v53, 1  ;;  %v1967_v28 = vcombine.high %v1965_v54, %v1965_v54  ;;  %v2183_v32 = vrot.slane %v5716_v52, 1 }
 0x22c   : > { %v5723_v45 = vmax.f32 %v2175_v43, %v2176_v23  ;;  %v2216_v6 = vrot.slane %v2215_v10, 2  ;;  %v2042_v36 = vrot.slane %v1958_v16, %v5067_v50  ;;  %v2190_v31 = vrot.slane %v2189_v57, 1 }
 0x22d   : > { %v5728_v15 = vrot.slane %v1966_v62, %v5067_v50  ;;  %v2058_v34 = vrot.slane %v1965_v54, %v5067_v50  ;;  %v2066_v0 = vrot.slane %v1967_v28, %v5067_v50  ;;  %v5732_v1 = vmax.f32 %v2203_v53, %v2204_v40  ;;  %v1913_v54 = vpop.f32.mrf.mxu1 }
 0x22e   : > { %v2217_v41 = vmax.f32 %v2215_v10, %v2216_v6  ;;  %v2043_v2 = vcombine.high %v2042_v36, %v2042_v36  ;;  %v2220_v8 = vsel %vm1809_vm15, %v2042_v36, -inf  ;;  %v5740_v7 = vmax.f32 %v2189_v57, %v2190_v31 }
 0x22f   : > { %v2051_v9 = vcombine.high %v5728_v15, %v5728_v15  ;;  %v2059_v37 = vcombine.high %v2058_v34, %v2058_v34  ;;  %v2067_v16 = vcombine.high %v2066_v0, %v2066_v0  ;;  %v2221_v39 = vrot.slane %v2220_v8, 4 }
 0x230   : > { %v2218_v21 = vrot.slane %v2217_v41, 1  ;;  %v2227_v42 = vsel %vm707_vm1, %v2043_v2, -inf  ;;  %v2248_v27 = vsel %vm1809_vm15, %v2058_v34, -inf  ;;  %v2262_v25 = vsel %vm1809_vm15, %v2066_v0, -inf }
 0x231   : > { %v2228_v13 = vrot.slane %v2227_v42, 4  ;;  %v2241_v17 = vsel %vm707_vm1, %v2051_v9, -inf  ;;  %v2249_v29 = vrot.slane %v2248_v27, 4  ;;  %v5743_v30 = vmax.f32 %v2220_v8, %v2221_v39 }
 0x232   : > { %v2242_v22 = vrot.slane %v2241_v17, 4  ;;  %v2255_v59 = vsel %vm707_vm1, %v2059_v37, -inf  ;;  %v2263_v26 = vrot.slane %v2262_v25, 4  ;;  %v5746_v58 = vmax.f32 %v2217_v41, %v2218_v21 }
 0x233   : > { %v2229_v5 = vmax.f32 %v2227_v42, %v2228_v13  ;;  %v2256_v3 = vrot.slane %v2255_v59, 4  ;;  %v2269_v12 = vsel %vm707_vm1, %v2067_v16, -inf  ;;  %v1921_v4 = vadd.f32 %v1907_v38, %v5692_v19 }
 0x234   : > { %v2243_v20 = vmax.f32 %v2241_v17, %v2242_v22  ;;  %v2264_v35 = vmax.f32 %v2262_v25, %v2263_v26  ;;  %v2270_v47 = vrot.slane %v2269_v12, 4  ;;  %v5750_v56 = vmax.f32 %v2248_v27, %v2249_v29 }
 0x235   : > { %v2230_v43 = vrot.slane %v2229_v5, 2  ;;  %v2257_v11 = vmax.f32 %v2255_v59, %v2256_v3  ;;  %v5753_v51 = vadd.f32 %v1911_v24, %v5696_v33  ;;  %v1968_v57 = vcombine.low %v5705_v49, %v1921_v4 }
 0x236   : > { %v2244_v53 = vrot.slane %v2243_v20, 2  ;;  %v2265_v62 = vrot.slane %v2264_v35, 2  ;;  %v2271_v23 = vmax.f32 %v2269_v12, %v2270_v47  ;;  %v1969_v28 = vcombine.high %v5705_v49, %v1921_v4 }
 0x237   : > { %v2231_v10 = vmax.f32 %v2229_v5, %v2230_v43  ;;  %v2258_v40 = vrot.slane %v2257_v11, 2  ;;  %v5758_v6 = vadd.f32 %v1913_v54, %v5698_v55  ;;  %v1976_v31 = vrot.slane %v1968_v57, %v5067_v50 }
 0x238   : > { %v2245_v19 = vmax.f32 %v2243_v20, %v2244_v53  ;;  %v5760_v36 = vmax.f32 %v2264_v35, %v2265_v62  ;;  %v2272_v38 = vrot.slane %v2271_v23, 2  ;;  %v2251_v34 = vrot.slane %v5750_v56, 2 }
 0x239   : > { %v2232_v33 = vrot.slane %v2231_v10, 1  ;;  %v2259_v0 = vmax.f32 %v2257_v11, %v2258_v40  ;;  %v1983_v41 = vrot.slane %v1969_v28, %v5067_v50  ;;  %v1984_v9 = vcombine.high %v1976_v31, %v1976_v31 }
 0x23a   : > { %v2246_v2 = vrot.slane %v2245_v19, 1  ;;  %v2273_v8 = vmax.f32 %v2271_v23, %v2272_v38  ;;  %v1986_v49 = vcombine.low %v5753_v51, %v5758_v6  ;;  %v2267_v37 = vrot.slane %v5760_v36, 1 }
 0x23b   : > { %v2260_v55 = vrot.slane %v2259_v0, 1  ;;  %v1985_v16 = vcombine.high %v1983_v41, %v1983_v41  ;;  %v2074_v39 = vrot.slane %v1976_v31, %v5067_v50  ;;  %v5769_v21 = vmax.f32 %v2231_v10, %v2232_v33 }
 0x23c   : > { %v2247_v42 = vmax.f32 %v2245_v19, %v2246_v2  ;;  %v2274_v27 = vrot.slane %v2273_v8, 1  ;;  %v2082_v25 = vrot.slane %v1984_v9, %v5067_v50  ;;  %v2090_v17 = vrot.slane %v1983_v41, %v5067_v50 }
 0x23d   : > { %v2261_v24 = vmax.f32 %v2259_v0, %v2260_v55  ;;  %v2075_v13 = vcombine.high %v2074_v39, %v2074_v39  ;;  %v2098_v29 = vrot.slane %v1985_v16, %v5067_v50  ;;  %v2276_v26 = vsel %vm1809_vm15, %v2074_v39, -inf }
 0x23e   : > { %v2275_v22 = vmax.f32 %v2273_v8, %v2274_v27  ;;  %v2083_v59 = vcombine.high %v2082_v25, %v2082_v25  ;;  %v2290_v5 = vsel %vm1809_vm15, %v2082_v25, -inf  ;;  %v2091_v12 = vcombine.high %v2090_v17, %v2090_v17 }
 0x23f   : > { %v3481_v3 = vsel %vm1084_vm2, %v2261_v24, %v2247_v42  ;;  %v2099_v20 = vcombine.high %v2098_v29, %v2098_v29  ;;  %v2277_v35 = vrot.slane %v2276_v26, 4  ;;  %v2283_v4 = vsel %vm707_vm1, %v2075_v13, -inf }
 0x240   : > { %v3482_v47 = vsel %vm1086_vm4, %v2275_v22, %v3481_v3  ;;  %v2291_v54 = vrot.slane %v2290_v5, 4  ;;  %v2297_v43 = vsel %vm707_vm1, %v2083_v59, -inf  ;;  %v2284_v53 = vrot.slane %v2283_v4, 4 }
 0x241   : > { %v2278_v11 = vmax.f32 %v2276_v26, %v2277_v35  ;;  %v2298_v62 = vrot.slane %v2297_v43, 4  ;;  %v2304_v23 = vsel %vm1809_vm15, %v2090_v17, -inf  ;;  %v2311_v40 = vsel %vm707_vm1, %v2091_v12, -inf }
 0x242   : > { %v2292_v57 = vmax.f32 %v2290_v5, %v2291_v54  ;;  %v2305_v10 = vrot.slane %v2304_v23, 4  ;;  %v2318_v28 = vsel %vm1809_vm15, %v2098_v29, -inf  ;;  %v2285_v38 = vmax.f32 %v2283_v4, %v2284_v53 }
 0x243   : > { %v2279_v19 = vrot.slane %v2278_v11, 2  ;;  %v2299_v31 = vmax.f32 %v2297_v43, %v2298_v62  ;;  %v2312_v33 = vrot.slane %v2311_v40, 4  ;;  %v2319_v2 = vrot.slane %v2318_v28, 4 }
 0x244   : > { %v2293_v0 = vrot.slane %v2292_v57, 2  ;;  %v2306_v41 = vmax.f32 %v2304_v23, %v2305_v10  ;;  %v2325_v8 = vsel %vm707_vm1, %v2099_v20, -inf  ;;  %v2286_v55 = vrot.slane %v2285_v38, 2 }
 0x245   : > { %v2280_v9 = vmax.f32 %v2278_v11, %v2279_v19  ;;  %v2300_v16 = vrot.slane %v2299_v31, 2  ;;  %v2313_v39 = vmax.f32 %v2311_v40, %v2312_v33  ;;  %v5786_v25 = vmax.f32 %v2318_v28, %v2319_v2 }
 0x246   : > { %v5784_v42 = vmax.f32 %v2292_v57, %v2293_v0  ;;  %v2307_v27 = vrot.slane %v2306_v41, 2  ;;  %v2326_v24 = vrot.slane %v2325_v8, 4  ;;  %v2287_v17 = vmax.f32 %v2285_v38, %v2286_v55 }
 0x247   : > { %v2281_v13 = vrot.slane %v2280_v9, 1  ;;  %v2301_v29 = vmax.f32 %v2299_v31, %v2300_v16  ;;  %v2314_v22 = vrot.slane %v2313_v39, 2  ;;  %v5789_v59 = vmax.f32 %v5760_v36, %v2267_v37 }
 0x248   : > { %v2295_v26 = vrot.slane %v5784_v42, 1  ;;  %v5792_v5 = vmax.f32 %v2306_v41, %v2307_v27  ;;  %v2327_v3 = vmax.f32 %v2325_v8, %v2326_v24  ;;  %v2288_v20 = vrot.slane %v2287_v17, 1 }
 0x249   : > { %v5794_v12 = vmax.f32 %v2280_v9, %v2281_v13  ;;  %v2302_v35 = vrot.slane %v2301_v29, 1  ;;  %v2315_v4 = vmax.f32 %v2313_v39, %v2314_v22  ;;  %v2321_v54 = vrot.slane %v5786_v25, 2 }
 0x24a   : > { %v2328_v43 = vrot.slane %v2327_v3, 2  ;;  %v1987_v11 = vcombine.high %v5753_v51, %v5758_v6  ;;  %v1994_v36 = vrot.slane %v1986_v49, %v5067_v50  ;;  %v2289_v37 = vmax.f32 %v2287_v17, %v2288_v20 }
 0x24b   : > { %v2303_v53 = vmax.f32 %v2301_v29, %v2302_v35  ;;  %v2309_v62 = vrot.slane %v5792_v5, 1  ;;  %v2316_v23 = vrot.slane %v2315_v4, 1  ;;  %v5809_v38 = vsel %vm1084_vm2, %v5794_v12, %v5789_v59 }
 0x24c   : > { %v2329_v57 = vmax.f32 %v2327_v3, %v2328_v43  ;;  %v2001_v10 = vrot.slane %v1987_v11, %v5067_v50  ;;  %v2002_v40 = vcombine.high %v1994_v36, %v1994_v36  ;;  %v2106_v28 = vrot.slane %v1994_v36, %v5067_v50 }
 0x24d   : > { %v2317_v19 = vmax.f32 %v2315_v4, %v2316_v23  ;;  %v3483_v51 = vsel %vm1088_vm6, %v2289_v37, %v3482_v47  ;;  %v5815_v6 = vmax.f32 %v5716_v52, %v2183_v32  ;;  %v2198_v22 = vmax.f32 %v5714_v44, %v2197_v60 }
 0x24e   : > { %v2330_v49 = vrot.slane %v2329_v57, 1  ;;  %v3484_v31 = vsel %vm1076_vm3, %v2303_v53, %v3483_v51  ;;  %v2003_v33 = vcombine.high %v2001_v10, %v2001_v10  ;;  %v2107_v0 = vcombine.high %v2106_v28, %v2106_v28 }
 0x24f   : > { %v3485_v41 = vsel %vm1078_vm5, %v2317_v19, %v3484_v31  ;;  %v2114_v2 = vrot.slane %v2002_v40, %v5067_v50  ;;  %v2122_v8 = vrot.slane %v2001_v10, %v5067_v50  ;;  %v2332_v9 = vsel %vm1809_vm15, %v2106_v28, -inf }
 0x250   : > { %v2331_v55 = vmax.f32 %v2329_v57, %v2330_v49  ;;  %v5823_v47 = vrot.slane %v2003_v33, %v5067_v50  ;;  %v2333_v16 = vrot.slane %v2332_v9, 4  ;;  %v2339_v52 = vsel %vm707_vm1, %v2107_v0, -inf }
 0x251   : > { %v2115_v32 = vcombine.high %v2114_v2, %v2114_v2  ;;  %v2123_v39 = vcombine.high %v2122_v8, %v2122_v8  ;;  %v2340_v27 = vrot.slane %v2339_v52, 4  ;;  %v5827_v24 = vsel %vm1809_vm15, %v2114_v2, -inf }
 0x252   : > { %v3486_v13 = vsel %vm1080_vm7, %v2331_v55, %v3485_v41  ;;  %v2131_v17 = vcombine.high %v5823_v47, %v5823_v47  ;;  %v5832_v29 = vmax.f32 %v2332_v9, %v2333_v16  ;;  %v2360_v35 = vsel %vm1809_vm15, %v2122_v8, -inf }
 0x253   : > { %v2341_v3 = vmax.f32 %v2339_v52, %v2340_v27  ;;  %v2353_v20 = vsel %vm707_vm1, %v2115_v32, -inf  ;;  %v2367_v4 = vsel %vm707_vm1, %v2123_v39, -inf  ;;  %v2347_v43 = vrot.slane %v5827_v24, 4 }
 0x254   : > { %v2354_v11 = vrot.slane %v2353_v20, 4  ;;  %v2361_v36 = vrot.slane %v2360_v35, 4  ;;  %v2368_v37 = vrot.slane %v2367_v4, 4  ;;  %v2381_v23 = vsel %vm707_vm1, %v2131_v17, -inf }
 0x255   : > { %v2342_v53 = vrot.slane %v2341_v3, 2  ;;  %v2209_v57 = vrot.slane %v5718_v61, 2  ;;  %v2223_v10 = vrot.slane %v5743_v30, 2  ;;  %v2382_v40 = vrot.slane %v2381_v23, 4 }
 0x256   : > { %v2355_v44 = vmax.f32 %v2353_v20, %v2354_v11  ;;  %v2369_v60 = vmax.f32 %v2367_v4, %v2368_v37  ;;  %v2234_v28 = vsel %vm1809_vm15, %v5728_v15, -inf  ;;  %v2848_v2 = vsel %vm1088_vm6, %v5815_v6, %v5720_v18 }
 0x257   : > { %v2343_v19 = vmax.f32 %v2341_v3, %v2342_v53  ;;  %v2210_v51 = vmax.f32 %v5718_v61, %v2209_v57  ;;  %v2224_v49 = vmax.f32 %v5743_v30, %v2223_v10  ;;  %v2235_v31 = vrot.slane %v2234_v28, 4 }
 0x258   : > { %v2356_v33 = vrot.slane %v2355_v44, 2  ;;  %v2370_v0 = vrot.slane %v2369_v60, 2  ;;  %v2383_v41 = vmax.f32 %v2381_v23, %v2382_v40  ;;  %v2849_v39 = vsel %vm1076_vm3, %v2198_v22, %v2848_v2 }
 0x259   : > { %v2344_v8 = vrot.slane %v2343_v19, 1  ;;  %v2211_v9 = vrot.slane %v2210_v51, 1  ;;  %v2225_v55 = vrot.slane %v2224_v49, 1  ;;  %v2236_v16 = vmax.f32 %v2234_v28, %v2235_v31 }
 0x25a   : > { %v2357_v52 = vmax.f32 %v2355_v44, %v2356_v33  ;;  %v2371_v32 = vmax.f32 %v2369_v60, %v2370_v0  ;;  %v2384_v15 = vrot.slane %v2383_v41, 2  ;;  %v2252_v11 = vmax.f32 %v5750_v56, %v2251_v34 }
 0x25b   : > { %v2345_v61 = vmax.f32 %v2343_v19, %v2344_v8  ;;  %v2212_v30 = vmax.f32 %v2210_v51, %v2211_v9  ;;  %v2226_v27 = vmax.f32 %v2224_v49, %v2225_v55  ;;  %v2237_v17 = vrot.slane %v2236_v16, 2 }
 0x25c   : > { %v2358_v3 = vrot.slane %v2357_v52, 1  ;;  %v2372_v20 = vrot.slane %v2371_v32, 1  ;;  %v2385_v4 = vmax.f32 %v2383_v41, %v2384_v15  ;;  %v2428_v57 = vsel %vm1086_vm4, %v5815_v6, %v5720_v18 }
 0x25d   : > { %v5856_v37 = vsel %vm1082_vm8, %v2345_v61, %v3486_v13  ;;  %v2238_v53 = vmax.f32 %v2236_v16, %v2237_v17  ;;  %v2850_v23 = vsel %vm1078_vm5, %v2212_v30, %v2849_v39  ;;  %v2335_v10 = vrot.slane %v5832_v29, 2 }
 0x25e   : > { %v2359_v44 = vmax.f32 %v2357_v52, %v2358_v3  ;;  %v2373_v60 = vmax.f32 %v2371_v32, %v2372_v20  ;;  %v2386_v40 = vrot.slane %v2385_v4, 1  ;;  %v2253_v19 = vrot.slane %v2252_v11, 1 }
 0x25f   : > { %v2239_v28 = vrot.slane %v2238_v53, 1  ;;  %v2429_v51 = vsel %vm1088_vm6, %v2198_v22, %v2428_v57  ;;  %v2362_v56 = vmax.f32 %v2360_v35, %v2361_v36  ;;  %v2851_v13 = vsel %vm1080_vm7, %v2226_v27, %v2850_v23 }
 0x260   : > { %v3488_v34 = vsel %vm1084_vm2, %v2373_v60, %v2359_v44  ;;  %v2430_v49 = vsel %vm1076_vm3, %v2212_v30, %v2429_v51  ;;  %v2374_v31 = vsel %vm1809_vm15, %v5823_v47, -inf  ;;  %v2254_v6 = vmax.f32 %v2252_v11, %v2253_v19 }
 0x261   : > { %v2240_v18 = vmax.f32 %v2238_v53, %v2239_v28  ;;  %v2431_v33 = vsel %vm1078_vm5, %v2226_v27, %v2430_v49  ;;  %v2363_v0 = vrot.slane %v2362_v56, 2  ;;  %v2387_v41 = vmax.f32 %v2385_v4, %v2386_v40 }
 0x262   : > { %v2375_v2 = vrot.slane %v2374_v31, 4  ;;  %v2296_v22 = vmax.f32 %v5784_v42, %v2295_v26  ;;  %v2322_v35 = vmax.f32 %v5786_v25, %v2321_v54  ;;  %v2853_v47 = vsel %vm1084_vm2, %v5789_v59, %v2254_v6 }
 0x263   : > { %v2852_v36 = vsel %vm1082_vm8, %v2240_v18, %v2851_v13  ;;  %v2432_v8 = vsel %vm1080_vm7, %v2240_v18, %v2431_v33  ;;  %v2364_v9 = vmax.f32 %v2362_v56, %v2363_v0  ;;  %v2336_v42 = vmax.f32 %v5832_v29, %v2335_v10  ;;  %v2410_v0 = vld [vmem:[%s6500_s5 + $0xb0] sm:$0xff] }
 0x264   : > { %2861 = vrot.lane.b32.xlu0 %v2852_v36, %s4867_s15  ;;  %v2433_v55 = vsel %vm1082_vm8, %v2254_v6, %v2432_v8  ;;  %v2376_v16 = vmax.f32 %v2374_v31, %v2375_v2  ;;  %v2323_v52 = vrot.slane %v2322_v35, 1  ;;  %v2348_v54 = vmax.f32 %v5827_v24, %v2347_v43 }
 0x265   : > { %v5884_v26 = vsel %vm2443_vm0, 0.0, %v2433_v55  ;;  %v2365_v25 = vrot.slane %v2364_v9, 1  ;;  %v2854_v59 = vsel %vm1086_vm4, %v5794_v12, %v2853_v47  ;;  %v2310_v29 = vmax.f32 %v5792_v5, %v2309_v62 }
 0x266   : > { %4575 = vmatprep.mubr.msk.f32.mxu0 %vm1127_vm10, %v5884_v26  ;;  %v2536_v32 = vrot.slane %v5884_v26, 1  ;;  %v2377_v15 = vrot.slane %v2376_v16, 2  ;;  %v2324_v39 = vmax.f32 %v2322_v35, %v2323_v52  ;;  %v2337_v30 = vrot.slane %v2336_v42, 1 }
 0x267   : > { %v2366_v61 = vmax.f32 %v2364_v9, %v2365_v25  ;;  %v2349_v27 = vrot.slane %v2348_v54, 2  ;;  %v2855_v17 = vsel %vm1088_vm6, %v2296_v22, %v2854_v59  ;;  %v2435_v12 = vsel %vm1086_vm4, %v2296_v22, %v5809_v38  ;;  %v2409_v9 = vld [vmem:[%s6500_s5 + $0xa8] sm:$0xff] }
 0x268   : > { %v2378_v24 = vmax.f32 %v2376_v16, %v2377_v15  ;;  %v2856_v43 = vsel %vm1076_vm3, %v2310_v29, %v2855_v17  ;;  %v3477_v3 = vsel %vm1076_vm3, %v5740_v7, %v5723_v45  ;;  %v2338_v20 = vmax.f32 %v2336_v42, %v2337_v30  ;;  %v2407_v17 = vld [vmem:[%s6500_s5 + $0x98] sm:$0xff] }
 0x269   : > { %v2350_v4 = vmax.f32 %v2348_v54, %v2349_v27  ;;  %v2857_v5 = vsel %vm1078_vm5, %v2324_v39, %v2856_v43  ;;  %v2436_v62 = vsel %vm1088_vm6, %v2310_v29, %v2435_v12  ;;  %v3478_v23 = vsel %vm1078_vm5, %v5732_v1, %v3477_v3  ;;  %v2408_v54 = vld [vmem:[%s6500_s5 + $0xa0] sm:$0xff]  ;;  %v2814_v29 = vld [vmem:[%s6502_s7 + $0x30] sm:$0xff] }
 0x26a   : > { %v2379_v11 = vrot.slane %v2378_v24, 1  ;;  %v2437_v53 = vsel %vm1076_vm3, %v2324_v39, %v2436_v62  ;;  %v3585_v57 = vrot.slane %v5856_v37, 1  ;;  %v2858_v38 = vsel %vm1080_vm7, %v2338_v20, %v2857_v5  ;;  %v2406_v62 = vld [vmem:[%s6500_s5 + $0x90] sm:$0xff] }
 0x26b   : > { %v2351_v10 = vrot.slane %v2350_v4, 1  ;;  %v2438_v44 = vsel %vm1078_vm5, %v2338_v20, %v2437_v53  ;;  %v3479_v45 = vsel %vm1080_vm7, %v5746_v58, %v3478_v23  ;;  %v3671_v40 = vrot.slane %v5856_v37, 2  ;;  %v2813_v20 = vld [vmem:[%s6502_s7 + $0x28] sm:$0xff]  ;;  %v2812_v23 = vld [vmem:[%s6502_s7 + $0x20] sm:$0xff] }
 0x26c   : > { %v2380_v7 = vmax.f32 %v2378_v24, %v2379_v11  ;;  %v3480_v60 = vsel %vm1082_vm8, %v5769_v21, %v3479_v45  ;;  %v3489_v28 = vsel %vm1086_vm4, %v2387_v41, %v3488_v34  ;;  %v2622_v1 = vrot.slane %v5884_v26, 2  ;;  %v2810_v45 = vld [vmem:[%s6502_s7 + $0x10] sm:$0xff] }
 0x26d   : > { %v2352_v19 = vmax.f32 %v2350_v4, %v2351_v10  ;;  %v5920_v51 = vsel %vm1112_vm9, 0.0, %v3480_v60  ;;  %v5923_v56 = vsel %vm1112_vm9, %v3489_v28, 0.0  ;;  %v3757_v6 = vrot.slane %v5856_v37, 3  ;;  %v2811_v10 = vld [vmem:[%s6502_s7 + $0x18] sm:$0xff]  ;;  %v2809_v28 = vld [vmem:[%s6502_s7 + $0x8] sm:$0xff] }
 0x26e   : > { %v2860_v13 = vsel %vm1084_vm2, %v2380_v7, %v2366_v61  ;;  %v5927_v58 = vsel %vm2443_vm0, %v2380_v7, 0.0  ;;  %v3584_v21 = vrot.slane %v5920_v51, 1  ;;  %v3670_v49 = vrot.slane %v5920_v51, 2  ;;  %v2823_v7 = vld [vmem:[%s6502_s7 + $0x78] sm:$0xff] }
 0x26f   : > { %2865 = vrot.lane.b32.xlu1 %v2860_v13, %s4867_s15  ;;  %v2539_v34 = vrot.slane %v5927_v58, 1  ;;  %v2859_v31 = vsel %vm1082_vm8, %v2352_v19, %v2858_v38  ;;  %v2439_v18 = vsel %vm1080_vm7, %v2352_v19, %v2438_v44  ;;  %v3587_v22 = vrot.slane %v5923_v56, 1  ;;  %v2404_v44 = vld [vmem:[%s6500_s5 + $0x80] sm:$0xff]  ;;  %v2831_v13 = vld [vmem:[%s6502_s7 + $0xb8] sm:$0xff] }
 0x270   : > { %2863 = vrot.lane.b32.xlu0 %v2859_v31, %s4867_s15  ;;  %v5938_v33 = vsel %vm1082_vm8, %v2366_v61, %v2439_v18  ;;  %v5944_v41 = vsel %vm1235_vm11, %v3584_v21, %v3585_v57  ;;  %v5947_v2 = vsel %vm1350_vm12, %v3670_v49, %v3671_v40  ;;  %v3756_v8 = vrot.slane %v5920_v51, 3  ;;  %v2808_v19 = vld [vmem:[%s6502_s7] sm:$0xff]  ;;  %v2818_v21 = vld [vmem:[%s6502_s7 + $0x50] sm:$0xff]  ;;  %v2817_v49 = vld [vmem:[%s6502_s7 + $0x48] sm:$0xff] }
 0x271   : > { %4576 = vmatmul.mubr.msk.f32.vlgmr.msra.gmra.mxu0 %vm1127_vm10, %v5938_v33  ;;  %v2537_v35 = vrot.slane %v5938_v33, 1  ;;  %v2623_v36 = vrot.slane %v5938_v33, 2  ;;  %v3673_v47 = vrot.slane %v5923_v56, 2  ;;  %v5961_v55 = vsel %vm1235_vm11, %v3585_v57, %v3587_v22  ;;  %v2405_v57 = vld [vmem:[%s6500_s5 + $0x88] sm:$0xff]  ;;  %v2839_v31 = vld [vmem:[%s6502_s7 + $0xf8] sm:$0xff] }
 0x272   : > { %4598 = vmatpush3.msra.mxu0 %v5639_v63  ;;  %v3842_v16 = vrot.slane %v5920_v51, 4  ;;  %v3843_v52 = vrot.slane %v5856_v37, 4  ;;  %v3759_v42 = vrot.slane %v5923_v56, 3  ;;  %v5976_v59 = vsel %vm1465_vm13, %v3756_v8, %v3757_v6 }
 0x273   : > { %4599 = vmatprep.subr.mxu0 %v2410_v0  ;;  %v2538_v26 = vsel %vm1235_vm11, %v2536_v32, %v2537_v35  ;;  %v2624_v63 = vsel %vm1350_vm12, %v2622_v1, %v2623_v36  ;;  %v2540_v25 = vsel %vm1235_vm11, %v2537_v35, %v2539_v34  ;;  %v5979_v15 = vsel %vm1350_vm12, %v3671_v40, %v3673_v47  ;;  %v2822_v40 = vld [vmem:[%s6502_s7 + $0x70] sm:$0xff]  ;;  %v2821_v1 = vld [vmem:[%s6502_s7 + $0x68] sm:$0xff]  ;;  %v2816_v34 = vld [vmem:[%s6502_s7 + $0x40] sm:$0xff] }
 0x274   : > { %4600 = vmatpush3.msra.mxu0 %v2410_v0  ;;  %4594 = vmatprep.mubr.msk.f32.mxu1 %vm1127_vm10, %v2538_v26  ;;  %v5982_v32 = vsel %vm1580_vm14, %v3842_v16, %v3843_v52  ;;  %v5989_v39 = vsel %vm1465_vm13, %v3757_v6, %v3759_v42  ;;  %v3928_v61 = vrot.slane %v5920_v51, 5  ;;  %v3929_v30 = vrot.slane %v5856_v37, 5  ;;  %v2830_v35 = vld [vmem:[%s6502_s7 + $0xb0] sm:$0xff] }
 0x275   : > { %4601 = vmatprep.subr.mxu0 %v2409_v9  ;;  %4613 = vmatprep.mubr.msk.f32.mxu0 %vm1127_vm10, %v2624_v63  ;;  %v3845_v27 = vrot.slane %v5923_v56, 4  ;;  %v4014_v24 = vrot.slane %v5920_v51, 6  ;;  %v4015_v43 = vrot.slane %v5856_v37, 6  ;;  %v3931_v12 = vrot.slane %v5923_v56, 5 }
 0x276   : > { %4595 = vmatmul.mubr.msk.f32.vlgmr.msra.gmra.mxu1 %vm1127_vm10, %v2540_v25  ;;  %4602 = vmatpush3.msra.mxu0 %v2409_v9  ;;  %v4017_v3 = vrot.slane %v5923_v56, 6  ;;  %v6007_v4 = vsel %vm1112_vm9, %v3928_v61, %v3929_v30  ;;  %v2625_v38 = vrot.slane %v5927_v58, 2  ;;  %v2820_v56 = vld [vmem:[%s6502_s7 + $0x60] sm:$0xff]  ;;  %v2819_v58 = vld [vmem:[%s6502_s7 + $0x58] sm:$0xff]  ;;  %vm4250_vm1 = vcmp.lt.s32.totalorder %v543_v46, 384 }
 0x277   : > { %4603 = vmatprep.subr.mxu0 %v2408_v54  ;;  %4617 = vmatpush3.msra.mxu1 %v5663_v14  ;;  %v6010_v5 = vsel %vm1580_vm14, %v3843_v52, %v3845_v27  ;;  %v6016_v11 = vsel %vm1809_vm15, %v4014_v24, %v4015_v43  ;;  %v6019_v14 = vsel %vm1112_vm9, %v3929_v30, %v3931_v12  ;;  %v2829_v52 = vld [vmem:[%s6502_s7 + $0xa8] sm:$0xff]  ;;  %v2827_v30 = vld [vmem:[%s6502_s7 + $0x98] sm:$0xff]  ;;  %v2826_v24 = vld [vmem:[%s6502_s7 + $0x90] sm:$0xff] }
 0x278   : > { %4604 = vmatpush3.msra.mxu0 %v2408_v54  ;;  %4618 = vmatprep.subr.mxu1 %v2814_v29  ;;  %v6022_v53 = vsel %vm1809_vm15, %v4015_v43, %v4017_v3  ;;  %v2626_v60 = vsel %vm1350_vm12, %v2623_v36, %v2625_v38  ;;  %v2828_v54 = vld [vmem:[%s6502_s7 + $0xa0] sm:$0xff]  ;;  %v2825_v12 = vld [vmem:[%s6502_s7 + $0x88] sm:$0xff]  ;;  %v2835_v3 = vld [vmem:[%s6502_s7 + $0xd8] sm:$0xff] }
 0x279   : > { %4605 = vmatprep.subr.mxu0 %v2407_v17  ;;  %4619 = vmatpush3.msra.mxu1 %v2814_v29  ;;  %v2838_v29 = vld [vmem:[%s6502_s7 + $0xf0] sm:$0xff]  ;;  %v2836_v43 = vld [vmem:[%s6502_s7 + $0xe0] sm:$0xff]  ;;  %v2847_v38 = vld [vmem:[%s6502_s7 + $0x138] sm:$0xff] }
 0x27a   : > { %4606 = vmatpush3.msra.mxu0 %v2407_v17  ;;  %4620 = vmatprep.subr.mxu1 %v2813_v20  ;;  %v2837_v17 = vld [vmem:[%s6502_s7 + $0xe8] sm:$0xff] }
 0x27b   : > { %4607 = vmatprep.subr.mxu0 %v2406_v62  ;;  %4621 = vmatpush3.msra.mxu1 %v2813_v20 }
 0x27c   : > { %4608 = vmatpush3.msra.mxu0 %v2406_v62  ;;  %4622 = vmatprep.subr.mxu1 %v2812_v23  ;;  %v2824_v62 = vld [vmem:[%s6502_s7 + $0x80] sm:$0xff] }
 0x27d   : > { %4609 = vmatprep.subr.mxu0 %v2405_v57  ;;  %4623 = vmatpush3.msra.mxu1 %v2812_v23  ;;  %v2834_v23 = vld [vmem:[%s6502_s7 + $0xd0] sm:$0xff] }
 0x27e   : > { %4610 = vmatpush3.msra.mxu0 %v2405_v57  ;;  %4624 = vmatprep.subr.mxu1 %v2811_v10 }
 0x27f   : > { %4611 = vmatprep.subr.mxu0 %v2404_v44  ;;  %4625 = vmatpush3.msra.mxu1 %v2811_v10  ;;  %v2833_v10 = vld [vmem:[%s6502_s7 + $0xc8] sm:$0xff] }
 0x280   : > { %4612 = vmatpush3.msra.mxu0 %v2404_v44  ;;  %4626 = vmatprep.subr.mxu1 %v2810_v45 }
 0x281   : > { %4614 = vmatmul.mubr.msk.f32.vlgmr.msra.gmra.mxu0 %vm1127_vm10, %v2626_v60  ;;  %4635 = vmatprep.subr.mxu0 %v2823_v7  ;;  %v2832_v60 = vld [vmem:[%s6502_s7 + $0xc0] sm:$0xff] }
 0x282   : > { %4636 = vmatpush3.msra.mxu0 %v2823_v7  ;;  %4627 = vmatpush3.msra.mxu1 %v2810_v45 }
 0x283   : > { %4637 = vmatprep.subr.mxu0 %v2822_v40  ;;  %4628 = vmatprep.subr.mxu1 %v2809_v28 }
 0x284   : > { %4638 = vmatpush3.msra.mxu0 %v2822_v40  ;;  %4629 = vmatpush3.msra.mxu1 %v2809_v28  ;;  %v2846_v40 = vld [vmem:[%s6502_s7 + $0x130] sm:$0xff] }
 0x285   : > { %4639 = vmatprep.subr.mxu0 %v2821_v1  ;;  %4630 = vmatprep.subr.mxu1 %v2808_v19 }
 0x286   : > { %4640 = vmatpush3.msra.mxu0 %v2821_v1  ;;  %4631 = vmatpush3.msra.mxu1 %v2808_v19  ;;  %v2845_v1 = vld [vmem:[%s6502_s7 + $0x128] sm:$0xff]  ;;  %v3412_v19 = vld [vmem:[%s6504_s9 + $0x38] sm:$0xff] }
 0x287   : > { %4641 = vmatprep.subr.mxu0 %v2820_v56  ;;  %4654 = vmatprep.subr.mxu1 %v2831_v13 }
 0x288   : > { %4642 = vmatpush3.msra.mxu0 %v2820_v56 }
 0x289   : > { %4643 = vmatprep.subr.mxu0 %v2819_v58 }
 0x28a   : > { %4644 = vmatpush3.msra.mxu0 %v2819_v58  ;;  %v3411_v58 = vld [vmem:[%s6504_s9 + $0x30] sm:$0xff] }
 0x28b   : > { %4645 = vmatprep.subr.mxu0 %v2818_v21 }
 0x28c   : > { %4646 = vmatpush3.msra.mxu0 %v2818_v21  ;;  %v2843_v21 = vld [vmem:[%s6502_s7 + $0x118] sm:$0xff] }
 0x28d   : > { %4647 = vmatprep.subr.mxu0 %v2817_v49 }
 0x28e   : > { %4648 = vmatpush3.msra.mxu0 %v2817_v49  ;;  %v3410_v49 = vld [vmem:[%s6504_s9 + $0x28] sm:$0xff] }
 0x28f   : > { %4649 = vmatprep.subr.mxu0 %v2816_v34 }
 0x290   : > { %4650 = vmatpush3.msra.mxu0 %v2816_v34  ;;  %v2842_v34 = vld [vmem:[%s6502_s7 + $0x110] sm:$0xff] }
 0x291   : > { %4673 = vmatprep.subr.mxu0 %v2839_v31 }
 0x2d6   : > { %v2862_v18 = vpop.permute.xlu0 %2861 }
 0x2d7   : > { %v6081_v6 = vsel %vm1809_vm15, 0.0, %v2862_v18  ;;  %v3408_v18 = vld [vmem:[%s6504_s9 + $0x18] sm:$0xff] }
 0x2d8   : > { %4632 = vmatprep.mubr.msk.f32.mxu1 %vm1127_vm10, %v6081_v6  ;;  %v2961_v8 = vrot.slane %v6081_v6, 1  ;;  %v3047_v47 = vrot.slane %v6081_v6, 2  ;;  %v3133_v61 = vrot.slane %v6081_v6, 3  ;;  %v3219_v45 = vrot.slane %v6081_v6, 4 }
 0x2e1   : > { %v2866_v33 = vpop.permute.xlu1 %2865 }
 0x2e2   : > { %v6086_v0 = vsel %vm1809_vm15, %v2866_v33, 0.0  ;;  %v6088_v22 = vpop.permute.xlu0 %2863  ;;  %v2840_v33 = vld [vmem:[%s6502_s7 + $0x100] sm:$0xff] }
 0x2e3   : > { %v2964_v36 = vrot.slane %v6086_v0, 1  ;;  %4633 = vmatmul.mubr.msk.f32.vlgmr.msra.gmra.mxu1 %vm1127_vm10, %v6088_v22  ;;  %v2962_v9 = vrot.slane %v6088_v22, 1  ;;  %v3048_v16 = vrot.slane %v6088_v22, 2  ;;  %v3134_v42 = vrot.slane %v6088_v22, 3 }
 0x2e4   : > { %4655 = vmatpush3.msra.mxu1 %v2831_v13  ;;  %v3050_v20 = vrot.slane %v6086_v0, 2  ;;  %v3220_v57 = vrot.slane %v6088_v22, 4  ;;  %v3136_v7 = vrot.slane %v6086_v0, 3  ;;  %v2844_v13 = vld [vmem:[%s6502_s7 + $0x120] sm:$0xff]  ;;  %v3222_v6 = vrot.slane %v6086_v0, 4  ;;  %v3406_v0 = vld [vmem:[%s6504_s9 + $0x8] sm:$0xff] }
 0x2e5   : > { %4656 = vmatprep.subr.mxu1 %v2830_v35  ;;  %v2963_v26 = vsel %vm1235_vm11, %v2961_v8, %v2962_v9  ;;  %v3049_v63 = vsel %vm1350_vm12, %v3047_v47, %v3048_v16  ;;  %v2965_v25 = vsel %vm1235_vm11, %v2962_v9, %v2964_v36  ;;  %v3135_v27 = vsel %vm1465_vm13, %v3133_v61, %v3134_v42  ;;  %v3420_v36 = vld [vmem:[%s6504_s9 + $0x78] sm:$0xff]  ;;  %v3405_v47 = vld [vmem:[%s6504_s9] sm:$0xff]  ;;  %v3419_v9 = vld [vmem:[%s6504_s9 + $0x70] sm:$0xff] }
 0x2e6   : > { %4657 = vmatpush3.msra.mxu1 %v2830_v35  ;;  %4651 = vmatprep.mubr.msk.f32.mxu0 %vm1127_vm10, %v2963_v26  ;;  %v3051_v44 = vsel %vm1350_vm12, %v3048_v16, %v3050_v20  ;;  %v3221_v28 = vsel %vm1580_vm14, %v3219_v45, %v3220_v57  ;;  %v3137_v56 = vsel %vm1465_vm13, %v3134_v42, %v3136_v7  ;;  %v3407_v35 = vld [vmem:[%s6504_s9 + $0x10] sm:$0xff]  ;;  %v3418_v22 = vld [vmem:[%s6504_s9 + $0x68] sm:$0xff]  ;;  %v3428_v16 = vld [vmem:[%s6504_s9 + $0xb8] sm:$0xff] }
 0x2e7   : > { %4658 = vmatprep.subr.mxu1 %v2829_v52  ;;  %4670 = vmatprep.mubr.msk.f32.mxu1 %vm1127_vm10, %v3049_v63  ;;  %v3223_v8 = vsel %vm1580_vm14, %v3220_v57, %v3222_v6  ;;  %v3416_v42 = vld [vmem:[%s6504_s9 + $0x58] sm:$0xff]  ;;  %v3415_v26 = vld [vmem:[%s6504_s9 + $0x50] sm:$0xff]  ;;  %v3425_v63 = vld [vmem:[%s6504_s9 + $0xa0] sm:$0xff] }
 0x2e8   : > { %4652 = vmatmul.mubr.msk.f32.vlgmr.msra.gmra.mxu0 %vm1127_vm10, %v2965_v25  ;;  %4659 = vmatpush3.msra.mxu1 %v2829_v52  ;;  %v3417_v52 = vld [vmem:[%s6504_s9 + $0x60] sm:$0xff]  ;;  %v3424_v25 = vld [vmem:[%s6504_s9 + $0x98] sm:$0xff]  ;;  %v3422_v61 = vld [vmem:[%s6504_s9 + $0x88] sm:$0xff] }
 0x2e9   : > { %4674 = vmatpush3.msra.mxu0 %v2839_v31  ;;  %4660 = vmatprep.subr.mxu1 %v2828_v54  ;;  %v3409_v31 = vld [vmem:[%s6504_s9 + $0x20] sm:$0xff]  ;;  %v3439_v57 = vld [vmem:[%s6504_s9 + $0x110] sm:$0xff]  ;;  %v3460_v7 = vld [vmem:[%s6504_s9 + $0x1b8] sm:$0xff] }
 0x2ea   : > { %4675 = vmatprep.subr.mxu0 %v2838_v29  ;;  %4689 = vmatprep.mubr.msk.f32.mxu0 %vm1127_vm10, %v3135_v27  ;;  %v3421_v27 = vld [vmem:[%s6504_s9 + $0x80] sm:$0xff]  ;;  %v3451_v45 = vld [vmem:[%s6504_s9 + $0x170] sm:$0xff] }
 0x2eb   : > { %4661 = vmatpush3.msra.mxu1 %v2828_v54  ;;  %4676 = vmatpush3.msra.mxu0 %v2838_v29  ;;  %v3413_v54 = vld [vmem:[%s6504_s9 + $0x40] sm:$0xff]  ;;  %v3423_v29 = vld [vmem:[%s6504_s9 + $0x90] sm:$0xff] }
 0x2ec   : > { %4662 = vmatprep.subr.mxu1 %v2827_v30  ;;  %4677 = vmatprep.subr.mxu0 %v2837_v17  ;;  %v3441_v20 = vld [vmem:[%s6504_s9 + $0x120] sm:$0xff] }
 0x2ed   : > { %4663 = vmatpush3.msra.mxu1 %v2827_v30  ;;  %4678 = vmatpush3.msra.mxu0 %v2837_v17  ;;  %v3436_v30 = vld [vmem:[%s6504_s9 + $0xf8] sm:$0xff]  ;;  %v3435_v17 = vld [vmem:[%s6504_s9 + $0xf0] sm:$0xff] }
 0x2ee   : > { %4664 = vmatprep.subr.mxu1 %v2826_v24  ;;  %4679 = vmatprep.subr.mxu0 %v2836_v43 }
 0x2ef   : > { %4665 = vmatpush3.msra.mxu1 %v2826_v24  ;;  %4680 = vmatpush3.msra.mxu0 %v2836_v43  ;;  %v3444_v24 = vld [vmem:[%s6504_s9 + $0x138] sm:$0xff]  ;;  %v3433_v43 = vld [vmem:[%s6504_s9 + $0xe0] sm:$0xff] }
 0x2f0   : > { %4666 = vmatprep.subr.mxu1 %v2825_v12  ;;  %4681 = vmatprep.subr.mxu0 %v2835_v3 }
 0x2f1   : > { %4667 = vmatpush3.msra.mxu1 %v2825_v12  ;;  %4682 = vmatpush3.msra.mxu0 %v2835_v3  ;;  %v3432_v12 = vld [vmem:[%s6504_s9 + $0xd8] sm:$0xff]  ;;  %v3431_v3 = vld [vmem:[%s6504_s9 + $0xd0] sm:$0xff] }
 0x2f2   : > { %4668 = vmatprep.subr.mxu1 %v2824_v62  ;;  %4683 = vmatprep.subr.mxu0 %v2834_v23 }
 0x2f3   : > { %4669 = vmatpush3.msra.mxu1 %v2824_v62  ;;  %4684 = vmatpush3.msra.mxu0 %v2834_v23  ;;  %v3440_v62 = vld [vmem:[%s6504_s9 + $0x118] sm:$0xff]  ;;  %v3429_v23 = vld [vmem:[%s6504_s9 + $0xc0] sm:$0xff] }
 0x2f4   : > { %4671 = vmatmul.mubr.msk.f32.vlgmr.msra.gmra.mxu1 %vm1127_vm10, %v3051_v44  ;;  %4685 = vmatprep.subr.mxu0 %v2833_v10  ;;  %v3437_v44 = vld [vmem:[%s6504_s9 + $0x100] sm:$0xff] }
 0x2f5   : > { %4692 = vmatprep.subr.mxu1 %v2847_v38  ;;  %4686 = vmatpush3.msra.mxu0 %v2833_v10  ;;  %v3438_v10 = vld [vmem:[%s6504_s9 + $0x108] sm:$0xff] }
 0x2f6   : > { %4693 = vmatpush3.msra.mxu1 %v2847_v38  ;;  %4708 = vmatprep.mubr.msk.f32.mxu1 %vm1127_vm10, %v3221_v28  ;;  %v3452_v38 = vld [vmem:[%s6504_s9 + $0x178] sm:$0xff]  ;;  %v3447_v28 = vld [vmem:[%s6504_s9 + $0x150] sm:$0xff] }
 0x2f7   : > { %4687 = vmatprep.subr.mxu0 %v2832_v60  ;;  %4694 = vmatprep.subr.mxu1 %v2846_v40 }
 0x2f8   : > { %4688 = vmatpush3.msra.mxu0 %v2832_v60  ;;  %4695 = vmatpush3.msra.mxu1 %v2846_v40  ;;  %v3449_v60 = vld [vmem:[%s6504_s9 + $0x160] sm:$0xff]  ;;  %v3448_v40 = vld [vmem:[%s6504_s9 + $0x158] sm:$0xff] }
 0x2f9   : > { %4690 = vmatmul.mubr.msk.f32.vlgmr.msra.gmra.mxu0 %vm1127_vm10, %v3137_v56  ;;  %4696 = vmatprep.subr.mxu1 %v2845_v1  ;;  %v3445_v56 = vld [vmem:[%s6504_s9 + $0x140] sm:$0xff] }
 0x2fa   : > { %4711 = vmatprep.subr.mxu0 %v3412_v19  ;;  %4697 = vmatpush3.msra.mxu1 %v2845_v1  ;;  %v3457_v1 = vld [vmem:[%s6504_s9 + $0x1a0] sm:$0xff] }
 0x2fb   : > { %4712 = vmatpush3.msra.mxu0 %v3412_v19  ;;  %4727 = vmatprep.mubr.msk.f32.mxu0 %vm1127_vm10, %v5920_v51  ;;  %v2841_v51 = vld [vmem:[%s6502_s7 + $0x108] sm:$0xff]  ;;  %v3456_v19 = vld [vmem:[%s6504_s9 + $0x198] sm:$0xff] }
 0x2fc   : > { %4698 = vmatprep.subr.mxu1 %v2844_v13  ;;  %4713 = vmatprep.subr.mxu0 %v3411_v58 }
 0x2fd   : > { %4699 = vmatpush3.msra.mxu1 %v2844_v13  ;;  %4714 = vmatpush3.msra.mxu0 %v3411_v58  ;;  %v3455_v13 = vld [vmem:[%s6504_s9 + $0x190] sm:$0xff]  ;;  %v3454_v58 = vld [vmem:[%s6504_s9 + $0x188] sm:$0xff] }
 0x2fe   : > { %4700 = vmatprep.subr.mxu1 %v2843_v21  ;;  %4715 = vmatprep.subr.mxu0 %v3410_v49 }
 0x2ff   : > { %4701 = vmatpush3.msra.mxu1 %v2843_v21  ;;  %4716 = vmatpush3.msra.mxu0 %v3410_v49  ;;  %v3453_v21 = vld [vmem:[%s6504_s9 + $0x180] sm:$0xff] }
 0x300   : > { %4702 = vmatprep.subr.mxu1 %v2842_v34  ;;  %4717 = vmatprep.subr.mxu0 %v3409_v31 }
 0x301   : > { %4703 = vmatpush3.msra.mxu1 %v2842_v34  ;;  %4718 = vmatpush3.msra.mxu0 %v3409_v31  ;;  %v4350_v31 = vld [vmem:[%s6501_s6] ss:$0 sm:$0xff] }
 0x302   : > { %4704 = vmatprep.subr.mxu1 %v2841_v51  ;;  %4719 = vmatprep.subr.mxu0 %v3408_v18 }
 0x303   : > { %4705 = vmatpush3.msra.mxu1 %v2841_v51  ;;  %4720 = vmatpush3.msra.mxu0 %v3408_v18 }
 0x304   : > { %4706 = vmatprep.subr.mxu1 %v2840_v33  ;;  %4721 = vmatprep.subr.mxu0 %v3407_v35 }
 0x305   : > { %4707 = vmatpush3.msra.mxu1 %v2840_v33  ;;  %4722 = vmatpush3.msra.mxu0 %v3407_v35 }
 0x306   : > { %4709 = vmatmul.mubr.msk.f32.vlgmr.msra.gmra.mxu1 %vm1127_vm10, %v3223_v8  ;;  %4723 = vmatprep.subr.mxu0 %v3406_v0 }
 0x307   : > { %4730 = vmatprep.subr.mxu1 %v3420_v36  ;;  %4724 = vmatpush3.msra.mxu0 %v3406_v0 }
 0x308   : > { %4731 = vmatpush3.msra.mxu1 %v3420_v36  ;;  %4746 = vmatprep.mubr.msk.f32.mxu1 %vm1127_vm10, %v5944_v41  ;;  %v3427_v41 = vld [vmem:[%s6504_s9 + $0xb0] sm:$0xff] }
 0x309   : > { %4725 = vmatprep.subr.mxu0 %v3405_v47  ;;  %4732 = vmatprep.subr.mxu1 %v3419_v9 }
 0x30a   : > { %4726 = vmatpush3.msra.mxu0 %v3405_v47  ;;  %4733 = vmatpush3.msra.mxu1 %v3419_v9 }
 0x30b   : > { %4728 = vmatmul.mubr.msk.f32.vlgmr.msra.gmra.mxu0 %vm1127_vm10, %v5856_v37  ;;  %4734 = vmatprep.subr.mxu1 %v3418_v22  ;;  %v3426_v37 = vld [vmem:[%s6504_s9 + $0xa8] sm:$0xff] }
 0x30c   : > { %4749 = vmatprep.subr.mxu0 %v3428_v16  ;;  %4735 = vmatpush3.msra.mxu1 %v3418_v22 }
 0x30d   : > { %4750 = vmatpush3.msra.mxu0 %v3428_v16  ;;  %4765 = vmatprep.mubr.msk.f32.mxu0 %vm1127_vm10, %v5947_v2  ;;  %v3414_v2 = vld [vmem:[%s6504_s9 + $0x48] sm:$0xff] }
 0x30e   : > { %4736 = vmatprep.subr.mxu1 %v3417_v52  ;;  %4751 = vmatprep.subr.mxu0 %v3427_v41 }
 0x30f   : > { %4737 = vmatpush3.msra.mxu1 %v3417_v52  ;;  %4752 = vmatpush3.msra.mxu0 %v3427_v41 }
 0x310   : > { %4738 = vmatprep.subr.mxu1 %v3416_v42  ;;  %4753 = vmatprep.subr.mxu0 %v3426_v37 }
 0x311   : > { %4739 = vmatpush3.msra.mxu1 %v3416_v42  ;;  %4754 = vmatpush3.msra.mxu0 %v3426_v37 }
 0x312   : > { %4740 = vmatprep.subr.mxu1 %v3415_v26  ;;  %4755 = vmatprep.subr.mxu0 %v3425_v63 }
 0x313   : > { %4741 = vmatpush3.msra.mxu1 %v3415_v26  ;;  %4756 = vmatpush3.msra.mxu0 %v3425_v63 }
 0x314   : > { %4742 = vmatprep.subr.mxu1 %v3414_v2  ;;  %4757 = vmatprep.subr.mxu0 %v3424_v25 }
 0x315   : > { %4743 = vmatpush3.msra.mxu1 %v3414_v2  ;;  %4758 = vmatpush3.msra.mxu0 %v3424_v25 }
 0x316   : > { %4744 = vmatprep.subr.mxu1 %v3413_v54  ;;  %4759 = vmatprep.subr.mxu0 %v3423_v29 }
 0x317   : > { %4745 = vmatpush3.msra.mxu1 %v3413_v54  ;;  %4760 = vmatpush3.msra.mxu0 %v3423_v29 }
 0x318   : > { %4747 = vmatmul.mubr.msk.f32.vlgmr.msra.gmra.mxu1 %vm1127_vm10, %v5961_v55  ;;  %4761 = vmatprep.subr.mxu0 %v3422_v61  ;;  %v3434_v55 = vld [vmem:[%s6504_s9 + $0xe8] sm:$0xff] }
 0x319   : > { %4768 = vmatprep.subr.mxu1 %v3436_v30  ;;  %4762 = vmatpush3.msra.mxu0 %v3422_v61 }
 0x31a   : > { %4769 = vmatpush3.msra.mxu1 %v3436_v30  ;;  %4784 = vmatprep.mubr.msk.f32.mxu1 %vm1127_vm10, %v5976_v59  ;;  %v3443_v59 = vld [vmem:[%s6504_s9 + $0x130] sm:$0xff] }
 0x31b   : > { %4763 = vmatprep.subr.mxu0 %v3421_v27  ;;  %4770 = vmatprep.subr.mxu1 %v3435_v17 }
 0x31c   : > { %4764 = vmatpush3.msra.mxu0 %v3421_v27  ;;  %4771 = vmatpush3.msra.mxu1 %v3435_v17 }
 0x31d   : > { %4766 = vmatmul.mubr.msk.f32.vlgmr.msra.gmra.mxu0 %vm1127_vm10, %v5979_v15  ;;  %4772 = vmatprep.subr.mxu1 %v3434_v55  ;;  %v3442_v15 = vld [vmem:[%s6504_s9 + $0x128] sm:$0xff] }
 0x31e   : > { %4787 = vmatprep.subr.mxu0 %v3444_v24  ;;  %4773 = vmatpush3.msra.mxu1 %v3434_v55 }
 0x31f   : > { %4788 = vmatpush3.msra.mxu0 %v3444_v24  ;;  %4803 = vmatprep.mubr.msk.f32.mxu0 %vm1127_vm10, %v5982_v32  ;;  %v3430_v32 = vld [vmem:[%s6504_s9 + $0xc8] sm:$0xff] }
 0x320   : > { %4774 = vmatprep.subr.mxu1 %v3433_v43  ;;  %4789 = vmatprep.subr.mxu0 %v3443_v59 }
 0x321   : > { %4775 = vmatpush3.msra.mxu1 %v3433_v43  ;;  %4790 = vmatpush3.msra.mxu0 %v3443_v59 }
 0x322   : > { %4776 = vmatprep.subr.mxu1 %v3432_v12  ;;  %4791 = vmatprep.subr.mxu0 %v3442_v15 }
 0x323   : > { %4777 = vmatpush3.msra.mxu1 %v3432_v12  ;;  %4792 = vmatpush3.msra.mxu0 %v3442_v15 }
 0x324   : > { %4778 = vmatprep.subr.mxu1 %v3431_v3  ;;  %4793 = vmatprep.subr.mxu0 %v3441_v20 }
 0x325   : > { %4779 = vmatpush3.msra.mxu1 %v3431_v3  ;;  %4794 = vmatpush3.msra.mxu0 %v3441_v20 }
 0x326   : > { %4780 = vmatprep.subr.mxu1 %v3430_v32  ;;  %4795 = vmatprep.subr.mxu0 %v3440_v62 }
 0x327   : > { %4781 = vmatpush3.msra.mxu1 %v3430_v32  ;;  %4796 = vmatpush3.msra.mxu0 %v3440_v62 }
 0x328   : > { %4782 = vmatprep.subr.mxu1 %v3429_v23  ;;  %4797 = vmatprep.subr.mxu0 %v3439_v57 }
 0x329   : > { %4783 = vmatpush3.msra.mxu1 %v3429_v23  ;;  %4798 = vmatpush3.msra.mxu0 %v3439_v57 }
 0x32a   : > { %4785 = vmatmul.mubr.msk.f32.vlgmr.msra.gmra.mxu1 %vm1127_vm10, %v5989_v39  ;;  %4799 = vmatprep.subr.mxu0 %v3438_v10  ;;  %v3450_v39 = vld [vmem:[%s6504_s9 + $0x168] sm:$0xff] }
 0x32b   : > { %4806 = vmatprep.subr.mxu1 %v3452_v38  ;;  %4800 = vmatpush3.msra.mxu0 %v3438_v10 }
 0x32c   : > { %4807 = vmatpush3.msra.mxu1 %v3452_v38  ;;  %4822 = vmatprep.mubr.msk.f32.mxu1 %vm1127_vm10, %v6007_v4  ;;  %v3459_v4 = vld [vmem:[%s6504_s9 + $0x1b0] sm:$0xff] }
 0x32d   : > { %4801 = vmatprep.subr.mxu0 %v3437_v44  ;;  %4808 = vmatprep.subr.mxu1 %v3451_v45 }
 0x32e   : > { %4802 = vmatpush3.msra.mxu0 %v3437_v44  ;;  %4809 = vmatpush3.msra.mxu1 %v3451_v45 }
 0x32f   : > { %4804 = vmatmul.mubr.msk.f32.vlgmr.msra.gmra.mxu0 %vm1127_vm10, %v6010_v5  ;;  %4810 = vmatprep.subr.mxu1 %v3450_v39  ;;  %v3458_v5 = vld [vmem:[%s6504_s9 + $0x1a8] sm:$0xff] }
 0x330   : > { %4825 = vmatprep.subr.mxu0 %v3460_v7  ;;  %4811 = vmatpush3.msra.mxu1 %v3450_v39 }
 0x331   : > { %4826 = vmatpush3.msra.mxu0 %v3460_v7  ;;  %4841 = vmatprep.mubr.msk.f32.mxu0 %vm1127_vm10, %v6016_v11  ;;  %v3446_v11 = vld [vmem:[%s6504_s9 + $0x148] sm:$0xff]  ;;  %v4577_v49 = vpop.f32.mrf.mxu0 }
 0x332   : > { %4812 = vmatprep.subr.mxu1 %v3449_v60  ;;  %4827 = vmatprep.subr.mxu0 %v3459_v4  ;;  %v2534_v18 = vadd.f32 %v4577_v49, %v4350_v31 }
 0x333   : > { %4813 = vmatpush3.msra.mxu1 %v3449_v60  ;;  %4828 = vmatpush3.msra.mxu0 %v3459_v4  ;;  %v2524_v51 = vpop.f32.mrf.mxu0 }
 0x334   : > { %4814 = vmatprep.subr.mxu1 %v3448_v40  ;;  %4829 = vmatprep.subr.mxu0 %v3458_v5  ;;  %v2533_v9 = vadd.f32 %v4350_v31, %v2524_v51 }
 0x335   : > { %4815 = vmatpush3.msra.mxu1 %v3448_v40  ;;  %4830 = vmatpush3.msra.mxu0 %v3458_v5 }
 0x336   : > { %4816 = vmatprep.subr.mxu1 %v3447_v28  ;;  %4831 = vmatprep.subr.mxu0 %v3457_v1  ;;  %v4596_v34 = vpop.f32.mrf.mxu1 }
 0x337   : > { %4817 = vmatpush3.msra.mxu1 %v3447_v28  ;;  %4832 = vmatpush3.msra.mxu0 %v3457_v1  ;;  %v2621_v33 = vadd.f32 %v4596_v34, %v2534_v18 }
 0x338   : > { %4818 = vmatprep.subr.mxu1 %v3446_v11  ;;  %4833 = vmatprep.subr.mxu0 %v3456_v19 }
 0x339   : > { %4819 = vmatpush3.msra.mxu1 %v3446_v11  ;;  %4834 = vmatpush3.msra.mxu0 %v3456_v19 }
 0x33a   : > { %4820 = vmatprep.subr.mxu1 %v3445_v56  ;;  %4835 = vmatprep.subr.mxu0 %v3455_v13 }
 0x33b   : > { %4821 = vmatpush3.msra.mxu1 %v3445_v56  ;;  %4836 = vmatpush3.msra.mxu0 %v3455_v13 }
 0x33c   : > { %4823 = vmatmul.mubr.msk.f32.vlgmr.msra.gmra.mxu1 %vm1127_vm10, %v6019_v14  ;;  %4837 = vmatprep.subr.mxu0 %v3454_v58  ;;  %v2611_v14 = vpop.f32.mrf.mxu1 }
 0x33d   : > { %4838 = vmatpush3.msra.mxu0 %v3454_v58  ;;  %v2620_v52 = vadd.f32 %v2611_v14, %v2533_v9 }
 0x33e   : > { %4839 = vmatprep.subr.mxu0 %v3453_v21 }
 0x33f   : > { %4840 = vmatpush3.msra.mxu0 %v3453_v21 }
 0x340   : > { %4842 = vmatmul.mubr.msk.f32.vlgmr.msra.gmra.mxu0 %vm1127_vm10, %v6022_v53  ;;  %v4357_v53 = vld [vmem:[%s6503_s8] ss:$0 sm:$0xff] }
 0x341   : > { %v4615_v6 = vpop.f32.mrf.mxu0 }
 0x342   : > { %v2707_v0 = vadd.f32 %v4615_v6, %v2621_v33 }
 0x343   : > { %v2697_v36 = vpop.f32.mrf.mxu0 }
 0x344   : > { %v2727_v22 = vcombine.high %v2707_v0, %v2707_v0  ;;  %v2734_v41 = vrot.slane %v2707_v0, %v5067_v50  ;;  %v2706_v37 = vadd.f32 %v2697_v36, %v2620_v52 }
 0x346   : > { %v2741_v63 = vrot.slane %v2727_v22, %v5067_v50  ;;  %v2742_v54 = vcombine.high %v2734_v41, %v2734_v41  ;;  %v2780_v29 = vsel %vm1809_vm15, %v2734_v41, -inf  ;;  %v2710_v17 = vcombine.high %v2706_v37, %v2706_v37 }
 0x347   : > { %v2781_v59 = vrot.slane %v2780_v29, 4  ;;  %v2717_v62 = vrot.slane %v2706_v37, %v5067_v50 }
 0x348   : > { %v2743_v43 = vcombine.high %v2741_v63, %v2741_v63  ;;  %v2787_v15 = vsel %vm1809_vm15, %v2742_v54, -inf  ;;  %v2794_v3 = vsel %vm1809_vm15, %v2741_v63, -inf  ;;  %v2724_v57 = vrot.slane %v2710_v17, %v5067_v50 }
 0x349   : > { %v2782_v44 = vmax.f32 %v2780_v29, %v2781_v59  ;;  %v2788_v45 = vrot.slane %v2787_v15, 4  ;;  %v2795_v39 = vrot.slane %v2794_v3, 4  ;;  %v2725_v4 = vcombine.high %v2717_v62, %v2717_v62 }
 0x34a   : > { %v2801_v7 = vsel %vm1809_vm15, %v2743_v43, -inf  ;;  %v2726_v40 = vcombine.high %v2724_v57, %v2724_v57  ;;  %v2752_v5 = vsel %vm1809_vm15, %v2717_v62, -inf  ;;  %v2766_v28 = vsel %vm1809_vm15, %v2724_v57, -inf }
 0x34b   : > { %v2783_v11 = vrot.slane %v2782_v44, 2  ;;  %v2789_v19 = vmax.f32 %v2787_v15, %v2788_v45  ;;  %v2796_v56 = vmax.f32 %v2794_v3, %v2795_v39  ;;  %v2802_v13 = vrot.slane %v2801_v7, 4 }
 0x34c   : > { %v2753_v21 = vrot.slane %v2752_v5, 4  ;;  %v2759_v49 = vsel %vm1809_vm15, %v2725_v4, -inf  ;;  %v2767_v34 = vrot.slane %v2766_v28, 4  ;;  %v2773_v51 = vsel %vm1809_vm15, %v2726_v40, -inf }
 0x34d   : > { %v2784_v6 = vmax.f32 %v2782_v44, %v2783_v11  ;;  %v2790_v33 = vrot.slane %v2789_v19, 2  ;;  %v2803_v0 = vmax.f32 %v2801_v7, %v2802_v13  ;;  %v2760_v36 = vrot.slane %v2759_v49, 4 }
 0x34e   : > { %v2768_v9 = vmax.f32 %v2766_v28, %v2767_v34  ;;  %v2774_v22 = vrot.slane %v2773_v51, 4 }
 0x34f   : > { %v2785_v41 = vrot.slane %v2784_v6, 1  ;;  %v2761_v63 = vmax.f32 %v2759_v49, %v2760_v36 }
 0x351   : > { %v2762_v62 = vrot.slane %v2761_v63, 2 }
 0x353   : > { %v2763_v49 = vmax.f32 %v2761_v63, %v2762_v62 }
 0x3a3   : > { %v4634_v35 = vpop.f32.mrf.mxu1 }
 0x3a4   : > { %v2959_v26 = vadd.f32 %v4634_v35, %v4357_v53  ;;  %v2797_v35 = vrot.slane %v2796_v56, 2 }
 0x3a5   : > { %v2949_v8 = vpop.f32.mrf.mxu1 }
 0x3a6   : > { %v2958_v61 = vadd.f32 %v4357_v53, %v2949_v8  ;;  %v2798_v37 = vmax.f32 %v2796_v56, %v2797_v35  ;;  %v4368_v56 = vld [vmem:[%s6505_s10] ss:$0 sm:$0xff] }
 0x3a8   : > { %v4653_v47 = vpop.f32.mrf.mxu0 }
 0x3a9   : > { %v3046_v30 = vadd.f32 %v4653_v47, %v2959_v26  ;;  %v2754_v47 = vmax.f32 %v2752_v5, %v2753_v21  ;;  %v2804_v26 = vrot.slane %v2803_v0, 2 }
 0x3aa   : > { %v3036_v42 = vpop.f32.mrf.mxu0 }
 0x3ab   : > { %v3045_v55 = vadd.f32 %v3036_v42, %v2958_v61  ;;  %v2791_v42 = vmax.f32 %v2789_v19, %v2790_v33  ;;  %v2755_v29 = vrot.slane %v2754_v47, 2  ;;  %v2769_v61 = vrot.slane %v2768_v9, 2 }
 0x3ac   : > { %v2805_v15 = vmax.f32 %v2803_v0, %v2804_v26 }
 0x3ad   : > { %v2756_v4 = vmax.f32 %v2754_v47, %v2755_v29  ;;  %v2770_v40 = vmax.f32 %v2768_v9, %v2769_v61 }
 0x3ae   : > { %v2806_v28 = vrot.slane %v2805_v15, 1 }
 0x3af   : > { %v2757_v33 = vrot.slane %v2756_v4, 1  ;;  %v2771_v35 = vrot.slane %v2770_v40, 1 }
 0x3b0   : > { %v6429_v47 = vmax.f32 %v2805_v15, %v2806_v28 }
 0x3b1   : > { %v6431_v29 = vmax.f32 %v2756_v4, %v2757_v33 }
 0x3b4   : > { %v4672_v16 = vpop.f32.mrf.mxu1 }
 0x3b5   : > { %v3132_v24 = vadd.f32 %v4672_v16, %v3046_v30  ;;  %v2775_v30 = vmax.f32 %v2773_v51, %v2774_v22 }
 0x3b6   : > { %v3122_v2 = vpop.f32.mrf.mxu1 }
 0x3b7   : > { %v3131_v20 = vadd.f32 %v3122_v2, %v3045_v55  ;;  %v2776_v5 = vrot.slane %v2775_v30, 2 }
 0x3b9   : > { %v4691_v25 = vpop.f32.mrf.mxu0  ;;  %v2777_v0 = vmax.f32 %v2775_v30, %v2776_v5 }
 0x3ba   : > { %v3218_v32 = vadd.f32 %v4691_v25, %v3132_v24 }
 0x3bb   : > { %v3208_v12 = vpop.f32.mrf.mxu0  ;;  %v2778_v61 = vrot.slane %v2777_v0, 1 }
 0x3bc   : > { %v3217_v10 = vadd.f32 %v3208_v12, %v3131_v20  ;;  %v2792_v12 = vrot.slane %v2791_v42, 1 }
 0x3c6   : > { %v4710_v27 = vpop.f32.mrf.mxu1 }
 0x3c7   : > { %v3304_v38 = vadd.f32 %v4710_v27, %v3218_v32  ;;  %v2799_v32 = vrot.slane %v2798_v37, 1 }
 0x3c8   : > { %v3294_v23 = vpop.f32.mrf.mxu1 }
 0x3c9   : > { %v3303_v60 = vadd.f32 %v3294_v23, %v3217_v10  ;;  %v3324_v1 = vcombine.high %v3304_v38, %v3304_v38  ;;  %v3331_v31 = vrot.slane %v3304_v38, %v5067_v50  ;;  %v6427_v21 = vmax.f32 %v2798_v37, %v2799_v32 }
 0x3cb   : > { %v3307_v58 = vcombine.high %v3303_v60, %v3303_v60  ;;  %v3338_v18 = vrot.slane %v3324_v1, %v5067_v50  ;;  %v3314_v14 = vrot.slane %v3303_v60, %v5067_v50  ;;  %v3339_v53 = vcombine.high %v3331_v31, %v3331_v31  ;;  %v4729_v17 = vpop.f32.mrf.mxu0 }
 0x3cc   : > { %v3377_v2 = vsel %vm1809_vm15, %v3331_v31, -inf  ;;  %v6420_v60 = vmax.f32 %v2784_v6, %v2785_v41  ;;  %v3582_v36 = vadd.f32 %v4729_v17, %v4368_v56 }
 0x3cd   : > { %v3321_v8 = vrot.slane %v3307_v58, %v5067_v50  ;;  %v3340_v16 = vcombine.high %v3338_v18, %v3338_v18  ;;  %v3322_v52 = vcombine.high %v3314_v14, %v3314_v14  ;;  %v3384_v27 = vsel %vm1809_vm15, %v3339_v53, -inf  ;;  %v3572_v7 = vpop.f32.mrf.mxu0 }
 0x3ce   : > { %v3391_v55 = vsel %vm1809_vm15, %v3338_v18, -inf  ;;  %v3349_v43 = vsel %vm1809_vm15, %v3314_v14, -inf  ;;  %v3378_v3 = vrot.slane %v3377_v2, 4  ;;  %v3385_v23 = vrot.slane %v3384_v27, 4 }
 0x3cf   : > { %v3323_v25 = vcombine.high %v3321_v8, %v3321_v8  ;;  %v3363_v54 = vsel %vm1809_vm15, %v3321_v8, -inf  ;;  %v3398_v24 = vsel %vm1809_vm15, %v3340_v16, -inf  ;;  %v3356_v59 = vsel %vm1809_vm15, %v3322_v52, -inf }
 0x3d0   : > { %v3364_v20 = vrot.slane %v3363_v54, 4  ;;  %v3392_v38 = vrot.slane %v3391_v55, 4  ;;  %v3399_v44 = vrot.slane %v3398_v24, 4  ;;  %v3350_v45 = vrot.slane %v3349_v43, 4 }
 0x3d1   : > { %v3370_v57 = vsel %vm1809_vm15, %v3323_v25, -inf  ;;  %v3357_v39 = vrot.slane %v3356_v59, 4  ;;  %v3379_v1 = vmax.f32 %v3377_v2, %v3378_v3  ;;  %v6425_v58 = vmax.f32 %v2791_v42, %v2792_v12 }
 0x3d2   : > { %v3365_v11 = vmax.f32 %v3363_v54, %v3364_v20  ;;  %v3371_v19 = vrot.slane %v3370_v57, 4  ;;  %v3386_v34 = vmax.f32 %v3384_v27, %v3385_v23  ;;  %v3393_v51 = vmax.f32 %v3391_v55, %v3392_v38 }
 0x3d3   : > { %v3400_v18 = vmax.f32 %v3398_v24, %v3399_v44  ;;  %v3351_v14 = vmax.f32 %v3349_v43, %v3350_v45  ;;  %v3358_v6 = vmax.f32 %v3356_v59, %v3357_v39  ;;  %v3380_v9 = vrot.slane %v3379_v1, 2 }
 0x3d4   : > { %v3366_v22 = vrot.slane %v3365_v11, 2  ;;  %v3372_v53 = vmax.f32 %v3370_v57, %v3371_v19  ;;  %v2764_v52 = vrot.slane %v2763_v49, 1  ;;  %v3387_v41 = vrot.slane %v3386_v34, 2 }
 0x3d5   : > { %v3581_v42 = vadd.f32 %v4368_v56, %v3572_v7  ;;  %v3394_v26 = vrot.slane %v3393_v51, 2  ;;  %v3401_v63 = vrot.slane %v3400_v18, 2  ;;  %v3352_v2 = vrot.slane %v3351_v14, 2 }
 0x3d6   : > { %v3359_v25 = vrot.slane %v3358_v6, 2  ;;  %v6433_v55 = vmax.f32 %v2770_v40, %v2771_v35  ;;  %v3381_v24 = vmax.f32 %v3379_v1, %v3380_v9  ;;  %v3367_v43 = vmax.f32 %v3365_v11, %v3366_v22 }
 0x3d7   : > { %v3373_v59 = vrot.slane %v3372_v53, 2  ;;  %v6435_v12 = vmax.f32 %v2763_v49, %v2764_v52  ;;  %v3388_v15 = vmax.f32 %v3386_v34, %v3387_v41  ;;  %v3395_v62 = vmax.f32 %v3393_v51, %v3394_v26 }
 0x3d8   : > { %v4748_v10 = vpop.f32.mrf.mxu1  ;;  %v3402_v23 = vmax.f32 %v3400_v18, %v3401_v63  ;;  %v3353_v57 = vmax.f32 %v3351_v14, %v3352_v2  ;;  %v6437_v44 = vmax.f32 %v2777_v0, %v2778_v61  ;;  %v4200_v45 = vmax.f32 %v6431_v29, %v6420_v60 }
 0x3d9   : > { %v3669_v37 = vadd.f32 %v4748_v10, %v3582_v36  ;;  %v3360_v10 = vmax.f32 %v3358_v6, %v3359_v25  ;;  %v4202_v4 = vmax.f32 %v6433_v55, %v6427_v21  ;;  %v3382_v40 = vrot.slane %v3381_v24, 1 }
 0x3da   : > { %v3659_v31 = vpop.f32.mrf.mxu1  ;;  %v3368_v5 = vrot.slane %v3367_v43, 1  ;;  %v3374_v28 = vmax.f32 %v3372_v53, %v3373_v59  ;;  %v3389_v11 = vrot.slane %v3388_v15, 1  ;;  %v3403_v49 = vrot.slane %v3402_v23, 1 }
 0x3db   : > { %v3668_v30 = vadd.f32 %v3659_v31, %v3581_v42  ;;  %v3354_v34 = vrot.slane %v3353_v57, 1  ;;  %v3361_v31 = vrot.slane %v3360_v10, 1  ;;  %v4201_v18 = vmax.f32 %v6435_v12, %v6425_v58 }
 0x3dc   : > { %v4203_v14 = vmax.f32 %v6437_v44, %v6429_v47  ;;  %v6447_v35 = vmax.f32 %v3381_v24, %v3382_v40  ;;  %v3369_v0 = vmax.f32 %v3367_v43, %v3368_v5  ;;  %v3375_v36 = vrot.slane %v3374_v28, 1 }
 0x3dd   : > { %v4767_v13 = vpop.f32.mrf.mxu0  ;;  %v6451_v53 = vmax.f32 %v3388_v15, %v3389_v11  ;;  %v6454_v26 = vmax.f32 %v3353_v57, %v3354_v34  ;;  %v6456_v63 = vmax.f32 %v3360_v10, %v3361_v31 }
 0x3de   : > { %v3755_v27 = vadd.f32 %v4767_v13, %v3669_v37  ;;  %v3396_v13 = vrot.slane %v3395_v62, 1  ;;  %v3404_v37 = vmax.f32 %v3402_v23, %v3403_v49 }
 0x3df   : > { %v3745_v16 = vpop.f32.mrf.mxu0 }
 0x3e0   : > { %v3754_v3 = vadd.f32 %v3745_v16, %v3668_v30  ;;  %v3397_v42 = vmax.f32 %v3395_v62, %v3396_v13  ;;  %v3376_v30 = vmax.f32 %v3374_v28, %v3375_v36 }
 0x3ea   : > { %v4786_v8 = vpop.f32.mrf.mxu1 }
 0x3eb   : > { %v3841_v20 = vadd.f32 %v4786_v8, %v3755_v27  ;;  %v4868_v8 = vmov 1966171168   ;;  %v4209_v27 = vmax.f32 %v3369_v0, %v3397_v42 }
 0x3ec   : > { %v3831_v17 = vpop.f32.mrf.mxu1  ;;  %v6449_v9 = vunpack.c.l.s4 %v4868_v8 }
 0x3ed   : > { %v3840_v39 = vadd.f32 %v3831_v17, %v3754_v3 }
 0x3ef   : > { %v4805_v54 = vpop.f32.mrf.mxu0 }
 0x3f0   : > { %v3927_v7 = vadd.f32 %v4805_v54, %v3841_v20 }
 0x3f1   : > { %v3917_v38 = vpop.f32.mrf.mxu0 }
 0x3f2   : > { %v3926_v19 = vadd.f32 %v3917_v38, %v3840_v39 }
 0x3fc   : > { %v4824_v32 = vpop.f32.mrf.mxu1 }
 0x3fd   : > { %v4013_v56 = vadd.f32 %v4824_v32, %v3927_v7 }
 0x3fe   : > { %v4003_v1 = vpop.f32.mrf.mxu1 }
 0x3ff   : > { %v4012_v6 = vadd.f32 %v4003_v1, %v3926_v19 }
 0x400   : > { %v4843_v51 = vpop.f32.mrf.mxu0 }
 0x401   : > { %v4099_v33 = vadd.f32 %v4843_v51, %v4013_v56  ;;  %v4210_v56 = vmax.f32 %v3376_v30, %v3404_v37  ;;  %v4208_v37 = vmax.f32 %v6456_v63, %v6451_v53  ;;  %v4205_v53 = vmax.f32 %v4202_v4, %v4203_v14 }
 0x402   : > { %v4089_v22 = vpop.f32.mrf.mxu0 }
 0x403   : > { %v4119_v16 = vcombine.high %v4099_v33, %v4099_v33  ;;  %v4126_v52 = vrot.slane %v4099_v33, %v5067_v50  ;;  %v4098_v41 = vadd.f32 %v4089_v22, %v4012_v6 }
 0x405   : > { %v4133_v2 = vrot.slane %v4119_v16, %v5067_v50  ;;  %v4134_v25 = vcombine.high %v4126_v52, %v4126_v52  ;;  %v4172_v54 = vsel %vm1809_vm15, %v4126_v52, -inf  ;;  %v4102_v61 = vcombine.high %v4098_v41, %v4098_v41 }
 0x406   : > { %v4173_v17 = vrot.slane %v4172_v54, 4  ;;  %v4109_v24 = vrot.slane %v4098_v41, %v5067_v50 }
 0x407   : > { %v4135_v43 = vcombine.high %v4133_v2, %v4133_v2  ;;  %v4179_v59 = vsel %vm1809_vm15, %v4134_v25, -inf  ;;  %v4186_v15 = vsel %vm1809_vm15, %v4133_v2, -inf  ;;  %v4116_v3 = vrot.slane %v4102_v61, %v5067_v50 }
 0x408   : > { %v4174_v20 = vmax.f32 %v4172_v54, %v4173_v17  ;;  %v4180_v32 = vrot.slane %v4179_v59, 4  ;;  %v4187_v62 = vrot.slane %v4186_v15, 4  ;;  %v4117_v23 = vcombine.high %v4109_v24, %v4109_v24 }
 0x409   : > { %v4193_v57 = vsel %vm1809_vm15, %v4135_v43, -inf  ;;  %v4118_v10 = vcombine.high %v4116_v3, %v4116_v3  ;;  %v4144_v38 = vsel %vm1809_vm15, %v4109_v24, -inf  ;;  %v4158_v39 = vsel %vm1809_vm15, %v4116_v3, -inf }
 0x40a   : > { %v4175_v7 = vrot.slane %v4174_v20, 2  ;;  %v4181_v40 = vmax.f32 %v4179_v59, %v4180_v32  ;;  %v4188_v5 = vmax.f32 %v4186_v15, %v4187_v62  ;;  %v4194_v28 = vrot.slane %v4193_v57, 4 }
 0x40b   : > { %v4145_v1 = vrot.slane %v4144_v38, 4  ;;  %v4151_v11 = vsel %vm1809_vm15, %v4117_v23, -inf  ;;  %v4159_v19 = vrot.slane %v4158_v39, 4  ;;  %v4165_v50 = vsel %vm1809_vm15, %v4118_v10, -inf }
 0x40c   : > { %v4182_v13 = vrot.slane %v4181_v40, 2  ;;  %v4189_v49 = vrot.slane %v4188_v5, 2  ;;  %v4195_v34 = vmax.f32 %v4193_v57, %v4194_v28  ;;  %v4152_v51 = vrot.slane %v4151_v11, 4 }
 0x40d   : > { %v4146_v31 = vmax.f32 %v4144_v38, %v4145_v1  ;;  %v4160_v6 = vmax.f32 %v4158_v39, %v4159_v19  ;;  %v4166_v33 = vrot.slane %v4165_v50, 4  ;;  %v4176_v0 = vmax.f32 %v4174_v20, %v4175_v7 }
 0x40e   : > { %v4183_v36 = vmax.f32 %v4181_v40, %v4182_v13  ;;  %v4190_v8 = vmax.f32 %v4188_v5, %v4189_v49  ;;  %v4196_v22 = vrot.slane %v4195_v34, 2  ;;  %v4153_v52 = vmax.f32 %v4151_v11, %v4152_v51 }
 0x40f   : > { %v4147_v16 = vrot.slane %v4146_v31, 2  ;;  %v4161_v41 = vrot.slane %v4160_v6, 2  ;;  %v4167_v42 = vmax.f32 %v4165_v50, %v4166_v33  ;;  %v4207_v2 = vmax.f32 %v6454_v26, %v6447_v35 }
 0x410   : > { %v4212_v25 = vmax.f32 %v4209_v27, %v4210_v56  ;;  %v4197_v54 = vmax.f32 %v4195_v34, %v4196_v22  ;;  %v4154_v30 = vrot.slane %v4153_v52, 2  ;;  %v4177_v43 = vrot.slane %v4176_v0, 1 }
 0x411   : > { %v4148_v61 = vmax.f32 %v4146_v31, %v4147_v16  ;;  %v4162_v17 = vmax.f32 %v4160_v6, %v4161_v41  ;;  %v4168_v24 = vrot.slane %v4167_v42, 2  ;;  %v4184_v59 = vrot.slane %v4183_v36, 1 }
 0x412   : > { %v4191_v15 = vrot.slane %v4190_v8, 1  ;;  %v4198_v3 = vrot.slane %v4197_v54, 1  ;;  %v4155_v32 = vmax.f32 %v4153_v52, %v4154_v30  ;;  %v4204_v35 = vmax.f32 %v4200_v45, %v4201_v18 }
 0x413   : > { %v4149_v20 = vrot.slane %v4148_v61, 1  ;;  %v4163_v62 = vrot.slane %v4162_v17, 1  ;;  %v4169_v23 = vmax.f32 %v4167_v42, %v4168_v24  ;;  %v4211_v26 = vmax.f32 %v4207_v2, %v4208_v37 }
 0x414   : > { %v4156_v27 = vrot.slane %v4155_v32, 1  ;;  %v4227_v39 = vunpack.c.0.s8 %v6449_v9  ;;  %v4178_v58 = vmax.f32 %v4176_v0, %v4177_v43  ;;  %v4185_v12 = vmax.f32 %v4183_v36, %v4184_v59 }
 0x415   : > { %v4150_v63 = vmax.f32 %v4148_v61, %v4149_v20  ;;  %v4164_v57 = vmax.f32 %v4162_v17, %v4163_v62  ;;  %v4170_v10 = vrot.slane %v4169_v23, 1  ;;  %v4213_v38 = vmax.f32 %v4211_v26, %v4212_v25 }
 0x416   : > { %v4192_v60 = vmax.f32 %v4190_v8, %v4191_v15  ;;  %v4199_v29 = vmax.f32 %v4197_v54, %v4198_v3  ;;  %v4157_v45 = vmax.f32 %v4155_v32, %v4156_v27  ;;  %v4206_v47 = vmax.f32 %v4204_v35, %v4205_v53 }
 0x417   : > { %v4171_v18 = vmax.f32 %v4169_v23, %v4170_v10  ;;  %v4214_v44 = vmax.f32 %v4150_v63, %v4178_v58  ;;  %v4230_v14 = vsub.s32 %v4227_v39, %v5059_v48 }
 0x418   : > { %v4215_v7 = vmax.f32 %v4157_v45, %v4185_v12  ;;  %v4216_v21 = vmax.f32 %v4164_v57, %v4192_v60  ;;  %v4224_v4 = vcombine.low %v4206_v47, %v4213_v38 }
 0x419   : > { %v4217_v55 = vmax.f32 %v4171_v18, %v4199_v29 }
 0x41a   : > { %v4218_v40 = vmax.f32 %v4214_v44, %v4215_v7  ;;  %v4231_v9 = vrot.slane %v4224_v4, %v4230_v14 }
 0x41b   : > { %v4219_v5 = vmax.f32 %v4216_v21, %v4217_v55 }
 0x41d   : > { %v4220_v28 = vmax.f32 %v4218_v40, %v4219_v5 }
 0x41f   : > { %v4238_v1 = vrot.slane %v4220_v28, %v4230_v14 }
 0x421   : > { %v4239_v11 = vcombine.low %v4231_v9, %v4238_v1 }
 0x423   : > { %v4246_v19 = vrot.slane %v4239_v11, %v4230_v14 }
 0x425   : > { %4252 = vst.msk [vmem:[%s384_s27] sm:$0x7] %vm4250_vm1, %v4246_v19 }
 0x426 PF: > { %s21_s17 = sadd.s32 1, %s4863_s17  }
 0x427   : > { %p18_p4 = scmp.ge.s32.totalorder %s21_s17, 4  }
 0x429   :  { %20 = sbr.rel (!%p18_p4) target bundleno = 1 (0x1), region = 94 }

</bundles_post_ra>
